<compile_context>
chip_gen: v5e
topology: v5e:2x2
jax: 0.10.0
libtpu: 0.0.40
codegen_flags: <defaults>
</compile_context>

<pallas_src>
import functools

import numpy as np
import jax
import jax.numpy as jnp
from jax import lax
from jax.experimental import pallas as pl
from jax.experimental.pallas import tpu as pltpu

N_CH = 16          # visible channels
N_MEM = 8          # memory channels
N_HW = 4           # hardware channels
N_HEADS = 4        # attention heads
HEAD_HID = 32      # per-head hidden width
CT = N_CH + N_MEM + N_HW        # 28 total channels
CT_P = 32                       # channels padded to an aligned sublane group
PERC = CT * 4                   # 112 perception features
UPD = N_CH + N_MEM              # 24 updated channels


# ----------------------------------------------------------------------------
# Pallas kernel: one grid step processes bt images lane-batched as (32, bt*HW).
# ----------------------------------------------------------------------------
def _nca_kernel(x_ref, mask_ref,
                w1_ref, b1_ref,
                wf_ref, bfh_ref,
                wp2_ref, bp2_ref,
                wa_ref, ba_ref,
                wh1a_ref, wh1b_ref, bh1_ref,
                wh2_ref, bh2_ref,
                wh3_ref, bh3_ref,
                out_ref, mm_ref, *, H, W, bt):
    HW = H * W
    LHW = bt * HW
    f32 = jnp.float32
    bf16 = jnp.bfloat16

    xe = x_ref[0]                                    # (32, LHW) f32, channel-major

    up_ok = mask_ref[0:1, :]                         # row >= 1   (neighbor above exists)
    dn_ok = mask_ref[1:2, :]                         # row <= H-2 (neighbor below exists)
    lf_ok = mask_ref[2:3, :]                         # col >= 1   (left neighbor exists)
    rt_ok = mask_ref[3:4, :]                         # col <= W-2 (right neighbor exists)

    # ---- separable 3x3 stencils via XLU lane rolls (zero-padding semantics) ----
    up = pltpu.roll(xe, shift=W, axis=1) * up_ok         # x[r-1, c]
    dn = pltpu.roll(xe, shift=LHW - W, axis=1) * dn_ok   # x[r+1, c]

    s_v = up + 2.0 * xe + dn        # vertical (1,2,1)  -> sobel_x
    d_v = dn - up                   # vertical (-1,0,1) -> sobel_y
    s_r = up + xe + dn              # vertical (1,1,1)  -> laplacian

    def nb_right(t):                # value at column c+1, edge-masked
        return pltpu.roll(t, shift=LHW - 1, axis=1) * rt_ok

    def nb_left(t):                 # value at column c-1, edge-masked
        return pltpu.roll(t, shift=1, axis=1) * lf_ok

    sob_x = nb_right(s_v) - nb_left(s_v)
    sob_y = nb_left(d_v) + 2.0 * d_v + nb_right(d_v)
    lap = nb_left(s_r) + s_r + nb_right(s_r) - 9.0 * xe

    # ---- alive mask + 3x3 max-pool (single compare at the end) -----------------
    x3 = xe[3:4, :]                                       # (1, LHW)
    m_v = jnp.maximum(jnp.maximum(up[3:4, :], dn[3:4, :]), x3)
    m_h = jnp.maximum(jnp.maximum(nb_left(m_v), nb_right(m_v)), m_v)
    alive_ext = (m_h > 0.1).astype(f32)                   # (1, LHW)

    # per-image alive ratio, broadcast back over each image's HW lane segment
    alive = (x3 > 0.1).astype(f32)
    ar_parts = []
    for b in range(bt):
        s = jnp.sum(alive[:, b * HW:(b + 1) * HW]) * (1.0 / HW)   # scalar per image
        ar_parts.append(jnp.broadcast_to(s, (1, HW)))
    ar = ar_parts[0] if bt == 1 else jnp.concatenate(ar_parts, axis=1)   # (1, LHW)

    # ---- perception features -> bf16 scratch slabs (MXU operand) ---------------
    mm_ref[0:CT_P, :] = xe.astype(bf16)
    mm_ref[CT_P:2 * CT_P, :] = sob_x.astype(bf16)
    mm_ref[2 * CT_P:3 * CT_P, :] = sob_y.astype(bf16)
    mm_ref[3 * CT_P:4 * CT_P, :] = lap.astype(bf16)

    # perception MLP layer 1: (128,128) x (128, LHW), f32 accumulation
    h1 = jnp.maximum(
        jnp.dot(w1_ref[...], mm_ref[...], preferred_element_type=f32) + b1_ref[...], 0.0)

    # fused (perception layer 2 + all 4 heads' first layer): single 128-wide matmul
    ph = jnp.maximum(
        jnp.dot(wf_ref[...], h1.astype(bf16), preferred_element_type=f32) + bfh_ref[...], 0.0)

    # ---- hardware-channel attention (1/temperature folded into wa/ba) ----------
    hw_ch = xe[N_CH + N_MEM:CT, :]                        # (4, LHW)
    wa = wa_ref[...]
    logits = ba_ref[...] + wa[:, 0:1] * hw_ch[0:1, :]
    for k in range(1, N_HW):
        logits = logits + wa[:, k:k + 1] * hw_ch[k:k + 1, :]
    logits = logits - jnp.max(logits, axis=0, keepdims=True)
    e = jnp.exp(logits)
    attn = e * pl.reciprocal(jnp.sum(e, axis=0, keepdims=True), approx=True)   # (4, LHW)

    # fold attention into the head inputs; reuse the scratch slab-by-slab
    for i in range(N_HEADS):
        mm_ref[i * HEAD_HID:(i + 1) * HEAD_HID, :] = (
            ph[i * HEAD_HID:(i + 1) * HEAD_HID, :] * attn[i:i + 1, :]).astype(bf16)

    # heads' second layers collapse into one (24,128)x(128,LHW) matmul;
    # bias term bp2 . attn is a K=4 contraction -> 4 broadcast FMAs on the VPU
    bp2 = bp2_ref[...]                                    # (24, 4)
    bias24 = bp2[:, 0:1] * attn[0:1, :]
    for i in range(1, N_HEADS):
        bias24 = bias24 + bp2[:, i:i + 1] * attn[i:i + 1, :]
    weighted = (jnp.dot(wp2_ref[...], mm_ref[...], preferred_element_type=f32)
                + bias24)                                 # (24, LHW)

    # ---- homeostatic controller (tiny K -> VPU broadcast FMAs) -----------------
    mem = xe[N_CH:N_CH + N_MEM, :]                        # (8, LHW)
    mem_mean = jnp.mean(mem, axis=0, keepdims=True)       # (1, LHW)
    hh = jnp.maximum(
        wh1a_ref[...] * mem_mean + wh1b_ref[...] * ar + bh1_ref[...], 0.0)   # (16, LHW)
    wh2 = wh2_ref[...]                                    # (8, 16)
    acc = bh2_ref[...] + wh2[:, 0:1] * hh[0:1, :]
    for k in range(1, 16):
        acc = acc + wh2[:, k:k + 1] * hh[k:k + 1, :]
    hh2 = jnp.maximum(acc, 0.0)                           # (8, LHW)
    scale = jax.nn.sigmoid(
        jnp.sum(wh3_ref[...] * hh2, axis=0, keepdims=True) + bh3_ref[...])   # (1, LHW)

    upd = weighted * scale                                # (24, LHW)

    # eval mode => update_mask == 1 everywhere; two aligned lane-dense slab stores
    out_ref[0, 0:UPD, :] = (xe[0:UPD, :] + upd) * alive_ext
    out_ref[0, UPD:CT_P, :] = xe[UPD:CT_P, :]             # hardware channels + zero pad


# ----------------------------------------------------------------------------
# Wrapper: parameter fusion + pallas_call
# ----------------------------------------------------------------------------
def _prepare_params(params):
    (w1, b1, w2, b2, wa, ba, temp,
     wp1, bp1, wp2, bp2,
     wh1, bh1, wh2, bh2, wh3, bh3) = params
    hp = lax.Precision.HIGHEST
    bf16 = jnp.bfloat16

    # perception layer-1 weight: pad each 28-col group to 32 -> (128, 128), K = 128
    w1p = w1.reshape(128, 4, CT)
    w1p = jnp.pad(w1p, ((0, 0), (0, 0), (0, CT_P - CT))).reshape(128, 4 * CT_P)
    b1c = b1.reshape(128, 1)

    # fuse perception layer 2 into every head's first layer:
    #   relu(Wp1_i (W2 h + b2) + bp1_i) == relu((Wp1_i W2) h + (Wp1_i b2 + bp1_i))
    wf = jnp.concatenate(
        [jnp.dot(wp1[i], w2, precision=hp) for i in range(N_HEADS)], axis=0)   # (128,128)
    bfh = jnp.concatenate(
        [jnp.dot(wp1[i], b2, precision=hp) + bp1[i] for i in range(N_HEADS)],
        axis=0).reshape(N_HEADS * HEAD_HID, 1)                                 # (128,1)

    # heads' second layer concatenated along K (attention is folded in-kernel)
    wp2c = jnp.concatenate([wp2[i] for i in range(N_HEADS)], axis=1)           # (24,128)
    bp2t = bp2.T                                                               # (24,4)

    # fold 1/temperature into the attention embed
    wa_t = wa / temp
    ba_t = (ba / temp).reshape(N_HEADS, 1)

    # big matmul weights in bf16 (f32 accumulation in-kernel); biases stay f32
    return (w1p.astype(bf16), b1c, wf.astype(bf16), bfh, wp2c.astype(bf16), bp2t,
            wa_t, ba_t,
            wh1[:, 0:1], wh1[:, 1:2], bh1.reshape(16, 1),
            wh2, bh2.reshape(8, 1),
            wh3.reshape(8, 1), bh3.reshape(1, 1))


def _neighbor_masks(H, W, bt):
    """f32 validity masks for up/down/left/right neighbors over the bt*HW lane axis."""
    HW = H * W
    idx = np.arange(bt * HW)
    col = idx % W
    row = (idx % HW) // W
    m = np.stack([row >= 1, row <= H - 2, col >= 1, col <= W - 2]).astype(np.float32)
    return jnp.asarray(m)                                   # (4, bt*HW)


@jax.jit
def homeostatic_nca_forward(x_nchw, params):
    B, C, H, W = x_nchw.shape
    assert C == CT
    HW = H * W

    prep = _prepare_params(params)

    # images lane-batched per grid step; keep grid length >= 2 so the "parallel"
    # batch axis shards across v7x's two TensorCores (no-op on v5e/v6e).
    bt = 1
    limit = min(8, max(1, B // 2))
    for cand in range(limit, 0, -1):
        if B % cand == 0:
            bt = cand
            break
    G = B // bt
    LHW = bt * HW

    # channel-major, pad channels to 32, stack bt images along the lane axis
    x = x_nchw.reshape(B, C, HW).astype(jnp.float32)
    x = jnp.pad(x, ((0, 0), (0, CT_P - C), (0, 0)))
    x = x.reshape(G, bt, CT_P, HW).transpose(0, 2, 1, 3).reshape(G, CT_P, LHW)

    masks = _neighbor_masks(H, W, bt)

    kernel = functools.partial(_nca_kernel, H=H, W=W, bt=bt)
    w_specs = [pl.BlockSpec(p.shape, lambda g: (0, 0)) for p in prep]

    # TODO(synk): when iterating NCA steps back-to-back, add
    #             input_output_aliases={0: 0} to reuse the state buffer in HBM.
    out = pl.pallas_call(
        kernel,
        out_shape=jax.ShapeDtypeStruct((G, CT_P, LHW), jnp.float32),
        grid_spec=pltpu.PrefetchScalarGridSpec(
            num_scalar_prefetch=0,
            grid=(G,),
            in_specs=[pl.BlockSpec((1, CT_P, LHW), lambda g: (g, 0, 0)),
                      pl.BlockSpec(masks.shape, lambda g: (0, 0))] + w_specs,
            out_specs=pl.BlockSpec((1, CT_P, LHW), lambda g: (g, 0, 0)),
            scratch_shapes=[pltpu.VMEM((4 * CT_P, LHW), jnp.bfloat16)],
        ),
        compiler_params=pltpu.CompilerParams(
            dimension_semantics=("parallel",)),
    )(x, masks, *prep)

    out = out.reshape(G, CT_P, bt, HW).transpose(0, 2, 1, 3).reshape(B, CT_P, HW)
    return out[:, :C, :].reshape(B, C, H, W)


# ----------------------------------------------------------------------------
# Deterministic parameter init (PyTorch Linear convention: weight = (out, in)).
# NOTE: the reference module zero-inits each pathway's output layer; here every
# layer is randomly initialized so the full compute path is exercised.
# ----------------------------------------------------------------------------
def init_params(key):
    ks = jax.random.split(key, 16)

    def lin(k, fan_in, fan_out):
        bound = 1.0 / np.sqrt(fan_in)
        kw, kb = jax.random.split(k)
        w = jax.random.uniform(kw, (fan_out, fan_in), jnp.float32, -bound, bound)
        b = jax.random.uniform(kb, (fan_out,), jnp.float32, -bound, bound)
        return w, b

    w1, b1 = lin(ks[0], PERC, 128)
    w2, b2 = lin(ks[1], 128, 64)
    wa, ba = lin(ks[2], N_HW, N_HEADS)
    temp = jnp.array(1.0, jnp.float32)

    wp1s, bp1s, wp2s, bp2s = [], [], [], []
    for i in range(N_HEADS):
        w, b = lin(ks[3 + i], 64, HEAD_HID)
        wp1s.append(w); bp1s.append(b)
        w, b = lin(ks[7 + i], HEAD_HID, UPD)
        wp2s.append(w); bp2s.append(b)
    wp1 = jnp.stack(wp1s); bp1 = jnp.stack(bp1s)     # (4,32,64), (4,32)
    wp2 = jnp.stack(wp2s); bp2 = jnp.stack(bp2s)     # (4,24,32), (4,24)

    wh1, bh1 = lin(ks[11], 2, 16)
    wh2, bh2 = lin(ks[12], 16, 8)
    wh3, bh3 = lin(ks[13], 8, 1)

    return (w1, b1, w2, b2, wa, ba, temp,
            wp1, bp1, wp2, bp2,
            wh1, bh1, wh2, bh2, wh3, bh3)


# ----------------------------------------------------------------------------
# Pure-JAX reference (mirrors the PyTorch forward) for validation.
# ----------------------------------------------------------------------------
def ref_forward(x_nchw, params):
    (w1, b1, w2, b2, wa, ba, temp,
     wp1, bp1, wp2, bp2,
     wh1, bh1, wh2, bh2, wh3, bh3) = params
    B, C, H, W = x_nchw.shape

    visible = x_nchw[:, :N_CH]
    memory = x_nchw[:, N_CH:N_CH + N_MEM]
    hardware = x_nchw[:, C - N_HW:]
    alive = (visible[:, 3:4] > 0.1).astype(jnp.float32)
    alive_ratio = alive.mean(axis=(2, 3), keepdims=True)

    kid = jnp.array([[0, 0, 0], [0, 1, 0], [0, 0, 0]], jnp.float32)
    ksx = jnp.array([[-1, 0, 1], [-2, 0, 2], [-1, 0, 1]], jnp.float32)
    ksy = jnp.array([[-1, -2, -1], [0, 0, 0], [1, 2, 1]], jnp.float32)
    klp = jnp.array([[1, 1, 1], [1, -8, 1], [1, 1, 1]], jnp.float32)

    def dw_conv(x, k):
        kern = jnp.tile(k.reshape(1, 1, 3, 3), (C, 1, 1, 1))
        return lax.conv_general_dilated(
            x, kern, (1, 1), ((1, 1), (1, 1)),
            dimension_numbers=("NCHW", "OIHW", "NCHW"), feature_group_count=C)

    perc = jnp.concatenate([dw_conv(x_nchw, k) for k in (kid, ksx, ksy, klp)], axis=1)
    pf = perc.reshape(B, 4 * C, H * W).transpose(0, 2, 1)
    mf = memory.reshape(B, N_MEM, H * W).transpose(0, 2, 1)
    hf = hardware.reshape(B, N_HW, H * W).transpose(0, 2, 1)

    proc = jnp.maximum(pf @ w1.T + b1, 0.0) @ w2.T + b2
    attn = jax.nn.softmax((hf @ wa.T + ba) / temp, axis=-1)

    outs = [jnp.maximum(proc @ wp1[i].T + bp1[i], 0.0) @ wp2[i].T + bp2[i]
            for i in range(N_HEADS)]
    stack = jnp.stack(outs, axis=-1)
    weighted = (stack * attn[:, :, None, :]).sum(-1)

    ar = jnp.broadcast_to(alive_ratio, (B, 1, H, W)).reshape(B, H * W, 1)
    mm = mf.mean(-1, keepdims=True)
    hh = jnp.maximum(jnp.concatenate([mm, ar], -1) @ wh1.T + bh1, 0.0)
    hh = jnp.maximum(hh @ wh2.T + bh2, 0.0)
    scale = jax.nn.sigmoid(hh @ wh3.T + bh3)
    weighted = weighted * scale

    upd = weighted.transpose(0, 2, 1).reshape(B, UPD, H, W)
    nv = visible + upd[:, :N_CH]
    nm = memory + upd[:, N_CH:]
    alive_ext = lax.reduce_window(alive, -jnp.inf, lax.max, (1, 1, 3, 3),
                                  (1, 1, 1, 1),
                                  padding=((0, 0), (0, 0), (1, 1), (1, 1)))
    return jnp.concatenate([nv * alive_ext, nm * alive_ext, hardware], axis=1)


if __name__ == "__main__":
    key = jax.random.PRNGKey(0)
    k_x, k_p = jax.random.split(key)

    B, H, W = 2, 16, 16
    x = jax.random.uniform(k_x, (B, CT, H, W), jnp.float32)   # NCHW like PyTorch
    params = init_params(k_p)

    out = jax.block_until_ready(homeostatic_nca_forward(x, params))

    with jax.default_matmul_precision("float32"):
        ref = jax.block_until_ready(ref_forward(x, params))

    # bf16 MXU operands (f32 accumulation) + approx reciprocal in the softmax
    # => compare against the f32 reference at a correspondingly looser tolerance.
    np.testing.assert_allclose(np.asarray(out), np.asarray(ref),
                               rtol=2e-2, atol=2e-2)

    print("KERNEL_OK")
</pallas_src>

<mosaic_0001>
module attributes {stable_mosaic.version = 11 : i64} {
  func.func @_nca_kernel(%arg0: i32, %arg1: memref<1x32x256xf32, #tpu.memory_space<vmem>>, %arg2: memref<4x256xf32, #tpu.memory_space<vmem>>, %arg3: memref<128x128xbf16, #tpu.memory_space<vmem>>, %arg4: memref<128x1xf32, #tpu.memory_space<vmem>>, %arg5: memref<128x128xbf16, #tpu.memory_space<vmem>>, %arg6: memref<128x1xf32, #tpu.memory_space<vmem>>, %arg7: memref<24x128xbf16, #tpu.memory_space<vmem>>, %arg8: memref<24x4xf32, #tpu.memory_space<vmem>>, %arg9: memref<4x4xf32, #tpu.memory_space<vmem>>, %arg10: memref<4x1xf32, #tpu.memory_space<vmem>>, %arg11: memref<16x1xf32, #tpu.memory_space<vmem>>, %arg12: memref<16x1xf32, #tpu.memory_space<vmem>>, %arg13: memref<16x1xf32, #tpu.memory_space<vmem>>, %arg14: memref<8x16xf32, #tpu.memory_space<vmem>>, %arg15: memref<8x1xf32, #tpu.memory_space<vmem>>, %arg16: memref<8x1xf32, #tpu.memory_space<vmem>>, %arg17: memref<1x1xf32, #tpu.memory_space<vmem>>, %arg18: memref<1x32x256xf32, #tpu.memory_space<vmem>>, %arg19: memref<128x256xbf16, #tpu.memory_space<vmem>>) attributes {dimension_semantics = [#tpu.dimension_semantics<parallel>], iteration_bounds = array<i64: 2>, scalar_prefetch = 0 : i64, scratch_operands = 1 : i64, tpu.core_type = #tpu.core_type<tc>, window_params = [{transform_indices = @transform_0, window_bounds = array<i64: 1, 32, 256>}, {pipeline_mode = #tpu.pipeline_mode<synchronous>, transform_indices = @transform_1, window_bounds = array<i64: 4, 256>}, {pipeline_mode = #tpu.pipeline_mode<synchronous>, transform_indices = @transform_2, window_bounds = array<i64: 128, 128>}, {pipeline_mode = #tpu.pipeline_mode<synchronous>, transform_indices = @transform_3, window_bounds = array<i64: 128, 1>}, {pipeline_mode = #tpu.pipeline_mode<synchronous>, transform_indices = @transform_4, window_bounds = array<i64: 128, 128>}, {pipeline_mode = #tpu.pipeline_mode<synchronous>, transform_indices = @transform_5, window_bounds = array<i64: 128, 1>}, {pipeline_mode = #tpu.pipeline_mode<synchronous>, transform_indices = @transform_6, window_bounds = array<i64: 24, 128>}, {pipeline_mode = #tpu.pipeline_mode<synchronous>, transform_indices = @transform_7, window_bounds = array<i64: 24, 4>}, {pipeline_mode = #tpu.pipeline_mode<synchronous>, transform_indices = @transform_8, window_bounds = array<i64: 4, 4>}, {pipeline_mode = #tpu.pipeline_mode<synchronous>, transform_indices = @transform_9, window_bounds = array<i64: 4, 1>}, {pipeline_mode = #tpu.pipeline_mode<synchronous>, transform_indices = @transform_10, window_bounds = array<i64: 16, 1>}, {pipeline_mode = #tpu.pipeline_mode<synchronous>, transform_indices = @transform_11, window_bounds = array<i64: 16, 1>}, {pipeline_mode = #tpu.pipeline_mode<synchronous>, transform_indices = @transform_12, window_bounds = array<i64: 16, 1>}, {pipeline_mode = #tpu.pipeline_mode<synchronous>, transform_indices = @transform_13, window_bounds = array<i64: 8, 16>}, {pipeline_mode = #tpu.pipeline_mode<synchronous>, transform_indices = @transform_14, window_bounds = array<i64: 8, 1>}, {pipeline_mode = #tpu.pipeline_mode<synchronous>, transform_indices = @transform_15, window_bounds = array<i64: 8, 1>}, {pipeline_mode = #tpu.pipeline_mode<synchronous>, transform_indices = @transform_16, window_bounds = array<i64: 1, 1>}, {transform_indices = @transform_17, window_bounds = array<i64: 1, 32, 256>}]} {
    %c0 = arith.constant 0 : index
    %c0_0 = arith.constant 0 : index
    %c0_1 = arith.constant 0 : index
    %0 = vector.load %arg1[%c0, %c0_0, %c0_1] : memref<1x32x256xf32, #tpu.memory_space<vmem>>, vector<1x32x256xf32>
    %1 = vector.shape_cast %0 : vector<1x32x256xf32> to vector<32x256xf32>
    %c0_2 = arith.constant 0 : index
    %c0_3 = arith.constant 0 : index
    %2 = vector.load %arg2[%c0_2, %c0_3] : memref<4x256xf32, #tpu.memory_space<vmem>>, vector<1x256xf32>
    %c1 = arith.constant 1 : index
    %c0_4 = arith.constant 0 : index
    %3 = vector.load %arg2[%c1, %c0_4] : memref<4x256xf32, #tpu.memory_space<vmem>>, vector<1x256xf32>
    %c2 = arith.constant 2 : index
    %c0_5 = arith.constant 0 : index
    %4 = vector.load %arg2[%c2, %c0_5] : memref<4x256xf32, #tpu.memory_space<vmem>>, vector<1x256xf32>
    %c3 = arith.constant 3 : index
    %c0_6 = arith.constant 0 : index
    %5 = vector.load %arg2[%c3, %c0_6] : memref<4x256xf32, #tpu.memory_space<vmem>>, vector<1x256xf32>
    %c16_i32 = arith.constant 16 : i32
    %6 = tpu.dynamic_rotate %1 by %c16_i32 dim 1 : vector<32x256xf32>, i32 -> vector<32x256xf32>
    %7 = vector.broadcast %2 : vector<1x256xf32> to vector<32x256xf32>
    %8 = arith.mulf %6, %7 : vector<32x256xf32>
    %c240_i32 = arith.constant 240 : i32
    %9 = tpu.dynamic_rotate %1 by %c240_i32 dim 1 : vector<32x256xf32>, i32 -> vector<32x256xf32>
    %10 = vector.broadcast %3 : vector<1x256xf32> to vector<32x256xf32>
    %11 = arith.mulf %9, %10 : vector<32x256xf32>
    %cst = arith.constant 2.000000e+00 : f32
    %12 = vector.broadcast %cst : f32 to vector<32x256xf32>
    %13 = arith.mulf %12, %1 : vector<32x256xf32>
    %14 = arith.addf %8, %13 : vector<32x256xf32>
    %15 = arith.addf %14, %11 : vector<32x256xf32>
    %16 = arith.subf %11, %8 : vector<32x256xf32>
    %17 = arith.addf %8, %1 : vector<32x256xf32>
    %18 = arith.addf %17, %11 : vector<32x256xf32>
    %c255_i32 = arith.constant 255 : i32
    %19 = tpu.dynamic_rotate %15 by %c255_i32 dim 1 : vector<32x256xf32>, i32 -> vector<32x256xf32>
    %20 = vector.broadcast %5 : vector<1x256xf32> to vector<32x256xf32>
    %21 = arith.mulf %19, %20 : vector<32x256xf32>
    %c1_i32 = arith.constant 1 : i32
    %22 = tpu.dynamic_rotate %15 by %c1_i32 dim 1 : vector<32x256xf32>, i32 -> vector<32x256xf32>
    %23 = vector.broadcast %4 : vector<1x256xf32> to vector<32x256xf32>
    %24 = arith.mulf %22, %23 : vector<32x256xf32>
    %25 = arith.subf %21, %24 : vector<32x256xf32>
    %c1_i32_7 = arith.constant 1 : i32
    %26 = tpu.dynamic_rotate %16 by %c1_i32_7 dim 1 : vector<32x256xf32>, i32 -> vector<32x256xf32>
    %27 = vector.broadcast %4 : vector<1x256xf32> to vector<32x256xf32>
    %28 = arith.mulf %26, %27 : vector<32x256xf32>
    %cst_8 = arith.constant 2.000000e+00 : f32
    %29 = vector.broadcast %cst_8 : f32 to vector<32x256xf32>
    %30 = arith.mulf %29, %16 : vector<32x256xf32>
    %31 = arith.addf %28, %30 : vector<32x256xf32>
    %c255_i32_9 = arith.constant 255 : i32
    %32 = tpu.dynamic_rotate %16 by %c255_i32_9 dim 1 : vector<32x256xf32>, i32 -> vector<32x256xf32>
    %33 = vector.broadcast %5 : vector<1x256xf32> to vector<32x256xf32>
    %34 = arith.mulf %32, %33 : vector<32x256xf32>
    %35 = arith.addf %31, %34 : vector<32x256xf32>
    %c1_i32_10 = arith.constant 1 : i32
    %36 = tpu.dynamic_rotate %18 by %c1_i32_10 dim 1 : vector<32x256xf32>, i32 -> vector<32x256xf32>
    %37 = vector.broadcast %4 : vector<1x256xf32> to vector<32x256xf32>
    %38 = arith.mulf %36, %37 : vector<32x256xf32>
    %39 = arith.addf %38, %18 : vector<32x256xf32>
    %c255_i32_11 = arith.constant 255 : i32
    %40 = tpu.dynamic_rotate %18 by %c255_i32_11 dim 1 : vector<32x256xf32>, i32 -> vector<32x256xf32>
    %41 = vector.broadcast %5 : vector<1x256xf32> to vector<32x256xf32>
    %42 = arith.mulf %40, %41 : vector<32x256xf32>
    %43 = arith.addf %39, %42 : vector<32x256xf32>
    %cst_12 = arith.constant 9.000000e+00 : f32
    %44 = vector.broadcast %cst_12 : f32 to vector<32x256xf32>
    %45 = arith.mulf %44, %1 : vector<32x256xf32>
    %46 = arith.subf %43, %45 : vector<32x256xf32>
    %47 = vector.extract_strided_slice %1 {offsets = [3, 0], sizes = [1, 256], strides = [1, 1]} : vector<32x256xf32> to vector<1x256xf32>
    %48 = vector.extract_strided_slice %8 {offsets = [3, 0], sizes = [1, 256], strides = [1, 1]} : vector<32x256xf32> to vector<1x256xf32>
    %49 = vector.extract_strided_slice %11 {offsets = [3, 0], sizes = [1, 256], strides = [1, 1]} : vector<32x256xf32> to vector<1x256xf32>
    %50 = arith.maximumf %48, %49 : vector<1x256xf32>
    %51 = arith.maximumf %50, %47 : vector<1x256xf32>
    %c1_i32_13 = arith.constant 1 : i32
    %52 = tpu.dynamic_rotate %51 by %c1_i32_13 dim 1 : vector<1x256xf32>, i32 -> vector<1x256xf32>
    %53 = arith.mulf %52, %4 : vector<1x256xf32>
    %c255_i32_14 = arith.constant 255 : i32
    %54 = tpu.dynamic_rotate %51 by %c255_i32_14 dim 1 : vector<1x256xf32>, i32 -> vector<1x256xf32>
    %55 = arith.mulf %54, %5 : vector<1x256xf32>
    %56 = arith.maximumf %53, %55 : vector<1x256xf32>
    %57 = arith.maximumf %56, %51 : vector<1x256xf32>
    %cst_15 = arith.constant 1.000000e-01 : f32
    %58 = vector.broadcast %cst_15 : f32 to vector<1x256xf32>
    %59 = arith.cmpf ogt, %57, %58 : vector<1x256xf32>
    %60 = arith.extui %59 : vector<1x256xi1> to vector<1x256xi32>
    %61 = arith.sitofp %60 : vector<1x256xi32> to vector<1x256xf32>
    %cst_16 = arith.constant 1.000000e-01 : f32
    %62 = vector.broadcast %cst_16 : f32 to vector<1x256xf32>
    %63 = arith.cmpf ogt, %47, %62 : vector<1x256xf32>
    %64 = arith.extui %63 : vector<1x256xi1> to vector<1x256xi32>
    %65 = arith.sitofp %64 : vector<1x256xi32> to vector<1x256xf32>
    %66 = vector.shape_cast %65 : vector<1x256xf32> to vector<1x1x256xf32>
    %cst_17 = arith.constant dense<0.000000e+00> : vector<1xf32>
    %67 = vector.multi_reduction <add>, %66, %cst_17 [1, 2] : vector<1x1x256xf32> to vector<1xf32>
    %68 = vector.shape_cast %67 : vector<1xf32> to vector<1x1x1xf32>
    %69 = vector.extract %68[0, 0, 0] : f32 from vector<1x1x1xf32>
    %cst_18 = arith.constant 3.906250e-03 : f32
    %70 = arith.mulf %69, %cst_18 : f32
    %71 = vector.broadcast %70 : f32 to vector<1x256xf32>
    %72 = arith.truncf %1 : vector<32x256xf32> to vector<32x256xbf16>
    %c0_19 = arith.constant 0 : index
    %c0_20 = arith.constant 0 : index
    %73 = vector.load %arg19[%c0_19, %c0_20] : memref<128x256xbf16, #tpu.memory_space<vmem>>, vector<32x256xbf16>
    tpu.vector_store %arg19[%c0_19, %c0_20], %72 {strides = array<i32>} : memref<128x256xbf16, #tpu.memory_space<vmem>>, vector<32x256xbf16>,
    %74 = arith.truncf %25 : vector<32x256xf32> to vector<32x256xbf16>
    %c32 = arith.constant 32 : index
    %c0_21 = arith.constant 0 : index
    %75 = vector.load %arg19[%c32, %c0_21] : memref<128x256xbf16, #tpu.memory_space<vmem>>, vector<32x256xbf16>
    tpu.vector_store %arg19[%c32, %c0_21], %74 {strides = array<i32>} : memref<128x256xbf16, #tpu.memory_space<vmem>>, vector<32x256xbf16>,
    %76 = arith.truncf %35 : vector<32x256xf32> to vector<32x256xbf16>
    %c64 = arith.constant 64 : index
    %c0_22 = arith.constant 0 : index
    %77 = vector.load %arg19[%c64, %c0_22] : memref<128x256xbf16, #tpu.memory_space<vmem>>, vector<32x256xbf16>
    tpu.vector_store %arg19[%c64, %c0_22], %76 {strides = array<i32>} : memref<128x256xbf16, #tpu.memory_space<vmem>>, vector<32x256xbf16>,
    %78 = arith.truncf %46 : vector<32x256xf32> to vector<32x256xbf16>
    %c96 = arith.constant 96 : index
    %c0_23 = arith.constant 0 : index
    %79 = vector.load %arg19[%c96, %c0_23] : memref<128x256xbf16, #tpu.memory_space<vmem>>, vector<32x256xbf16>
    tpu.vector_store %arg19[%c96, %c0_23], %78 {strides = array<i32>} : memref<128x256xbf16, #tpu.memory_space<vmem>>, vector<32x256xbf16>,
    %c0_24 = arith.constant 0 : index
    %c0_25 = arith.constant 0 : index
    %80 = vector.load %arg3[%c0_24, %c0_25] : memref<128x128xbf16, #tpu.memory_space<vmem>>, vector<128x128xbf16>
    %c0_26 = arith.constant 0 : index
    %c0_27 = arith.constant 0 : index
    %81 = vector.load %arg19[%c0_26, %c0_27] : memref<128x256xbf16, #tpu.memory_space<vmem>>, vector<128x256xbf16>
    %cst_28 = arith.constant dense<0.000000e+00> : vector<128x256xf32>
    %82 = tpu.matmul %80, %81, %cst_28 {dimension_numbers = #tpu.dot_dimension_numbers<[1], [0], [0], [1], [0, 0, 1, 1], [], []>} : vector<128x128xbf16>, vector<128x256xbf16>, vector<128x256xf32> -> vector<128x256xf32>
    %c0_29 = arith.constant 0 : index
    %c0_30 = arith.constant 0 : index
    %83 = vector.load %arg4[%c0_29, %c0_30] : memref<128x1xf32, #tpu.memory_space<vmem>>, vector<128x1xf32>
    %84 = vector.broadcast %83 : vector<128x1xf32> to vector<128x256xf32>
    %85 = arith.addf %82, %84 : vector<128x256xf32>
    %cst_31 = arith.constant 0.000000e+00 : f32
    %86 = vector.broadcast %cst_31 : f32 to vector<128x256xf32>
    %87 = arith.maximumf %85, %86 : vector<128x256xf32>
    %c0_32 = arith.constant 0 : index
    %c0_33 = arith.constant 0 : index
    %88 = vector.load %arg5[%c0_32, %c0_33] : memref<128x128xbf16, #tpu.memory_space<vmem>>, vector<128x128xbf16>
    %89 = arith.truncf %87 : vector<128x256xf32> to vector<128x256xbf16>
    %cst_34 = arith.constant dense<0.000000e+00> : vector<128x256xf32>
    %90 = tpu.matmul %88, %89, %cst_34 {dimension_numbers = #tpu.dot_dimension_numbers<[1], [0], [0], [1], [0, 0, 1, 1], [], []>} : vector<128x128xbf16>, vector<128x256xbf16>, vector<128x256xf32> -> vector<128x256xf32>
    %c0_35 = arith.constant 0 : index
    %c0_36 = arith.constant 0 : index
    %91 = vector.load %arg6[%c0_35, %c0_36] : memref<128x1xf32, #tpu.memory_space<vmem>>, vector<128x1xf32>
    %92 = vector.broadcast %91 : vector<128x1xf32> to vector<128x256xf32>
    %93 = arith.addf %90, %92 : vector<128x256xf32>
    %cst_37 = arith.constant 0.000000e+00 : f32
    %94 = vector.broadcast %cst_37 : f32 to vector<128x256xf32>
    %95 = arith.maximumf %93, %94 : vector<128x256xf32>
    %96 = vector.extract_strided_slice %1 {offsets = [24, 0], sizes = [4, 256], strides = [1, 1]} : vector<32x256xf32> to vector<4x256xf32>
    %c0_38 = arith.constant 0 : index
    %c0_39 = arith.constant 0 : index
    %97 = vector.load %arg9[%c0_38, %c0_39] : memref<4x4xf32, #tpu.memory_space<vmem>>, vector<4x4xf32>
    %c0_40 = arith.constant 0 : index
    %c0_41 = arith.constant 0 : index
    %98 = vector.load %arg10[%c0_40, %c0_41] : memref<4x1xf32, #tpu.memory_space<vmem>>, vector<4x1xf32>
    %99 = vector.extract_strided_slice %97 {offsets = [0, 0], sizes = [4, 1], strides = [1, 1]} : vector<4x4xf32> to vector<4x1xf32>
    %100 = vector.extract_strided_slice %96 {offsets = [0, 0], sizes = [1, 256], strides = [1, 1]} : vector<4x256xf32> to vector<1x256xf32>
    %101 = vector.broadcast %99 : vector<4x1xf32> to vector<4x256xf32>
    %102 = vector.broadcast %100 : vector<1x256xf32> to vector<4x256xf32>
    %103 = arith.mulf %101, %102 : vector<4x256xf32>
    %104 = vector.broadcast %98 : vector<4x1xf32> to vector<4x256xf32>
    %105 = arith.addf %104, %103 : vector<4x256xf32>
    %106 = vector.extract_strided_slice %97 {offsets = [0, 1], sizes = [4, 1], strides = [1, 1]} : vector<4x4xf32> to vector<4x1xf32>
    %107 = vector.extract_strided_slice %96 {offsets = [1, 0], sizes = [1, 256], strides = [1, 1]} : vector<4x256xf32> to vector<1x256xf32>
    %108 = vector.broadcast %106 : vector<4x1xf32> to vector<4x256xf32>
    %109 = vector.broadcast %107 : vector<1x256xf32> to vector<4x256xf32>
    %110 = arith.mulf %108, %109 : vector<4x256xf32>
    %111 = arith.addf %105, %110 : vector<4x256xf32>
    %112 = vector.extract_strided_slice %97 {offsets = [0, 2], sizes = [4, 1], strides = [1, 1]} : vector<4x4xf32> to vector<4x1xf32>
    %113 = vector.extract_strided_slice %96 {offsets = [2, 0], sizes = [1, 256], strides = [1, 1]} : vector<4x256xf32> to vector<1x256xf32>
    %114 = vector.broadcast %112 : vector<4x1xf32> to vector<4x256xf32>
    %115 = vector.broadcast %113 : vector<1x256xf32> to vector<4x256xf32>
    %116 = arith.mulf %114, %115 : vector<4x256xf32>
    %117 = arith.addf %111, %116 : vector<4x256xf32>
    %118 = vector.extract_strided_slice %97 {offsets = [0, 3], sizes = [4, 1], strides = [1, 1]} : vector<4x4xf32> to vector<4x1xf32>
    %119 = vector.extract_strided_slice %96 {offsets = [3, 0], sizes = [1, 256], strides = [1, 1]} : vector<4x256xf32> to vector<1x256xf32>
    %120 = vector.broadcast %118 : vector<4x1xf32> to vector<4x256xf32>
    %121 = vector.broadcast %119 : vector<1x256xf32> to vector<4x256xf32>
    %122 = arith.mulf %120, %121 : vector<4x256xf32>
    %123 = arith.addf %117, %122 : vector<4x256xf32>
    %cst_42 = arith.constant dense<0xFF800000> : vector<256xf32>
    %124 = vector.multi_reduction <maximumf>, %123, %cst_42 [0] : vector<4x256xf32> to vector<256xf32>
    %125 = vector.shape_cast %124 : vector<256xf32> to vector<1x256xf32>
    %126 = vector.broadcast %125 : vector<1x256xf32> to vector<4x256xf32>
    %127 = arith.subf %123, %126 : vector<4x256xf32>
    %128 = math.exp %127 : vector<4x256xf32>
    %cst_43 = arith.constant dense<0.000000e+00> : vector<256xf32>
    %129 = vector.multi_reduction <add>, %128, %cst_43 [0] : vector<4x256xf32> to vector<256xf32>
    %130 = vector.shape_cast %129 : vector<256xf32> to vector<1x256xf32>
    %131 = tpu.reciprocal %130 {approx = true} : vector<1x256xf32> -> vector<1x256xf32>
    %132 = vector.broadcast %131 : vector<1x256xf32> to vector<4x256xf32>
    %133 = arith.mulf %128, %132 : vector<4x256xf32>
    %134 = vector.extract_strided_slice %95 {offsets = [0, 0], sizes = [32, 256], strides = [1, 1]} : vector<128x256xf32> to vector<32x256xf32>
    %135 = vector.extract_strided_slice %133 {offsets = [0, 0], sizes = [1, 256], strides = [1, 1]} : vector<4x256xf32> to vector<1x256xf32>
    %136 = vector.broadcast %135 : vector<1x256xf32> to vector<32x256xf32>
    %137 = arith.mulf %134, %136 : vector<32x256xf32>
    %138 = arith.truncf %137 : vector<32x256xf32> to vector<32x256xbf16>
    %c0_44 = arith.constant 0 : index
    %c0_45 = arith.constant 0 : index
    %139 = vector.load %arg19[%c0_44, %c0_45] : memref<128x256xbf16, #tpu.memory_space<vmem>>, vector<32x256xbf16>
    tpu.vector_store %arg19[%c0_44, %c0_45], %138 {strides = array<i32>} : memref<128x256xbf16, #tpu.memory_space<vmem>>, vector<32x256xbf16>,
    %140 = vector.extract_strided_slice %95 {offsets = [32, 0], sizes = [32, 256], strides = [1, 1]} : vector<128x256xf32> to vector<32x256xf32>
    %141 = vector.extract_strided_slice %133 {offsets = [1, 0], sizes = [1, 256], strides = [1, 1]} : vector<4x256xf32> to vector<1x256xf32>
    %142 = vector.broadcast %141 : vector<1x256xf32> to vector<32x256xf32>
    %143 = arith.mulf %140, %142 : vector<32x256xf32>
    %144 = arith.truncf %143 : vector<32x256xf32> to vector<32x256xbf16>
    %c32_46 = arith.constant 32 : index
    %c0_47 = arith.constant 0 : index
    %145 = vector.load %arg19[%c32_46, %c0_47] : memref<128x256xbf16, #tpu.memory_space<vmem>>, vector<32x256xbf16>
    tpu.vector_store %arg19[%c32_46, %c0_47], %144 {strides = array<i32>} : memref<128x256xbf16, #tpu.memory_space<vmem>>, vector<32x256xbf16>,
    %146 = vector.extract_strided_slice %95 {offsets = [64, 0], sizes = [32, 256], strides = [1, 1]} : vector<128x256xf32> to vector<32x256xf32>
    %147 = vector.extract_strided_slice %133 {offsets = [2, 0], sizes = [1, 256], strides = [1, 1]} : vector<4x256xf32> to vector<1x256xf32>
    %148 = vector.broadcast %147 : vector<1x256xf32> to vector<32x256xf32>
    %149 = arith.mulf %146, %148 : vector<32x256xf32>
    %150 = arith.truncf %149 : vector<32x256xf32> to vector<32x256xbf16>
    %c64_48 = arith.constant 64 : index
    %c0_49 = arith.constant 0 : index
    %151 = vector.load %arg19[%c64_48, %c0_49] : memref<128x256xbf16, #tpu.memory_space<vmem>>, vector<32x256xbf16>
    tpu.vector_store %arg19[%c64_48, %c0_49], %150 {strides = array<i32>} : memref<128x256xbf16, #tpu.memory_space<vmem>>, vector<32x256xbf16>,
    %152 = vector.extract_strided_slice %95 {offsets = [96, 0], sizes = [32, 256], strides = [1, 1]} : vector<128x256xf32> to vector<32x256xf32>
    %153 = vector.extract_strided_slice %133 {offsets = [3, 0], sizes = [1, 256], strides = [1, 1]} : vector<4x256xf32> to vector<1x256xf32>
    %154 = vector.broadcast %153 : vector<1x256xf32> to vector<32x256xf32>
    %155 = arith.mulf %152, %154 : vector<32x256xf32>
    %156 = arith.truncf %155 : vector<32x256xf32> to vector<32x256xbf16>
    %c96_50 = arith.constant 96 : index
    %c0_51 = arith.constant 0 : index
    %157 = vector.load %arg19[%c96_50, %c0_51] : memref<128x256xbf16, #tpu.memory_space<vmem>>, vector<32x256xbf16>
    tpu.vector_store %arg19[%c96_50, %c0_51], %156 {strides = array<i32>} : memref<128x256xbf16, #tpu.memory_space<vmem>>, vector<32x256xbf16>,
    %c0_52 = arith.constant 0 : index
    %c0_53 = arith.constant 0 : index
    %158 = vector.load %arg8[%c0_52, %c0_53] : memref<24x4xf32, #tpu.memory_space<vmem>>, vector<24x4xf32>
    %159 = vector.extract_strided_slice %158 {offsets = [0, 0], sizes = [24, 1], strides = [1, 1]} : vector<24x4xf32> to vector<24x1xf32>
    %160 = vector.extract_strided_slice %133 {offsets = [0, 0], sizes = [1, 256], strides = [1, 1]} : vector<4x256xf32> to vector<1x256xf32>
    %161 = vector.broadcast %159 : vector<24x1xf32> to vector<24x256xf32>
    %162 = vector.broadcast %160 : vector<1x256xf32> to vector<24x256xf32>
    %163 = arith.mulf %161, %162 : vector<24x256xf32>
    %164 = vector.extract_strided_slice %158 {offsets = [0, 1], sizes = [24, 1], strides = [1, 1]} : vector<24x4xf32> to vector<24x1xf32>
    %165 = vector.extract_strided_slice %133 {offsets = [1, 0], sizes = [1, 256], strides = [1, 1]} : vector<4x256xf32> to vector<1x256xf32>
    %166 = vector.broadcast %164 : vector<24x1xf32> to vector<24x256xf32>
    %167 = vector.broadcast %165 : vector<1x256xf32> to vector<24x256xf32>
    %168 = arith.mulf %166, %167 : vector<24x256xf32>
    %169 = arith.addf %163, %168 : vector<24x256xf32>
    %170 = vector.extract_strided_slice %158 {offsets = [0, 2], sizes = [24, 1], strides = [1, 1]} : vector<24x4xf32> to vector<24x1xf32>
    %171 = vector.extract_strided_slice %133 {offsets = [2, 0], sizes = [1, 256], strides = [1, 1]} : vector<4x256xf32> to vector<1x256xf32>
    %172 = vector.broadcast %170 : vector<24x1xf32> to vector<24x256xf32>
    %173 = vector.broadcast %171 : vector<1x256xf32> to vector<24x256xf32>
    %174 = arith.mulf %172, %173 : vector<24x256xf32>
    %175 = arith.addf %169, %174 : vector<24x256xf32>
    %176 = vector.extract_strided_slice %158 {offsets = [0, 3], sizes = [24, 1], strides = [1, 1]} : vector<24x4xf32> to vector<24x1xf32>
    %177 = vector.extract_strided_slice %133 {offsets = [3, 0], sizes = [1, 256], strides = [1, 1]} : vector<4x256xf32> to vector<1x256xf32>
    %178 = vector.broadcast %176 : vector<24x1xf32> to vector<24x256xf32>
    %179 = vector.broadcast %177 : vector<1x256xf32> to vector<24x256xf32>
    %180 = arith.mulf %178, %179 : vector<24x256xf32>
    %181 = arith.addf %175, %180 : vector<24x256xf32>
    %c0_54 = arith.constant 0 : index
    %c0_55 = arith.constant 0 : index
    %182 = vector.load %arg7[%c0_54, %c0_55] : memref<24x128xbf16, #tpu.memory_space<vmem>>, vector<24x128xbf16>
    %c0_56 = arith.constant 0 : index
    %c0_57 = arith.constant 0 : index
    %183 = vector.load %arg19[%c0_56, %c0_57] : memref<128x256xbf16, #tpu.memory_space<vmem>>, vector<128x256xbf16>
    %cst_58 = arith.constant dense<0.000000e+00> : vector<24x256xf32>
    %184 = tpu.matmul %182, %183, %cst_58 {dimension_numbers = #tpu.dot_dimension_numbers<[1], [0], [0], [1], [0, 0, 1, 1], [], []>} : vector<24x128xbf16>, vector<128x256xbf16>, vector<24x256xf32> -> vector<24x256xf32>
    %185 = arith.addf %184, %181 : vector<24x256xf32>
    %186 = vector.extract_strided_slice %1 {offsets = [16, 0], sizes = [8, 256], strides = [1, 1]} : vector<32x256xf32> to vector<8x256xf32>
    %cst_59 = arith.constant dense<0.000000e+00> : vector<256xf32>
    %187 = vector.multi_reduction <add>, %186, %cst_59 [0] : vector<8x256xf32> to vector<256xf32>
    %188 = vector.shape_cast %187 : vector<256xf32> to vector<1x256xf32>
    %cst_60 = arith.constant 8.000000e+00 : f32
    %189 = vector.broadcast %cst_60 : f32 to vector<1x256xf32>
    %190 = arith.divf %188, %189 : vector<1x256xf32>
    %c0_61 = arith.constant 0 : index
    %c0_62 = arith.constant 0 : index
    %191 = vector.load %arg11[%c0_61, %c0_62] : memref<16x1xf32, #tpu.memory_space<vmem>>, vector<16x1xf32>
    %192 = vector.broadcast %191 : vector<16x1xf32> to vector<16x256xf32>
    %193 = vector.broadcast %190 : vector<1x256xf32> to vector<16x256xf32>
    %194 = arith.mulf %192, %193 : vector<16x256xf32>
    %c0_63 = arith.constant 0 : index
    %c0_64 = arith.constant 0 : index
    %195 = vector.load %arg12[%c0_63, %c0_64] : memref<16x1xf32, #tpu.memory_space<vmem>>, vector<16x1xf32>
    %196 = vector.broadcast %195 : vector<16x1xf32> to vector<16x256xf32>
    %197 = vector.broadcast %71 : vector<1x256xf32> to vector<16x256xf32>
    %198 = arith.mulf %196, %197 : vector<16x256xf32>
    %199 = arith.addf %194, %198 : vector<16x256xf32>
    %c0_65 = arith.constant 0 : index
    %c0_66 = arith.constant 0 : index
    %200 = vector.load %arg13[%c0_65, %c0_66] : memref<16x1xf32, #tpu.memory_space<vmem>>, vector<16x1xf32>
    %201 = vector.broadcast %200 : vector<16x1xf32> to vector<16x256xf32>
    %202 = arith.addf %199, %201 : vector<16x256xf32>
    %cst_67 = arith.constant 0.000000e+00 : f32
    %203 = vector.broadcast %cst_67 : f32 to vector<16x256xf32>
    %204 = arith.maximumf %202, %203 : vector<16x256xf32>
    %c0_68 = arith.constant 0 : index
    %c0_69 = arith.constant 0 : index
    %205 = vector.load %arg14[%c0_68, %c0_69] : memref<8x16xf32, #tpu.memory_space<vmem>>, vector<8x16xf32>
    %c0_70 = arith.constant 0 : index
    %c0_71 = arith.constant 0 : index
    %206 = vector.load %arg15[%c0_70, %c0_71] : memref<8x1xf32, #tpu.memory_space<vmem>>, vector<8x1xf32>
    %207 = vector.extract_strided_slice %205 {offsets = [0, 0], sizes = [8, 1], strides = [1, 1]} : vector<8x16xf32> to vector<8x1xf32>
    %208 = vector.extract_strided_slice %204 {offsets = [0, 0], sizes = [1, 256], strides = [1, 1]} : vector<16x256xf32> to vector<1x256xf32>
    %209 = vector.broadcast %207 : vector<8x1xf32> to vector<8x256xf32>
    %210 = vector.broadcast %208 : vector<1x256xf32> to vector<8x256xf32>
    %211 = arith.mulf %209, %210 : vector<8x256xf32>
    %212 = vector.broadcast %206 : vector<8x1xf32> to vector<8x256xf32>
    %213 = arith.addf %212, %211 : vector<8x256xf32>
    %214 = vector.extract_strided_slice %205 {offsets = [0, 1], sizes = [8, 1], strides = [1, 1]} : vector<8x16xf32> to vector<8x1xf32>
    %215 = vector.extract_strided_slice %204 {offsets = [1, 0], sizes = [1, 256], strides = [1, 1]} : vector<16x256xf32> to vector<1x256xf32>
    %216 = vector.broadcast %214 : vector<8x1xf32> to vector<8x256xf32>
    %217 = vector.broadcast %215 : vector<1x256xf32> to vector<8x256xf32>
    %218 = arith.mulf %216, %217 : vector<8x256xf32>
    %219 = arith.addf %213, %218 : vector<8x256xf32>
    %220 = vector.extract_strided_slice %205 {offsets = [0, 2], sizes = [8, 1], strides = [1, 1]} : vector<8x16xf32> to vector<8x1xf32>
    %221 = vector.extract_strided_slice %204 {offsets = [2, 0], sizes = [1, 256], strides = [1, 1]} : vector<16x256xf32> to vector<1x256xf32>
    %222 = vector.broadcast %220 : vector<8x1xf32> to vector<8x256xf32>
    %223 = vector.broadcast %221 : vector<1x256xf32> to vector<8x256xf32>
    %224 = arith.mulf %222, %223 : vector<8x256xf32>
    %225 = arith.addf %219, %224 : vector<8x256xf32>
    %226 = vector.extract_strided_slice %205 {offsets = [0, 3], sizes = [8, 1], strides = [1, 1]} : vector<8x16xf32> to vector<8x1xf32>
    %227 = vector.extract_strided_slice %204 {offsets = [3, 0], sizes = [1, 256], strides = [1, 1]} : vector<16x256xf32> to vector<1x256xf32>
    %228 = vector.broadcast %226 : vector<8x1xf32> to vector<8x256xf32>
    %229 = vector.broadcast %227 : vector<1x256xf32> to vector<8x256xf32>
    %230 = arith.mulf %228, %229 : vector<8x256xf32>
    %231 = arith.addf %225, %230 : vector<8x256xf32>
    %232 = vector.extract_strided_slice %205 {offsets = [0, 4], sizes = [8, 1], strides = [1, 1]} : vector<8x16xf32> to vector<8x1xf32>
    %233 = vector.extract_strided_slice %204 {offsets = [4, 0], sizes = [1, 256], strides = [1, 1]} : vector<16x256xf32> to vector<1x256xf32>
    %234 = vector.broadcast %232 : vector<8x1xf32> to vector<8x256xf32>
    %235 = vector.broadcast %233 : vector<1x256xf32> to vector<8x256xf32>
    %236 = arith.mulf %234, %235 : vector<8x256xf32>
    %237 = arith.addf %231, %236 : vector<8x256xf32>
    %238 = vector.extract_strided_slice %205 {offsets = [0, 5], sizes = [8, 1], strides = [1, 1]} : vector<8x16xf32> to vector<8x1xf32>
    %239 = vector.extract_strided_slice %204 {offsets = [5, 0], sizes = [1, 256], strides = [1, 1]} : vector<16x256xf32> to vector<1x256xf32>
    %240 = vector.broadcast %238 : vector<8x1xf32> to vector<8x256xf32>
    %241 = vector.broadcast %239 : vector<1x256xf32> to vector<8x256xf32>
    %242 = arith.mulf %240, %241 : vector<8x256xf32>
    %243 = arith.addf %237, %242 : vector<8x256xf32>
    %244 = vector.extract_strided_slice %205 {offsets = [0, 6], sizes = [8, 1], strides = [1, 1]} : vector<8x16xf32> to vector<8x1xf32>
    %245 = vector.extract_strided_slice %204 {offsets = [6, 0], sizes = [1, 256], strides = [1, 1]} : vector<16x256xf32> to vector<1x256xf32>
    %246 = vector.broadcast %244 : vector<8x1xf32> to vector<8x256xf32>
    %247 = vector.broadcast %245 : vector<1x256xf32> to vector<8x256xf32>
    %248 = arith.mulf %246, %247 : vector<8x256xf32>
    %249 = arith.addf %243, %248 : vector<8x256xf32>
    %250 = vector.extract_strided_slice %205 {offsets = [0, 7], sizes = [8, 1], strides = [1, 1]} : vector<8x16xf32> to vector<8x1xf32>
    %251 = vector.extract_strided_slice %204 {offsets = [7, 0], sizes = [1, 256], strides = [1, 1]} : vector<16x256xf32> to vector<1x256xf32>
    %252 = vector.broadcast %250 : vector<8x1xf32> to vector<8x256xf32>
    %253 = vector.broadcast %251 : vector<1x256xf32> to vector<8x256xf32>
    %254 = arith.mulf %252, %253 : vector<8x256xf32>
    %255 = arith.addf %249, %254 : vector<8x256xf32>
    %256 = vector.extract_strided_slice %205 {offsets = [0, 8], sizes = [8, 1], strides = [1, 1]} : vector<8x16xf32> to vector<8x1xf32>
    %257 = vector.extract_strided_slice %204 {offsets = [8, 0], sizes = [1, 256], strides = [1, 1]} : vector<16x256xf32> to vector<1x256xf32>
    %258 = vector.broadcast %256 : vector<8x1xf32> to vector<8x256xf32>
    %259 = vector.broadcast %257 : vector<1x256xf32> to vector<8x256xf32>
    %260 = arith.mulf %258, %259 : vector<8x256xf32>
    %261 = arith.addf %255, %260 : vector<8x256xf32>
    %262 = vector.extract_strided_slice %205 {offsets = [0, 9], sizes = [8, 1], strides = [1, 1]} : vector<8x16xf32> to vector<8x1xf32>
    %263 = vector.extract_strided_slice %204 {offsets = [9, 0], sizes = [1, 256], strides = [1, 1]} : vector<16x256xf32> to vector<1x256xf32>
    %264 = vector.broadcast %262 : vector<8x1xf32> to vector<8x256xf32>
    %265 = vector.broadcast %263 : vector<1x256xf32> to vector<8x256xf32>
    %266 = arith.mulf %264, %265 : vector<8x256xf32>
    %267 = arith.addf %261, %266 : vector<8x256xf32>
    %268 = vector.extract_strided_slice %205 {offsets = [0, 10], sizes = [8, 1], strides = [1, 1]} : vector<8x16xf32> to vector<8x1xf32>
    %269 = vector.extract_strided_slice %204 {offsets = [10, 0], sizes = [1, 256], strides = [1, 1]} : vector<16x256xf32> to vector<1x256xf32>
    %270 = vector.broadcast %268 : vector<8x1xf32> to vector<8x256xf32>
    %271 = vector.broadcast %269 : vector<1x256xf32> to vector<8x256xf32>
    %272 = arith.mulf %270, %271 : vector<8x256xf32>
    %273 = arith.addf %267, %272 : vector<8x256xf32>
    %274 = vector.extract_strided_slice %205 {offsets = [0, 11], sizes = [8, 1], strides = [1, 1]} : vector<8x16xf32> to vector<8x1xf32>
    %275 = vector.extract_strided_slice %204 {offsets = [11, 0], sizes = [1, 256], strides = [1, 1]} : vector<16x256xf32> to vector<1x256xf32>
    %276 = vector.broadcast %274 : vector<8x1xf32> to vector<8x256xf32>
    %277 = vector.broadcast %275 : vector<1x256xf32> to vector<8x256xf32>
    %278 = arith.mulf %276, %277 : vector<8x256xf32>
    %279 = arith.addf %273, %278 : vector<8x256xf32>
    %280 = vector.extract_strided_slice %205 {offsets = [0, 12], sizes = [8, 1], strides = [1, 1]} : vector<8x16xf32> to vector<8x1xf32>
    %281 = vector.extract_strided_slice %204 {offsets = [12, 0], sizes = [1, 256], strides = [1, 1]} : vector<16x256xf32> to vector<1x256xf32>
    %282 = vector.broadcast %280 : vector<8x1xf32> to vector<8x256xf32>
    %283 = vector.broadcast %281 : vector<1x256xf32> to vector<8x256xf32>
    %284 = arith.mulf %282, %283 : vector<8x256xf32>
    %285 = arith.addf %279, %284 : vector<8x256xf32>
    %286 = vector.extract_strided_slice %205 {offsets = [0, 13], sizes = [8, 1], strides = [1, 1]} : vector<8x16xf32> to vector<8x1xf32>
    %287 = vector.extract_strided_slice %204 {offsets = [13, 0], sizes = [1, 256], strides = [1, 1]} : vector<16x256xf32> to vector<1x256xf32>
    %288 = vector.broadcast %286 : vector<8x1xf32> to vector<8x256xf32>
    %289 = vector.broadcast %287 : vector<1x256xf32> to vector<8x256xf32>
    %290 = arith.mulf %288, %289 : vector<8x256xf32>
    %291 = arith.addf %285, %290 : vector<8x256xf32>
    %292 = vector.extract_strided_slice %205 {offsets = [0, 14], sizes = [8, 1], strides = [1, 1]} : vector<8x16xf32> to vector<8x1xf32>
    %293 = vector.extract_strided_slice %204 {offsets = [14, 0], sizes = [1, 256], strides = [1, 1]} : vector<16x256xf32> to vector<1x256xf32>
    %294 = vector.broadcast %292 : vector<8x1xf32> to vector<8x256xf32>
    %295 = vector.broadcast %293 : vector<1x256xf32> to vector<8x256xf32>
    %296 = arith.mulf %294, %295 : vector<8x256xf32>
    %297 = arith.addf %291, %296 : vector<8x256xf32>
    %298 = vector.extract_strided_slice %205 {offsets = [0, 15], sizes = [8, 1], strides = [1, 1]} : vector<8x16xf32> to vector<8x1xf32>
    %299 = vector.extract_strided_slice %204 {offsets = [15, 0], sizes = [1, 256], strides = [1, 1]} : vector<16x256xf32> to vector<1x256xf32>
    %300 = vector.broadcast %298 : vector<8x1xf32> to vector<8x256xf32>
    %301 = vector.broadcast %299 : vector<1x256xf32> to vector<8x256xf32>
    %302 = arith.mulf %300, %301 : vector<8x256xf32>
    %303 = arith.addf %297, %302 : vector<8x256xf32>
    %cst_72 = arith.constant 0.000000e+00 : f32
    %304 = vector.broadcast %cst_72 : f32 to vector<8x256xf32>
    %305 = arith.maximumf %303, %304 : vector<8x256xf32>
    %c0_73 = arith.constant 0 : index
    %c0_74 = arith.constant 0 : index
    %306 = vector.load %arg16[%c0_73, %c0_74] : memref<8x1xf32, #tpu.memory_space<vmem>>, vector<8x1xf32>
    %307 = vector.broadcast %306 : vector<8x1xf32> to vector<8x256xf32>
    %308 = arith.mulf %307, %305 : vector<8x256xf32>
    %cst_75 = arith.constant dense<0.000000e+00> : vector<256xf32>
    %309 = vector.multi_reduction <add>, %308, %cst_75 [0] : vector<8x256xf32> to vector<256xf32>
    %310 = vector.shape_cast %309 : vector<256xf32> to vector<1x256xf32>
    %c0_76 = arith.constant 0 : index
    %c0_77 = arith.constant 0 : index
    %311 = vector.load %arg17[%c0_76, %c0_77] : memref<1x1xf32, #tpu.memory_space<vmem>>, vector<1x1xf32>
    %312 = vector.broadcast %311 : vector<1x1xf32> to vector<1x256xf32>
    %313 = arith.addf %310, %312 : vector<1x256xf32>
    %314 = arith.negf %313 : vector<1x256xf32>
    %315 = math.exp %314 : vector<1x256xf32>
    %cst_78 = arith.constant 1.000000e+00 : f32
    %316 = vector.broadcast %cst_78 : f32 to vector<1x256xf32>
    %317 = arith.addf %316, %315 : vector<1x256xf32>
    %318 = arith.divf %316, %317 : vector<1x256xf32>
    %319 = vector.broadcast %318 : vector<1x256xf32> to vector<24x256xf32>
    %320 = arith.mulf %185, %319 : vector<24x256xf32>
    %321 = vector.extract_strided_slice %1 {offsets = [0, 0], sizes = [24, 256], strides = [1, 1]} : vector<32x256xf32> to vector<24x256xf32>
    %322 = arith.addf %321, %320 : vector<24x256xf32>
    %323 = vector.broadcast %61 : vector<1x256xf32> to vector<24x256xf32>
    %324 = arith.mulf %322, %323 : vector<24x256xf32>
    %c0_79 = arith.constant 0 : index
    %c0_80 = arith.constant 0 : index
    %c0_81 = arith.constant 0 : index
    %325 = vector.load %arg18[%c0_79, %c0_80, %c0_81] : memref<1x32x256xf32, #tpu.memory_space<vmem>>, vector<1x24x256xf32>
    %326 = vector.shape_cast %325 : vector<1x24x256xf32> to vector<24x256xf32>
    %327 = vector.shape_cast %324 : vector<24x256xf32> to vector<1x24x256xf32>
    tpu.vector_store %arg18[%c0_79, %c0_80, %c0_81], %327 {strides = array<i32>} : memref<1x32x256xf32, #tpu.memory_space<vmem>>, vector<1x24x256xf32>,
    %328 = vector.extract_strided_slice %1 {offsets = [24, 0], sizes = [8, 256], strides = [1, 1]} : vector<32x256xf32> to vector<8x256xf32>
    %c0_82 = arith.constant 0 : index
    %c24 = arith.constant 24 : index
    %c0_83 = arith.constant 0 : index
    %329 = vector.load %arg18[%c0_82, %c24, %c0_83] : memref<1x32x256xf32, #tpu.memory_space<vmem>>, vector<1x8x256xf32>
    %330 = vector.shape_cast %329 : vector<1x8x256xf32> to vector<8x256xf32>
    %331 = vector.shape_cast %328 : vector<8x256xf32> to vector<1x8x256xf32>
    tpu.vector_store %arg18[%c0_82, %c24, %c0_83], %331 {strides = array<i32>} : memref<1x32x256xf32, #tpu.memory_space<vmem>>, vector<1x8x256xf32>,
    return
  }
  func.func @transform_0(%arg0: i32) -> (i32, i32, i32) {
    %c0_i32 = arith.constant 0 : i32
    %c0_i32_0 = arith.constant 0 : i32
    %c0_i32_1 = arith.constant 0 : i32
    return %arg0, %c0_i32, %c0_i32_0 : i32, i32, i32
  }
  func.func @transform_1(%arg0: i32) -> (i32, i32) {
    %c0_i32 = arith.constant 0 : i32
    %c0_i32_0 = arith.constant 0 : i32
    %c0_i32_1 = arith.constant 0 : i32
    return %c0_i32, %c0_i32_0 : i32, i32
  }
  func.func @transform_2(%arg0: i32) -> (i32, i32) {
    %c0_i32 = arith.constant 0 : i32
    %c0_i32_0 = arith.constant 0 : i32
    %c0_i32_1 = arith.constant 0 : i32
    return %c0_i32, %c0_i32_0 : i32, i32
  }
  func.func @transform_3(%arg0: i32) -> (i32, i32) {
    %c0_i32 = arith.constant 0 : i32
    %c0_i32_0 = arith.constant 0 : i32
    %c0_i32_1 = arith.constant 0 : i32
    return %c0_i32, %c0_i32_0 : i32, i32
  }
  func.func @transform_4(%arg0: i32) -> (i32, i32) {
    %c0_i32 = arith.constant 0 : i32
    %c0_i32_0 = arith.constant 0 : i32
    %c0_i32_1 = arith.constant 0 : i32
    return %c0_i32, %c0_i32_0 : i32, i32
  }
  func.func @transform_5(%arg0: i32) -> (i32, i32) {
    %c0_i32 = arith.constant 0 : i32
    %c0_i32_0 = arith.constant 0 : i32
    %c0_i32_1 = arith.constant 0 : i32
    return %c0_i32, %c0_i32_0 : i32, i32
  }
  func.func @transform_6(%arg0: i32) -> (i32, i32) {
    %c0_i32 = arith.constant 0 : i32
    %c0_i32_0 = arith.constant 0 : i32
    %c0_i32_1 = arith.constant 0 : i32
    return %c0_i32, %c0_i32_0 : i32, i32
  }
  func.func @transform_7(%arg0: i32) -> (i32, i32) {
    %c0_i32 = arith.constant 0 : i32
    %c0_i32_0 = arith.constant 0 : i32
    %c0_i32_1 = arith.constant 0 : i32
    return %c0_i32, %c0_i32_0 : i32, i32
  }
  func.func @transform_8(%arg0: i32) -> (i32, i32) {
    %c0_i32 = arith.constant 0 : i32
    %c0_i32_0 = arith.constant 0 : i32
    %c0_i32_1 = arith.constant 0 : i32
    return %c0_i32, %c0_i32_0 : i32, i32
  }
  func.func @transform_9(%arg0: i32) -> (i32, i32) {
    %c0_i32 = arith.constant 0 : i32
    %c0_i32_0 = arith.constant 0 : i32
    %c0_i32_1 = arith.constant 0 : i32
    return %c0_i32, %c0_i32_0 : i32, i32
  }
  func.func @transform_10(%arg0: i32) -> (i32, i32) {
    %c0_i32 = arith.constant 0 : i32
    %c0_i32_0 = arith.constant 0 : i32
    %c0_i32_1 = arith.constant 0 : i32
    return %c0_i32, %c0_i32_0 : i32, i32
  }
  func.func @transform_11(%arg0: i32) -> (i32, i32) {
    %c0_i32 = arith.constant 0 : i32
    %c0_i32_0 = arith.constant 0 : i32
    %c0_i32_1 = arith.constant 0 : i32
    return %c0_i32, %c0_i32_0 : i32, i32
  }
  func.func @transform_12(%arg0: i32) -> (i32, i32) {
    %c0_i32 = arith.constant 0 : i32
    %c0_i32_0 = arith.constant 0 : i32
    %c0_i32_1 = arith.constant 0 : i32
    return %c0_i32, %c0_i32_0 : i32, i32
  }
  func.func @transform_13(%arg0: i32) -> (i32, i32) {
    %c0_i32 = arith.constant 0 : i32
    %c0_i32_0 = arith.constant 0 : i32
    %c0_i32_1 = arith.constant 0 : i32
    return %c0_i32, %c0_i32_0 : i32, i32
  }
  func.func @transform_14(%arg0: i32) -> (i32, i32) {
    %c0_i32 = arith.constant 0 : i32
    %c0_i32_0 = arith.constant 0 : i32
    %c0_i32_1 = arith.constant 0 : i32
    return %c0_i32, %c0_i32_0 : i32, i32
  }
  func.func @transform_15(%arg0: i32) -> (i32, i32) {
    %c0_i32 = arith.constant 0 : i32
    %c0_i32_0 = arith.constant 0 : i32
    %c0_i32_1 = arith.constant 0 : i32
    return %c0_i32, %c0_i32_0 : i32, i32
  }
  func.func @transform_16(%arg0: i32) -> (i32, i32) {
    %c0_i32 = arith.constant 0 : i32
    %c0_i32_0 = arith.constant 0 : i32
    %c0_i32_1 = arith.constant 0 : i32
    return %c0_i32, %c0_i32_0 : i32, i32
  }
  func.func @transform_17(%arg0: i32) -> (i32, i32, i32) {
    %c0_i32 = arith.constant 0 : i32
    %c0_i32_0 = arith.constant 0 : i32
    %c0_i32_1 = arith.constant 0 : i32
    return %arg0, %c0_i32, %c0_i32_0 : i32, i32, i32
  }
}

</mosaic_0001>

<bundles_post_ra>
// kernel: homeostatic_nca_forward.1
= control target key start
LH: loop header
LB: loop body
LE: loop exit
PB: predicated region body
PF: predicated region fallthrough
CT: control target
= control target key end

     0   :  { %s3045_s26 = smov 0   ;;  %s4283_s0 = inlined_call_operand.vmem [shape: f32[2,32,256], index: 0, kind: input, shape index: {}]   ;;  %s4284_s1 = inlined_call_operand.vmem [shape: f32[4,256], index: 1, kind: input, shape index: {}]   ;;  %s4285_s2 = inlined_call_operand.vmem [shape: bf16[128,128], index: 2, kind: input, shape index: {}]   ;;  %s4286_s3 = inlined_call_operand.vmem [shape: f32[128,1], index: 3, kind: input, shape index: {}]   ;;  %s4287_s4 = inlined_call_operand.vmem [shape: bf16[128,128], index: 4, kind: input, shape index: {}]   ;;  %s4288_s5 = inlined_call_operand.vmem [shape: f32[128,1], index: 5, kind: input, shape index: {}]   ;;  %s4289_s6 = inlined_call_operand.vmem [shape: bf16[24,128], index: 6, kind: input, shape index: {}]   ;;  %s4290_s7 = inlined_call_operand.vmem [shape: f32[24,4], index: 7, kind: input, shape index: {}]   ;;  %s4291_s8 = inlined_call_operand.vmem [shape: f32[4,4], index: 8, kind: input, shape index: {}]   ;;  %s4292_s9 = inlined_call_operand.vmem [shape: f32[4,1], index: 9, kind: input, shape index: {}]   ;;  %s4293_s10 = inlined_call_operand.vmem [shape: f32[16,1], index: 10, kind: input, shape index: {}]   ;;  %s4294_s11 = inlined_call_operand.vmem [shape: f32[16,1], index: 11, kind: input, shape index: {}]   ;;  %s4295_s12 = inlined_call_operand.vmem [shape: f32[16,1], index: 12, kind: input, shape index: {}]   ;;  %s4296_s13 = inlined_call_operand.vmem [shape: f32[8,16], index: 13, kind: input, shape index: {}]   ;;  %s4297_s14 = inlined_call_operand.vmem [shape: f32[8,1], index: 14, kind: input, shape index: {}]   ;;  %s4298_s15 = inlined_call_operand.vmem [shape: f32[8,1], index: 15, kind: input, shape index: {}]   ;;  %s4299_s16 = inlined_call_operand.<no memory space> [shape: f32[1,1], index: 16, kind: input, shape index: {}]   ;;  %s4300_s17 = inlined_call_operand.vmem [shape: f32[2,32,256], index: 17, kind: output, shape index: {}]  }
   0x1   :  { %4320 = sst [smem:[#allocation20_spill]] %s4283_s0  ;;  %v22_v0 = vstv %s4299_s16 }
   0x2   :  { %4321 = sst [smem:[#allocation21_spill]] %s4284_s1  ;;  %23 = vst [vmem:[#allocation3] sm:$0x1] %v22_v0 }
   0x3 LB: > { %s2542_s27 = sadd.s32 4294967295, %s2928_s26   ;;  %p2546_p0 = scmp.ge.s32.totalorder %s2928_s26, 1  ;;  %s2928_s26 = sphi %s3045_s26, %s29_s26  }
   0x4   : > { %p489_p1 = scmp.lt.s32.totalorder %s2928_s26, 3 }
   0x6   : > { %p490_p2 = pnand %p2546_p0, %p489_p1 }
   0x8   : > { %493 = sbr.rel (%p490_p2) target bundleno = 1148 (0x47c), region = 88 }
   0xd   : > { %p541_p3 = scmp.lt.s32.totalorder %s2542_s27, 1  ;;  %s4322_s0 = sld [smem:[#allocation20_spill]]  ;;  %v582_v14 = vlaneseq  ;;  %vm1008_vm6 = vcmask 1040384   ;;  %vm1794_vm9 = vcmask 1043456  }
   0xe   : > { %s2930_s18 = smov 16   ;;  %s2931_s19 = smov 112  }
   0xf   : > { %s4365_s27 = smov (!%p541_p3, %s2542_s27), 1  ;;  %v3105_v15 = vand.u32 127, %v582_v14  ;;  %s4323_s21 = sld [smem:[#allocation21_spill]] }
  0x10   : > { %s2758_s16 = sshll.u32 %s4365_s27, 6  ;;  %s2932_s24 = smov 1  }
  0x11   : > { %vm584_vm0 = vcmp.lt.s32.totalorder %v3105_v15, 16  ;;  %vm622_vm1 = vcmp.lt.s32.totalorder %v3105_v15, 112  ;;  %s2933_s25 = smov 127   ;;  %vm746_vm2 = vcmp.lt.s32.totalorder %v3105_v15, 1  ;;  %vm708_vm3 = vcmp.lt.s32.totalorder %v3105_v15, 127 }
  0x13   : > { %s3061_s30 = scalar_lea.vmem %s4322_s0, %s2758_s16 }
  0x14   : > { %v3064_v1 = vld [vmem:[%s3061_s30 + $0x28] sm:$0xff]  ;;  %v3067_v2 = vld [vmem:[%s3061_s30 + $0x20] sm:$0xff]  ;;  %v3073_v3 = vld [vmem:[%s3061_s30 + $0x10] sm:$0xff] }
  0x15   : > { %578 = vrot.lane.b32.xlu1 %v3064_v1, %s2930_s18  ;;  %570 = vrot.lane.b32.xlu0 %v3067_v2, %s2930_s18  ;;  %v3076_v4 = vld [vmem:[%s3061_s30 + $0x18] sm:$0xff]  ;;  %v3084_v7 = vld [vmem:[%s3061_s30 + $0x30] sm:$0xff]  ;;  %v648_v31 = vmul.f32 2.0, %v3067_v2  ;;  %v649_v32 = vmul.f32 2.0, %v3064_v1 }
  0x16   : > { %610 = vrot.lane.b32.xlu2 %v3067_v2, %s2931_s19  ;;  %v1023_v5 = vpack.c.bf16 %v3076_v4, %v3073_v3  ;;  %v3081_v6 = vld [vmem:[%s3061_s30 + $0x38] sm:$0xff]  ;;  %v3092_v8 = vld [vmem:[%s3061_s30] sm:$0xff]  ;;  %v3096_v9 = vld [vmem:[%s3061_s30 + $0x8] sm:$0xff]  ;;  %v650_v38 = vmul.f32 2.0, %v3084_v7 }
  0x17   : > { %v559_v16 = vld [vmem:[%s4323_s21] ss:$4 sm:$0x3]  ;;  %v2551_v22 = vld [vmem:[%s4323_s21 + $0x1] ss:$4 sm:$0x3] }
  0x18   : > { %1027 = vst [vmem:[#allocation2 + $0x8] sm:$0xff] %v1023_v5  ;;  %v3111_v20 = vperm.slane %v559_v16, 0  ;;  %v3113_v21 = vperm.slane %v559_v16, 1  ;;  %v3127_v27 = vperm.slane %v2551_v22, 0  ;;  %v3129_v28 = vperm.slane %v2551_v22, 1 }
  0x19   : > { %v651_v37 = vmul.f32 2.0, %v3081_v6 }
  0x1d   : > { %580 = vrot.lane.b32.xlu1 %v3081_v6, %s2930_s18  ;;  %572 = vrot.lane.b32.xlu0 %v3084_v7, %s2930_s18 }
  0x1e   : > { %612 = vrot.lane.b32.xlu2 %v3084_v7, %s2931_s19 }
  0x25   : > { %620 = vrot.lane.b32.xlu1 %v3081_v6, %s2931_s19  ;;  %618 = vrot.lane.b32.xlu0 %v3064_v1, %s2931_s19 }
  0x26   : > { %566 = vrot.lane.b32.xlu2 %v3092_v8, %s2930_s18 }
  0x2d   : > { %568 = vrot.lane.b32.xlu0 %v3073_v3, %s2930_s18  ;;  %574 = vrot.lane.b32.xlu1 %v3096_v9, %s2930_s18 }
  0x2e   : > { %576 = vrot.lane.b32.xlu2 %v3076_v4, %s2930_s18 }
  0x35   : > { %606 = vrot.lane.b32.xlu0 %v3092_v8, %s2931_s19  ;;  %608 = vrot.lane.b32.xlu1 %v3073_v3, %s2931_s19 }
  0x36   : > { %614 = vrot.lane.b32.xlu2 %v3096_v9, %s2931_s19 }
  0x3d   : > { %616 = vrot.lane.b32.xlu0 %v3076_v4, %s2931_s19  ;;  %s4113_s19 = scalar_lea.vmem %s4300_s17, %s2758_s16 }
  0x70   : > { %v611_v10 = vpop.permute.xlu2 %610 }
  0x78   : > { %v613_v11 = vpop.permute.xlu2 %612 }
  0x80   : > { %v567_v19 = vpop.permute.xlu2 %566 }
  0x87   : > { %v579_v12 = vpop.permute.xlu1 %578  ;;  %v571_v13 = vpop.permute.xlu0 %570 }
  0x88   : > { %v587_v23 = vsel %vm584_vm0, %v571_v13, %v579_v12  ;;  %v591_v24 = vsel %vm584_vm0, %v579_v12, %v571_v13  ;;  %v577_v52 = vpop.permute.xlu2 %576  ;;  %v645_v12 = vmul.f32 2.0, %v3096_v9 }
  0x89   : > { %v3132_v29 = vmul.f32 %v3111_v20, %v591_v24  ;;  %v3135_v30 = vmul.f32 %v3113_v21, %v587_v23 }
  0x8b   : > { %v656_v47 = vadd.f32 %v648_v31, %v3132_v29  ;;  %v657_v48 = vadd.f32 %v649_v32, %v3135_v30 }
  0x8f   : > { %v581_v17 = vpop.permute.xlu1 %580  ;;  %v573_v18 = vpop.permute.xlu0 %572 }
  0x90   : > { %v588_v25 = vsel %vm584_vm0, %v573_v18, %v581_v17  ;;  %v592_v26 = vsel %vm584_vm0, %v581_v17, %v573_v18  ;;  %v615_v0 = vpop.permute.xlu2 %614 }
  0x91   : > { %v3140_v33 = vmul.f32 %v3111_v20, %v592_v26  ;;  %v3143_v34 = vmul.f32 %v3113_v21, %v588_v25 }
  0x93   : > { %v659_v53 = vadd.f32 %v651_v37, %v3143_v34  ;;  %v658_v54 = vadd.f32 %v650_v38, %v3140_v33 }
  0x97   : > { %v621_v35 = vpop.permute.xlu1 %620  ;;  %v619_v36 = vpop.permute.xlu0 %618 }
  0x98   : > { %v626_v39 = vsel %vm622_vm1, %v613_v11, %v621_v35  ;;  %v630_v40 = vsel %vm622_vm1, %v621_v35, %v613_v11  ;;  %v625_v41 = vsel %vm622_vm1, %v611_v10, %v619_v36  ;;  %v629_v42 = vsel %vm622_vm1, %v619_v36, %v611_v10 }
  0x99   : > { %v3156_v43 = vmul.f32 %v3127_v27, %v626_v39  ;;  %v3159_v44 = vmul.f32 %v3129_v28, %v630_v40  ;;  %v3162_v45 = vmul.f32 %v3127_v27, %v625_v41  ;;  %v3165_v46 = vmul.f32 %v3129_v28, %v629_v42 }
  0x9a   : > { %v644_v11 = vmul.f32 2.0, %v3092_v8  ;;  %v646_v39 = vmul.f32 2.0, %v3073_v3  ;;  %v647_v40 = vmul.f32 2.0, %v3076_v4 }
  0x9b   : > { %v3171_v49 = vsub.f32 %v3165_v46, %v3135_v30  ;;  %v3175_v50 = vsub.f32 %v3156_v43, %v3140_v33  ;;  %v3179_v51 = vsub.f32 %v3162_v45, %v3132_v29  ;;  %v3188_v55 = vadd.f32 %v656_v47, %v3162_v45 }
  0x9c   : > { %v3191_v56 = vadd.f32 %v659_v53, %v3159_v44  ;;  %v3194_v57 = vadd.f32 %v657_v48, %v3165_v46  ;;  %v3199_v58 = vadd.f32 %v658_v54, %v3156_v43  ;;  %v3207_v63 = vsub.f32 %v3159_v44, %v3143_v34 }
  0x9d   : > { %788 = vrot.lane.b32.xlu1 %v3171_v49, %s2932_s24  ;;  %782 = vrot.lane.b32.xlu0 %v3175_v50, %s2932_s24 }
  0x9e   : > { %780 = vrot.lane.b32.xlu2 %v3179_v51, %s2932_s24 }
  0x9f   : > { %v569_v59 = vpop.permute.xlu0 %568  ;;  %v575_v60 = vpop.permute.xlu1 %574 }
  0xa0   : > { %v585_v61 = vsel %vm584_vm0, %v567_v19, %v575_v60  ;;  %v589_v62 = vsel %vm584_vm0, %v575_v60, %v567_v19  ;;  %v586_v23 = vsel %vm584_vm0, %v569_v59, %v577_v52  ;;  %v590_v24 = vsel %vm584_vm0, %v577_v52, %v569_v59 }
  0xa1   : > { %v3214_v5 = vmul.f32 %v3111_v20, %v589_v62  ;;  %v3217_v10 = vmul.f32 %v3113_v21, %v585_v61  ;;  %v600_v37 = vmul.f32 %v3111_v20, %v590_v24  ;;  %v601_v38 = vmul.f32 %v3113_v21, %v586_v23 }
  0xa3   : > { %v652_v19 = vadd.f32 %v644_v11, %v3214_v5  ;;  %v653_v22 = vadd.f32 %v645_v12, %v3217_v10  ;;  %v654_v52 = vadd.f32 %v646_v39, %v600_v37  ;;  %v655_v21 = vadd.f32 %v647_v40, %v601_v38 }
  0xa5   : > { %830 = vrot.lane.b32.xlu1 %v3175_v50, %s2933_s25  ;;  %828 = vrot.lane.b32.xlu0 %v3179_v51, %s2933_s25 }
  0xa6   : > { %790 = vrot.lane.b32.xlu2 %v3207_v63, %s2932_s24 }
  0xa7   : > { %v607_v13 = vpop.permute.xlu0 %606  ;;  %v609_v36 = vpop.permute.xlu1 %608 }
  0xa8   : > { %v623_v14 = vsel %vm622_vm1, %v607_v13, %v615_v0  ;;  %v627_v16 = vsel %vm622_vm1, %v615_v0, %v607_v13  ;;  %v677_v13 = vadd.f32 %v3217_v10, %v3096_v9 }
  0xa9   : > { %v3228_v17 = vmul.f32 %v3127_v27, %v623_v14  ;;  %v3231_v18 = vmul.f32 %v3129_v28, %v627_v16 }
  0xab   : > { %v3241_v25 = vsub.f32 %v3228_v17, %v3214_v5  ;;  %v3244_v26 = vadd.f32 %v652_v19, %v3228_v17  ;;  %v3247_v31 = vadd.f32 %v653_v22, %v3231_v18  ;;  %v960_v32 = vmax.f32 %v3214_v5, %v3228_v17 }
  0xac   : > { %v961_v35 = vmax.f32 %v3217_v10, %v3231_v18  ;;  %v3273_v54 = vsub.f32 %v3231_v18, %v3217_v10  ;;  %v3351_v14 = vadd.f32 %v677_v13, %v3231_v18  ;;  %v4302_v19 = vmov 0   ;;  %v1101_v13 = vld [vmem:[%s4286_s3 + $0x78] sm:$0xff] }
  0xad   : > { %838 = vrot.lane.b32.xlu0 %v3207_v63, %s2933_s25  ;;  %776 = vrot.lane.b32.xlu1 %v3241_v25, %s2932_s24 }
  0xae   : > { %836 = vrot.lane.b32.xlu2 %v3171_v49, %s2933_s25  ;;  %2859 = vset.pattern.permute.xlu0 %v4302_v19 }
  0xaf   : > { %v617_v41 = vpop.permute.xlu0 %616  ;;  %2858 = vset.pattern.permute.xlu2 %v4302_v19  ;;  %2857 = vset.pattern.permute.xlu1 %v4302_v19 }
  0xb0   : > { %v624_v42 = vsel %vm622_vm1, %v609_v36, %v617_v41  ;;  %v628_v47 = vsel %vm622_vm1, %v617_v41, %v609_v36 }
  0xb1   : > { %v638_v48 = vmul.f32 %v3127_v27, %v624_v42  ;;  %v639_v20 = vmul.f32 %v3129_v28, %v628_v47  ;;  %v681_v27 = vadd.f32 %v3135_v30, %v3064_v1  ;;  %v680_v28 = vadd.f32 %v3132_v29, %v3067_v2 }
  0xb2   : > { %v682_v30 = vadd.f32 %v3140_v33, %v3084_v7  ;;  %v683_v29 = vadd.f32 %v3143_v34, %v3081_v6  ;;  %v676_v33 = vadd.f32 %v3214_v5, %v3092_v8  ;;  %v812_v47 = vmul.f32 2.0, %v3179_v51 }
  0xb3   : > { %v3269_v53 = vsub.f32 %v638_v48, %v600_v37  ;;  %v3275_v59 = vsub.f32 %v639_v20, %v601_v38  ;;  %v3277_v60 = vadd.f32 %v654_v52, %v638_v48  ;;  %v3279_v61 = vadd.f32 %v655_v21, %v639_v20 }
  0xb4   : > { %v3298_v62 = vadd.f32 %v681_v27, %v3165_v46  ;;  %v3301_v0 = vadd.f32 %v680_v28, %v3162_v45  ;;  %v3314_v46 = vadd.f32 %v682_v30, %v3156_v43  ;;  %v3317_v45 = vadd.f32 %v683_v29, %v3159_v44  ;;  %v1100_v29 = vld [vmem:[%s4286_s3 + $0x70] sm:$0xff] }
  0xb5   : > { %784 = vrot.lane.b32.xlu0 %v3273_v54, %s2932_s24  ;;  %786 = vrot.lane.b32.xlu1 %v3275_v59, %s2932_s24  ;;  %v3328_v34 = vadd.f32 %v676_v33, %v3228_v17  ;;  %v679_v43 = vadd.f32 %v601_v38, %v3076_v4  ;;  %v678_v44 = vadd.f32 %v600_v37, %v3073_v3  ;;  %v2553_v38 = vld [vmem:[%s4323_s21 + $0x3] ss:$4 sm:$0x3] }
  0xb6   : > { %778 = vrot.lane.b32.xlu2 %v3269_v53, %s2932_s24  ;;  %v3416_v41 = vperm.slane %v2553_v38, 0  ;;  %v3418_v42 = vperm.slane %v2553_v38, 1  ;;  %v1098_v33 = vld [vmem:[%s4286_s3 + $0x60] sm:$0xff]  ;;  %v963_v5 = vmax.f32 %v961_v35, %v3096_v9 }
  0xb7   : > { %v3338_v11 = vadd.f32 %v679_v43, %v639_v20  ;;  %v3340_v12 = vadd.f32 %v678_v44, %v638_v48  ;;  %v813_v48 = vmul.f32 2.0, %v3171_v49 }
  0xb8   : > { %v3544_v18 = vrot.slane %v963_v5, 3 }
  0xbd   : > { %826 = vrot.lane.b32.xlu0 %v3269_v53, %s2933_s25  ;;  %832 = vrot.lane.b32.xlu1 %v3273_v54, %s2933_s25 }
  0xbe   : > { %824 = vrot.lane.b32.xlu2 %v3241_v25, %s2933_s25 }
  0xc5   : > { %876 = vrot.lane.b32.xlu0 %v3298_v62, %s2932_s24  ;;  %868 = vrot.lane.b32.xlu1 %v3301_v0, %s2932_s24 }
  0xc6   : > { %834 = vrot.lane.b32.xlu2 %v3275_v59, %s2933_s25 }
  0xcd   : > { %910 = vrot.lane.b32.xlu0 %v3314_v46, %s2933_s25  ;;  %878 = vrot.lane.b32.xlu1 %v3317_v45, %s2932_s24 }
  0xce   : > { %870 = vrot.lane.b32.xlu2 %v3314_v46, %s2932_s24 }
  0xd5   : > { %864 = vrot.lane.b32.xlu0 %v3328_v34, %s2932_s24  ;;  %916 = vrot.lane.b32.xlu1 %v3298_v62, %s2933_s25 }
  0xd6   : > { %908 = vrot.lane.b32.xlu2 %v3301_v0, %s2933_s25 }
  0xdd   : > { %874 = vrot.lane.b32.xlu0 %v3338_v11, %s2932_s24  ;;  %866 = vrot.lane.b32.xlu1 %v3340_v12, %s2932_s24 }
  0xde   : > { %918 = vrot.lane.b32.xlu2 %v3317_v45, %s2933_s25 }
  0xe5   : > { %912 = vrot.lane.b32.xlu0 %v3351_v14, %s2933_s25  ;;  %904 = vrot.lane.b32.xlu1 %v3328_v34, %s2933_s25 }
  0xe6   : > { %872 = vrot.lane.b32.xlu2 %v3351_v14, %s2932_s24 }
  0xed   : > { %696 = vrot.lane.b32.xlu0 %v3188_v55, %s2933_s25  ;;  %914 = vrot.lane.b32.xlu1 %v3338_v11, %s2933_s25 }
  0xee   : > { %906 = vrot.lane.b32.xlu2 %v3340_v12, %s2933_s25 }
  0xf5   : > { %706 = vrot.lane.b32.xlu0 %v3191_v56, %s2933_s25  ;;  %698 = vrot.lane.b32.xlu1 %v3199_v58, %s2933_s25 }
  0xf6   : > { %704 = vrot.lane.b32.xlu2 %v3194_v57, %s2933_s25 }
  0xf8   : > { %v781_v16 = vpop.permute.xlu2 %780 }
  0xfd   : > { %742 = vrot.lane.b32.xlu0 %v3194_v57, %s2932_s24  ;;  %734 = vrot.lane.b32.xlu1 %v3188_v55, %s2932_s24  ;;  %v2552_v57 = vld [vmem:[%s4323_s21 + $0x2] ss:$4 sm:$0x3] }
  0xfe   : > { %736 = vrot.lane.b32.xlu2 %v3199_v58, %s2932_s24  ;;  %v3398_v24 = vperm.slane %v2552_v57, 0  ;;  %v3400_v36 = vperm.slane %v2552_v57, 1 }
 0x100   : > { %v791_v22 = vpop.permute.xlu2 %790 }
 0x105   : > { %694 = vrot.lane.b32.xlu0 %v3277_v60, %s2933_s25  ;;  %744 = vrot.lane.b32.xlu1 %v3191_v56, %s2932_s24 }
 0x106   : > { %692 = vrot.lane.b32.xlu2 %v3244_v26, %s2933_s25 }
 0x108   : > { %v837_v55 = vpop.permute.xlu2 %836 }
 0x10d   : > { %700 = vrot.lane.b32.xlu1 %v3247_v31, %s2933_s25  ;;  %730 = vrot.lane.b32.xlu0 %v3244_v26, %s2932_s24 }
 0x10e   : > { %702 = vrot.lane.b32.xlu2 %v3279_v61, %s2933_s25 }
 0x10f   : > { %v789_v56 = vpop.permute.xlu1 %788  ;;  %v783_v58 = vpop.permute.xlu0 %782 }
 0x110   : > { %v3396_v23 = vpop.permute.xlu2 %778  ;;  %v794_v26 = vsel %vm746_vm2, %v781_v16, %v789_v56  ;;  %v798_v37 = vsel %vm746_vm2, %v789_v56, %v781_v16  ;;  %v795_v51 = vsel %vm746_vm2, %v783_v58, %v791_v22  ;;  %v799_v49 = vsel %vm746_vm2, %v791_v22, %v783_v58 }
 0x111   : > { %v804_v39 = vmul.f32 %v798_v37, %v3398_v24  ;;  %v805_v40 = vmul.f32 %v794_v26, %v3400_v36  ;;  %v806_v16 = vmul.f32 %v799_v49, %v3398_v24  ;;  %v814_v22 = vmul.f32 2.0, %v3175_v50  ;;  %v1099_v50 = vld [vmem:[%s4286_s3 + $0x68] sm:$0xff] }
 0x112   : > { %v815_v56 = vmul.f32 2.0, %v3207_v63  ;;  %v1095_v63 = vld [vmem:[%s4286_s3 + $0x48] sm:$0xff] }
 0x113   : > { %v820_v27 = vadd.f32 %v812_v47, %v804_v39  ;;  %v821_v28 = vadd.f32 %v813_v48, %v805_v40  ;;  %v822_v40 = vadd.f32 %v814_v22, %v806_v16  ;;  %v808_v22 = vmul.f32 2.0, %v3241_v25 }
 0x115   : > { %732 = vrot.lane.b32.xlu1 %v3277_v60, %s2932_s24  ;;  %740 = vrot.lane.b32.xlu0 %v3279_v61, %s2932_s24 }
 0x116   : > { %738 = vrot.lane.b32.xlu2 %v3247_v31, %s2932_s24 }
 0x117   : > { %v831_v20 = vpop.permute.xlu1 %830  ;;  %v829_v52 = vpop.permute.xlu0 %828 }
 0x118   : > { %v842_v21 = vsel %vm708_vm3, %v829_v52, %v837_v55  ;;  %v846_v60 = vsel %vm708_vm3, %v837_v55, %v829_v52  ;;  %v3428_v61 = vpop.permute.xlu2 %824  ;;  %v807_v55 = vmul.f32 %v795_v51, %v3400_v36 }
 0x119   : > { %v852_v30 = vmul.f32 %v842_v21, %v3416_v41  ;;  %v853_v31 = vmul.f32 %v846_v60, %v3418_v42 }
 0x11a   : > { %v823_v47 = vadd.f32 %v815_v56, %v807_v55  ;;  %v809_v56 = vmul.f32 2.0, %v3273_v54 }
 0x11b   : > { %v860_v43 = vadd.f32 %v852_v30, %v820_v27  ;;  %v861_v44 = vadd.f32 %v853_v31, %v821_v28 }
 0x11d   : > { %v1040_v57 = vpack.c.bf16 %v861_v44, %v860_v43  ;;  %1174 = vperm.xlu1 %2857, %v1100_v29   ;;  %1164 = vperm.xlu0 %2859, %v1098_v33   ;;  %v1097_v43 = vld [vmem:[%s4286_s3 + $0x58] sm:$0xff]  ;;  %v1090_v44 = vld [vmem:[%s4286_s3 + $0x20] sm:$0xff] }
 0x11e   : > { %1179 = vperm.xlu2 %2858, %v1101_v13  }
 0x11f   : > { %1044 = vst [vmem:[#allocation2 + $0x50] sm:$0xff] %v1040_v57  ;;  %v839_v58 = vpop.permute.xlu0 %838  ;;  %v777_v26 = vpop.permute.xlu1 %776 }
 0x120   : > { %v843_v37 = vsel %vm708_vm3, %v831_v20, %v839_v58  ;;  %v847_v38 = vsel %vm708_vm3, %v839_v58, %v831_v20  ;;  %v835_v39 = vpop.permute.xlu2 %834  ;;  %v1096_v20 = vld [vmem:[%s4286_s3 + $0x50] sm:$0xff]  ;;  %v810_v58 = vmul.f32 2.0, %v3269_v53 }
 0x121   : > { %v854_v48 = vmul.f32 %v843_v37, %v3416_v41  ;;  %v855_v52 = vmul.f32 %v847_v38, %v3418_v42 }
 0x123   : > { %v862_v21 = vadd.f32 %v854_v48, %v822_v40  ;;  %v863_v60 = vadd.f32 %v855_v52, %v823_v47 }
 0x125   : > { %v1041_v27 = vpack.c.bf16 %v863_v60, %v862_v21  ;;  %1169 = vperm.xlu1 %2857, %v1099_v50   ;;  %1149 = vperm.xlu0 %2859, %v1095_v63  }
 0x126   : > { %1154 = vperm.xlu2 %2858, %v1096_v20  }
 0x127   : > { %1045 = vst [vmem:[#allocation2 + $0x58] sm:$0xff] %v1041_v27  ;;  %v785_v28 = vpop.permute.xlu0 %784  ;;  %v787_v30 = vpop.permute.xlu1 %786  ;;  %v1089_v27 = vld [vmem:[%s4286_s3 + $0x18] sm:$0xff] }
 0x128   : > { %v792_v31 = vsel %vm746_vm2, %v777_v26, %v785_v28  ;;  %v796_v51 = vsel %vm746_vm2, %v785_v28, %v777_v26  ;;  %v793_v49 = vsel %vm746_vm2, %v3396_v23, %v787_v30  ;;  %v797_v29 = vsel %vm746_vm2, %v787_v30, %v3396_v23  ;;  %v871_v33 = vpop.permute.xlu2 %870  ;;  %v1094_v23 = vld [vmem:[%s4286_s3 + $0x40] sm:$0xff] }
 0x129   : > { %v800_v13 = vmul.f32 %v796_v51, %v3398_v24  ;;  %v801_v16 = vmul.f32 %v792_v31, %v3400_v36  ;;  %v802_v55 = vmul.f32 %v797_v29, %v3398_v24  ;;  %v803_v57 = vmul.f32 %v793_v49, %v3400_v36  ;;  %v1093_v51 = vld [vmem:[%s4286_s3 + $0x38] sm:$0xff] }
 0x12a   : > { %v811_v26 = vmul.f32 2.0, %v3275_v59 }
 0x12b   : > { %v816_v37 = vadd.f32 %v808_v22, %v800_v13  ;;  %v817_v38 = vadd.f32 %v809_v56, %v801_v16  ;;  %v818_v40 = vadd.f32 %v810_v58, %v802_v55  ;;  %v962_v13 = vmax.f32 %v960_v32, %v3092_v8  ;;  %v1091_v55 = vld [vmem:[%s4286_s3 + $0x28] sm:$0xff] }
 0x12c   : > { %v819_v47 = vadd.f32 %v811_v26, %v803_v57 }
 0x12d   : > { %1159 = vperm.xlu1 %2857, %v1097_v43   ;;  %1124 = vperm.xlu0 %2859, %v1090_v44   ;;  %v3523_v57 = vrot.slane %v962_v13, 3 }
 0x12e   : > { %1144 = vperm.xlu2 %2858, %v1094_v23   ;;  %v1088_v23 = vld [vmem:[%s4286_s3 + $0x10] sm:$0xff] }
 0x12f   : > { %v827_v48 = vpop.permute.xlu0 %826  ;;  %v833_v52 = vpop.permute.xlu1 %832 }
 0x130   : > { %v841_v50 = vsel %vm708_vm3, %v827_v48, %v835_v39  ;;  %v845_v25 = vsel %vm708_vm3, %v835_v39, %v827_v48  ;;  %v840_v53 = vsel %vm708_vm3, %v3428_v61, %v833_v52  ;;  %v844_v54 = vsel %vm708_vm3, %v833_v52, %v3428_v61  ;;  %v3501_v59 = vpop.permute.xlu2 %908  ;;  %v1092_v39 = vld [vmem:[%s4286_s3 + $0x30] sm:$0xff] }
 0x131   : > { %v850_v63 = vmul.f32 %v841_v50, %v3416_v41  ;;  %v851_v21 = vmul.f32 %v845_v25, %v3418_v42  ;;  %v848_v60 = vmul.f32 %v840_v53, %v3416_v41  ;;  %v849_v20 = vmul.f32 %v844_v54, %v3418_v42  ;;  %v1087_v54 = vld [vmem:[%s4286_s3 + $0x8] sm:$0xff] }
 0x132   : > { %v951_v48 = vmul.f32 9.0, %v3081_v6 }
 0x133   : > { %v858_v28 = vadd.f32 %v850_v63, %v818_v40  ;;  %v859_v61 = vadd.f32 %v851_v21, %v819_v47  ;;  %v856_v30 = vadd.f32 %v848_v60, %v816_v37  ;;  %v857_v31 = vadd.f32 %v849_v20, %v817_v38 }
 0x134   : > { %v950_v47 = vmul.f32 9.0, %v3084_v7 }
 0x135   : > { %v1039_v49 = vpack.c.bf16 %v859_v61, %v858_v28  ;;  %v1038_v29 = vpack.c.bf16 %v857_v31, %v856_v30  ;;  %1134 = vperm.xlu1 %2857, %v1092_v39   ;;  %1119 = vperm.xlu0 %2859, %v1089_v27  }
 0x136   : > { %1139 = vperm.xlu2 %2858, %v1093_v51  }
 0x137   : > { %1043 = vst [vmem:[#allocation2 + $0x48] sm:$0xff] %v1039_v49  ;;  %v877_v43 = vpop.permute.xlu0 %876  ;;  %v869_v44 = vpop.permute.xlu1 %868  ;;  %v948_v49 = vmul.f32 9.0, %v3067_v2 }
 0x138   : > { %1042 = vst [vmem:[#allocation2 + $0x40] sm:$0xff] %v1038_v29  ;;  %v919_v16 = vpop.permute.xlu2 %918  ;;  %v882_v35 = vsel %vm746_vm2, %v869_v44, %v877_v43  ;;  %v886_v40 = vsel %vm746_vm2, %v877_v43, %v869_v44  ;;  %v949_v44 = vmul.f32 9.0, %v3064_v1 }
 0x139   : > { %v892_v63 = vmul.f32 %v886_v40, %v3398_v24  ;;  %v893_v20 = vmul.f32 %v882_v35, %v3400_v36 }
 0x13b   : > { %v900_v31 = vadd.f32 %v892_v63, %v3301_v0  ;;  %v901_v43 = vadd.f32 %v893_v20, %v3298_v62 }
 0x13d   : > { %1129 = vperm.xlu1 %2857, %v1091_v55   ;;  %970 = vrot.lane.b32.xlu0 %v3523_v57, %s2932_s24 }
 0x13e   : > { %1114 = vperm.xlu2 %2858, %v1088_v23  }
 0x13f   : > { %v911_v17 = vpop.permute.xlu0 %910  ;;  %v879_v32 = vpop.permute.xlu1 %878 }
 0x140   : > { %v923_v22 = vsel %vm708_vm3, %v911_v17, %v919_v16  ;;  %v927_v56 = vsel %vm708_vm3, %v919_v16, %v911_v17  ;;  %v883_v58 = vsel %vm746_vm2, %v871_v33, %v879_v32  ;;  %v887_v26 = vsel %vm746_vm2, %v879_v32, %v871_v33  ;;  %v873_v37 = vpop.permute.xlu2 %872  ;;  %v1086_v33 = vld [vmem:[%s4286_s3] sm:$0xff] }
 0x141   : > { %v894_v38 = vmul.f32 %v887_v26, %v3398_v24  ;;  %v895_v10 = vmul.f32 %v883_v58, %v3400_v36  ;;  %v934_v52 = vmul.f32 %v923_v22, %v3416_v41  ;;  %v935_v50 = vmul.f32 %v927_v56, %v3418_v42 }
 0x143   : > { %v902_v25 = vadd.f32 %v894_v38, %v3314_v46  ;;  %v903_v53 = vadd.f32 %v895_v10, %v3317_v45  ;;  %v945_v10 = vmul.f32 9.0, %v3096_v9 }
 0x145   : > { %v942_v21 = vadd.f32 %v934_v52, %v902_v25  ;;  %v943_v60 = vadd.f32 %v935_v50, %v903_v53  ;;  %1104 = vperm.xlu1 %2857, %v1086_v33   ;;  %980 = vrot.lane.b32.xlu0 %v3544_v18, %s2933_s25 }
 0x146   : > { %1109 = vperm.xlu2 %2858, %v1087_v54  }
 0x147   : > { %v958_v39 = vsub.f32 %v942_v21, %v950_v47  ;;  %v959_v27 = vsub.f32 %v943_v60, %v951_v48  ;;  %v865_v46 = vpop.permute.xlu0 %864  ;;  %v917_v28 = vpop.permute.xlu1 %916  ;;  %v944_v47 = vmul.f32 9.0, %v3092_v8 }
 0x148   : > { %v922_v45 = vsel %vm708_vm3, %v3501_v59, %v917_v28  ;;  %v926_v61 = vsel %vm708_vm3, %v917_v28, %v3501_v59  ;;  %v907_v30 = vpop.permute.xlu2 %906  ;;  %v880_v62 = vsel %vm746_vm2, %v865_v46, %v873_v37  ;;  %v884_v22 = vsel %vm746_vm2, %v873_v37, %v865_v46 }
 0x149   : > { %v1049_v51 = vpack.c.bf16 %v959_v27, %v958_v39  ;;  %v932_v29 = vmul.f32 %v922_v45, %v3416_v41  ;;  %v933_v13 = vmul.f32 %v926_v61, %v3418_v42  ;;  %v888_v56 = vmul.f32 %v884_v22, %v3398_v24 }
 0x14a   : > { %v889_v58 = vmul.f32 %v880_v62, %v3400_v36 }
 0x14b   : > { %1053 = vst [vmem:[#allocation2 + $0x78] sm:$0xff] %v1049_v51  ;;  %v940_v16 = vadd.f32 %v932_v29, %v900_v31  ;;  %v941_v55 = vadd.f32 %v933_v13, %v901_v43  ;;  %v896_v33 = vadd.f32 %v888_v56, %v3328_v34  ;;  %v947_v29 = vmul.f32 9.0, %v3076_v4 }
 0x14c   : > { %v897_v52 = vadd.f32 %v889_v58, %v3351_v14 }
 0x14d   : > { %v956_v23 = vsub.f32 %v940_v16, %v948_v49  ;;  %972 = vrot.lane.b32.xlu1 %v3544_v18, %s2932_s24  ;;  %v957_v59 = vsub.f32 %v941_v55, %v949_v44  ;;  %v946_v49 = vmul.f32 9.0, %v3073_v3 }
 0x14e   : > { %978 = vrot.lane.b32.xlu2 %v3523_v57, %s2933_s25 }
 0x14f   : > { %v875_v0 = vpop.permute.xlu0 %874  ;;  %v867_v5 = vpop.permute.xlu1 %866  ;;  %v1048_v17 = vpack.c.bf16 %v957_v59, %v956_v23 }
 0x150   : > { %v705_v32 = vpop.permute.xlu2 %704  ;;  %v881_v21 = vsel %vm746_vm2, %v867_v5, %v875_v0  ;;  %v885_v60 = vsel %vm746_vm2, %v875_v0, %v867_v5 }
 0x151   : > { %1052 = vst [vmem:[#allocation2 + $0x70] sm:$0xff] %v1048_v17  ;;  %v890_v34 = vmul.f32 %v885_v60, %v3398_v24  ;;  %v891_v14 = vmul.f32 %v881_v21, %v3400_v36  ;;  %v2632_v60 = vld [vmem:[#allocation2 + $0x50] sm:$0xf] }
 0x152   : > { %v2783_v37 = vld [vmem:[#allocation2 + $0x74] sm:$0xf0]  ;;  %v2650_v63 = vld [vmem:[#allocation2 + $0x78] sm:$0xf0] }
 0x153   : > { %v898_v13 = vadd.f32 %v890_v34, %v3340_v12  ;;  %v899_v16 = vadd.f32 %v891_v14, %v3338_v11 }
 0x157   : > { %v913_v26 = vpop.permute.xlu0 %912  ;;  %v905_v38 = vpop.permute.xlu1 %904 }
 0x158   : > { %v920_v35 = vsel %vm708_vm3, %v905_v38, %v913_v26  ;;  %v924_v40 = vsel %vm708_vm3, %v913_v26, %v905_v38  ;;  %v3594_v48 = vpop.permute.xlu2 %736  ;;  %v2648_v53 = vld [vmem:[#allocation2 + $0x70] sm:$0xf]  ;;  %v2782_v54 = vld [vmem:[#allocation2 + $0x74] sm:$0xf] }
 0x159   : > { %v928_v50 = vmul.f32 %v920_v35, %v3416_v41  ;;  %v929_v25 = vmul.f32 %v924_v40, %v3418_v42  ;;  %v2649_v20 = vor.u32 %v2783_v37, %v2648_v53  ;;  %v2653_v39 = vor.u32 %v2782_v54, %v2650_v63  ;;  %v2779_v53 = vld [vmem:[#allocation2 + $0x54] sm:$0xf0]  ;;  %v2634_v54 = vld [vmem:[#allocation2 + $0x58] sm:$0xf0] }
 0x15a   : > { %v2633_v14 = vor.u32 %v2779_v53, %v2632_v60 }
 0x15b   : > { %v936_v27 = vadd.f32 %v928_v50, %v896_v33  ;;  %v937_v46 = vadd.f32 %v929_v25, %v897_v52  ;;  %1310 = vmatpush.bf16.msra.mxu0 %v2649_v20  ;;  %1359 = vmatpush.bf16.msra.mxu1 %v2653_v39  ;;  %v2778_v20 = vld [vmem:[#allocation2 + $0x54] sm:$0xf]  ;;  %v2777_v39 = vld [vmem:[#allocation2 + $0x44] sm:$0xf0] }
 0x15d   : > { %v952_v28 = vsub.f32 %v936_v27, %v944_v47  ;;  %v953_v45 = vsub.f32 %v937_v46, %v945_v10  ;;  %v1024_v27 = vpack.c.bf16 %v3064_v1, %v3067_v2  ;;  %v1025_v46 = vpack.c.bf16 %v3081_v6, %v3084_v7 }
 0x15f   : > { %v1046_v61 = vpack.c.bf16 %v953_v45, %v952_v28  ;;  %v697_v31 = vpop.permute.xlu0 %696  ;;  %v915_v51 = vpop.permute.xlu1 %914  ;;  %v2637_v28 = vor.u32 %v2778_v20, %v2634_v54  ;;  %v2624_v45 = vld [vmem:[#allocation2 + $0x40] sm:$0xf]  ;;  %1028 = vst [vmem:[#allocation2 + $0x10] sm:$0xff] %v1024_v27 }
 0x160   : > { %v921_v43 = vsel %vm708_vm3, %v907_v30, %v915_v51  ;;  %v925_v44 = vsel %vm708_vm3, %v915_v51, %v907_v30  ;;  %v3616_v59 = vpop.permute.xlu2 %692  ;;  %v711_v11 = vsel %vm708_vm3, %v697_v31, %v705_v32  ;;  %v715_v12 = vsel %vm708_vm3, %v705_v32, %v697_v31  ;;  %v2626_v31 = vld [vmem:[#allocation2 + $0x48] sm:$0xf0]  ;;  %1029 = vst [vmem:[#allocation2 + $0x18] sm:$0xff] %v1025_v46 }
 0x161   : > { %1050 = vst [vmem:[#allocation2 + $0x60] sm:$0xff] %v1046_v61  ;;  %v930_v55 = vmul.f32 %v921_v43, %v3416_v41  ;;  %v931_v23 = vmul.f32 %v925_v44, %v3418_v42  ;;  %v726_v38 = vmul.f32 %v3416_v41, %v711_v11  ;;  %v727_v10 = vmul.f32 %v3418_v42, %v715_v12  ;;  %v2776_v61 = vld [vmem:[#allocation2 + $0x44] sm:$0xf] }
 0x162   : > { %v2625_v7 = vor.u32 %v2777_v39, %v2624_v45  ;;  %v2629_v44 = vor.u32 %v2776_v61, %v2626_v31  ;;  %v1473_v45 = vld [vmem:[%s4288_s5 + $0x8] sm:$0xff] }
 0x163   : > { %v938_v3 = vadd.f32 %v930_v55, %v898_v13  ;;  %v939_v0 = vadd.f32 %v931_v23, %v899_v16  ;;  %1495 = vperm.xlu0 %2859, %v1473_v45   ;;  %v1747_v45 = vld [vmem:[%s4292_s9] sm:$0xf] }
 0x165   : > { %v954_v4 = vsub.f32 %v938_v3, %v946_v49  ;;  %v955_v5 = vsub.f32 %v939_v0, %v947_v29  ;;  %v1022_v3 = vpack.c.bf16 %v3096_v9, %v3092_v8 }
 0x166   : > { %v2600_v31 = vld [vmem:[#allocation2 + $0x10] sm:$0xf] }
 0x167   : > { %v1047_v17 = vpack.c.bf16 %v955_v5, %v954_v4  ;;  %v707_v62 = vpop.permute.xlu0 %706  ;;  %v699_v22 = vpop.permute.xlu1 %698  ;;  %1026 = vst [vmem:[#allocation2] sm:$0xff] %v1022_v3  ;;  %v2769_v3 = vld [vmem:[#allocation2 + $0x4] sm:$0xf0] }
 0x168   : > { %v3618_v30 = vpop.permute.xlu2 %702  ;;  %v2640_v26 = vld [vmem:[#allocation2 + $0x60] sm:$0xf]  ;;  %v2780_v37 = vld [vmem:[#allocation2 + $0x64] sm:$0xf]  ;;  %v712_v51 = vsel %vm708_vm3, %v699_v22, %v707_v62  ;;  %v716_v49 = vsel %vm708_vm3, %v707_v62, %v699_v22 }
 0x169   : > { %1051 = vst [vmem:[#allocation2 + $0x68] sm:$0xff] %v1047_v17  ;;  %v728_v13 = vmul.f32 %v3416_v41, %v712_v51  ;;  %v729_v16 = vmul.f32 %v3418_v42, %v716_v49  ;;  %v2770_v51 = vld [vmem:[#allocation2 + $0x14] sm:$0xf] }
 0x16f   : > { %v743_v56 = vpop.permute.xlu0 %742  ;;  %v735_v58 = vpop.permute.xlu1 %734 }
 0x170   : > { %v749_v35 = vsel %vm746_vm2, %v735_v58, %v743_v56  ;;  %v753_v40 = vsel %vm746_vm2, %v743_v56, %v735_v58  ;;  %v2781_v47 = vld [vmem:[#allocation2 + $0x64] sm:$0xf0]  ;;  %v2642_v33 = vld [vmem:[#allocation2 + $0x68] sm:$0xf0]  ;;  %v739_v29 = vpop.permute.xlu2 %738 }
 0x171   : > { %v764_v52 = vmul.f32 %v3398_v24, %v753_v40  ;;  %v765_v32 = vmul.f32 %v3400_v36, %v749_v35  ;;  %v2641_v50 = vor.u32 %v2781_v47, %v2640_v26  ;;  %v2645_v25 = vor.u32 %v2780_v37, %v2642_v33 }
 0x173   : > { %v772_v63 = vsub.f32 %v726_v38, %v764_v52  ;;  %v773_v21 = vsub.f32 %v727_v10, %v765_v32  ;;  %1311 = vmatpush.bf16.msra.mxu0 %v2641_v50  ;;  %1360 = vmatpush.bf16.msra.mxu1 %v2645_v25 }
 0x175   : > { %v1032_v34 = vpack.c.bf16 %v773_v21, %v772_v63 }
 0x177   : > { %1036 = vst [vmem:[#allocation2 + $0x30] sm:$0xff] %v1032_v34  ;;  %v695_v43 = vpop.permute.xlu0 %694  ;;  %v745_v1 = vpop.permute.xlu1 %744  ;;  %1312 = vmatpush.bf16.msra.mxu0 %v2633_v14  ;;  %1361 = vmatpush.bf16.msra.mxu1 %v2637_v28 }
 0x178   : > { %v750_v2 = vsel %vm746_vm2, %v3594_v48, %v745_v1  ;;  %v754_v6 = vsel %vm746_vm2, %v745_v1, %v3594_v48  ;;  %v3652_v62 = vpop.permute.xlu2 %1179  ;;  %v714_v47 = vsel %vm708_vm3, %v3618_v30, %v695_v43 }
 0x179   : > { %v766_v55 = vmul.f32 %v3398_v24, %v754_v6  ;;  %v767_v23 = vmul.f32 %v3400_v36, %v750_v2  ;;  %v725_v60 = vmul.f32 %v3418_v42, %v714_v47 }
 0x17b   : > { %v774_v0 = vsub.f32 %v728_v13, %v766_v55  ;;  %v775_v4 = vsub.f32 %v729_v16, %v767_v23  ;;  %1313 = vmatpush.bf16.msra.mxu0 %v2625_v7  ;;  %1362 = vmatpush.bf16.msra.mxu1 %v2629_v44 }
 0x17d   : > { %v1033_v48 = vpack.c.bf16 %v775_v4, %v774_v0  ;;  %v1475_v0 = vld [vmem:[%s4288_s5 + $0x18] sm:$0xff]  ;;  %v2592_v4 = vld [vmem:[#allocation2] sm:$0xf] }
 0x17e   : > { %v2616_v40 = vld [vmem:[#allocation2 + $0x30] sm:$0xf]  ;;  %v2774_v33 = vld [vmem:[#allocation2 + $0x34] sm:$0xf]  ;;  %1505 = vperm.xlu0 %2859, %v1475_v0  }
 0x17f   : > { %1037 = vst [vmem:[#allocation2 + $0x38] sm:$0xff] %v1033_v48  ;;  %v701_v5 = vpop.permute.xlu1 %700  ;;  %v731_v17 = vpop.permute.xlu0 %730  ;;  %v2768_v48 = vld [vmem:[#allocation2 + $0x4] sm:$0xf] }
 0x180   : > { %v709_v22 = vsel %vm708_vm3, %v3616_v59, %v701_v5  ;;  %v713_v11 = vsel %vm708_vm3, %v701_v5, %v3616_v59  ;;  %v747_v8 = vsel %vm746_vm2, %v731_v17, %v739_v29  ;;  %v751_v9 = vsel %vm746_vm2, %v739_v29, %v731_v17  ;;  %v3682_v39 = vpop.permute.xlu2 %1154  ;;  %v2771_v29 = vld [vmem:[#allocation2 + $0x14] sm:$0xf0]  ;;  %v2594_v5 = vld [vmem:[#allocation2 + $0x8] sm:$0xf0] }
 0x181   : > { %v722_v12 = vmul.f32 %v3416_v41, %v709_v22  ;;  %v723_v56 = vmul.f32 %v3418_v42, %v713_v11  ;;  %v760_v58 = vmul.f32 %v3398_v24, %v751_v9  ;;  %v761_v26 = vmul.f32 %v3400_v36, %v747_v8 }
 0x182   : > { %v710_v59 = vsel %vm708_vm3, %v695_v43, %v3618_v30  ;;  %v2602_v43 = vld [vmem:[#allocation2 + $0x18] sm:$0xf0]  ;;  %v2601_v55 = vor.u32 %v2771_v29, %v2600_v31  ;;  %v2593_v17 = vor.u32 %v2769_v3, %v2592_v4  ;;  %v2597_v22 = vor.u32 %v2768_v48, %v2594_v5  ;;  %v1746_v3 = vld [vmem:[%s4291_s8] sm:$0xf] }
 0x183   : > { %v768_v38 = vsub.f32 %v722_v12, %v760_v58  ;;  %v769_v10 = vsub.f32 %v723_v56, %v761_v26  ;;  %v724_v54 = vmul.f32 %v3416_v41, %v710_v59  ;;  %v2605_v23 = vor.u32 %v2770_v51, %v2602_v43  ;;  %v2760_v12 = vld [vmem:[%s4285_s2] sm:$0xff]  ;;  %v2913_v58 = vld [vmem:[%s3061_s30 + $0x8] sm:$0xff]  ;;  %v1478_v51 = vld [vmem:[%s4288_s5 + $0x30] sm:$0xff] }
 0x184   : > { %v2912_v56 = vld [vmem:[%s3061_s30] sm:$0xff]  ;;  %vm997_vm5 = vcmp.gt.f32.partialorder %v2913_v58, 0.1  ;;  %v2935_v26 = vmov 0.0   ;;  %v1477_v59 = vld [vmem:[%s4288_s5 + $0x28] sm:$0xff] }
 0x185   : > { %v1030_v35 = vpack.c.bf16 %v769_v10, %v768_v38  ;;  %vm996_vm4 = vcmp.gt.f32.partialorder %v2912_v56, 0.1  ;;  %v2557_v10 = vsel %vm997_vm5, 1.0, %v2935_v26  ;;  %v1484_v5 = vld [vmem:[%s4288_s5 + $0x60] sm:$0xff]  ;;  %v4304_v56 = vmov 3   ;;  %v1906_v58 = vld [vmem:[%s4290_s7 + $0x8] sm:$0xff] }
 0x186   : > { %v2775_v37 = vld [vmem:[#allocation2 + $0x34] sm:$0xf0]  ;;  %v2618_v52 = vld [vmem:[#allocation2 + $0x38] sm:$0xf0]  ;;  %v2556_v38 = vsel %vm996_vm4, 1.0, %v2935_v26  ;;  %1515 = vperm.xlu0 %2859, %v1477_v59  }
 0x187   : > { %1034 = vst [vmem:[#allocation2 + $0x20] sm:$0xff] %v1030_v35  ;;  %v733_v32 = vpop.permute.xlu1 %732  ;;  %v741_v50 = vpop.permute.xlu0 %740  ;;  %v2617_v25 = vor.u32 %v2775_v37, %v2616_v40  ;;  %v2621_v53 = vor.u32 %v2774_v33, %v2618_v52  ;;  %v1004_v35 = vrot.slane %v2556_v38, 3  ;;  %v1005_v40 = vrot.slane %v2557_v10, 3  ;;  %v1472_v33 = vld [vmem:[%s4288_s5] sm:$0xff]  ;;  %v2765_v38 = vld [vmem:[%s4285_s2 + $0x28] sm:$0xff]  ;;  %v1907_v10 = vld [vmem:[%s4290_s7 + $0x10] sm:$0xff] }
 0x188   : > { %v748_v63 = vsel %vm746_vm2, %v733_v32, %v741_v50  ;;  %v752_v21 = vsel %vm746_vm2, %v741_v50, %v733_v32  ;;  %v3691_v61 = vpop.permute.xlu2 %1144  ;;  %1490 = vperm.xlu2 %2858, %v1472_v33   ;;  %v1483_v59 = vld [vmem:[%s4288_s5 + $0x58] sm:$0xff] }
 0x189   : > { %v762_v30 = vmul.f32 %v3398_v24, %v752_v21  ;;  %v763_v20 = vmul.f32 %v3400_v36, %v748_v63  ;;  %1314 = vmatpush.bf16.msra.mxu0 %v2617_v25  ;;  %1363 = vmatpush.bf16.msra.mxu1 %v2621_v53  ;;  %v1009_v52 = vsel %vm1008_vm6, %v1004_v35, 0.0  ;;  %v1010_v32 = vsel %vm1008_vm6, %v1005_v40, 0.0  ;;  %v1479_v53 = vld [vmem:[%s4288_s5 + $0x38] sm:$0xff]  ;;  %v2761_v21 = vld [vmem:[%s4285_s2 + $0x8] sm:$0xff]  ;;  %v1486_v35 = vld [vmem:[%s4288_s5 + $0x70] sm:$0xff] }
 0x18a   : > { %v1011_v25 = vadd.f32 %v1010_v32, %v1009_v52  ;;  %v2766_v40 = vld [vmem:[%s4285_s2 + $0x30] sm:$0xff]  ;;  %v1905_v52 = vld [vmem:[%s4290_s7] sm:$0xff] }
 0x18b   : > { %v770_v27 = vsub.f32 %v724_v54, %v762_v30  ;;  %v771_v46 = vsub.f32 %v725_v60, %v763_v20  ;;  %v1474_v54 = vld [vmem:[%s4288_s5 + $0x10] sm:$0xff]  ;;  %v1481_v20 = vld [vmem:[%s4288_s5 + $0x48] sm:$0xff] }
 0x18c   : > { %1012 = vadd.xlane.f32.xlu1 %v1011_v25 }
 0x18d   : > { %v1031_v34 = vpack.c.bf16 %v771_v46, %v770_v27  ;;  %v1476_v27 = vld [vmem:[%s4288_s5 + $0x20] sm:$0xff] }
 0x18e   : > { %v2608_v49 = vld [vmem:[#allocation2 + $0x20] sm:$0xf]  ;;  %v2772_v2 = vld [vmem:[#allocation2 + $0x24] sm:$0xf]  ;;  %1525 = vperm.xlu0 %2859, %v1479_v53  }
 0x18f   : > { %1035 = vst [vmem:[#allocation2 + $0x28] sm:$0xff] %v1031_v34  ;;  %v3684_v14 = vpop.permute.xlu1 %1174  ;;  %v3686_v28 = vpop.permute.xlu0 %1164 }
 0x190   : > { %v3700_v11 = vpop.permute.xlu2 %1139  ;;  %1500 = vperm.xlu2 %2858, %v1474_v54   ;;  %v2767_v54 = vld [vmem:[%s4285_s2 + $0x38] sm:$0xff] }
 0x196   : > { %v2773_v1 = vld [vmem:[#allocation2 + $0x24] sm:$0xf0]  ;;  %v2610_v6 = vld [vmem:[#allocation2 + $0x28] sm:$0xf0]  ;;  %1535 = vperm.xlu0 %2859, %v1481_v20  }
 0x197   : > { %v3693_v7 = vpop.permute.xlu1 %1169  ;;  %v3695_v44 = vpop.permute.xlu0 %1149  ;;  %v2609_v13 = vor.u32 %v2773_v1, %v2608_v49  ;;  %v2613_v16 = vor.u32 %v2772_v2, %v2610_v6  ;;  %v2762_v6 = vld [vmem:[%s4285_s2 + $0x10] sm:$0xff] }
 0x198   : > { %v3721_v50 = vpop.permute.xlu2 %1114  ;;  %1510 = vperm.xlu2 %2858, %v1476_v27  }
 0x199   : > { %1315 = vmatpush.bf16.msra.mxu0 %v2609_v13  ;;  %1364 = vmatpush.bf16.msra.mxu1 %v2613_v16 }
 0x19d   : > { %1316 = vmatpush.bf16.msra.mxu0 %v2601_v55  ;;  %1365 = vmatpush.bf16.msra.mxu1 %v2605_v23 }
 0x19e   : > { %1759 = vperm.xlu0 %2859, %v1747_v45  }
 0x19f   : > { %v3702_v8 = vpop.permute.xlu1 %1159  ;;  %v3704_v9 = vpop.permute.xlu0 %1124 }
 0x1a0   : > { %v3734_v30 = vpop.permute.xlu2 %1109  ;;  %1520 = vperm.xlu2 %2858, %v1478_v51  }
 0x1a1   : > { %1317 = vmatpush.bf16.msra.mxu0 %v2593_v17  ;;  %1366 = vmatpush.bf16.msra.mxu1 %v2597_v22  ;;  %v4306_v17 = vmov 1   ;;  %v1487_v22 = vld [vmem:[%s4288_s5 + $0x78] sm:$0xff] }
 0x1a4   : > { %1318 = vmatmul.bf16.vlgmr.msra.gmra.mxu0 %v2760_v12  ;;  %1367 = vmatmul.bf16.vlgmr.msra.gmra.mxu1 %v2760_v12  ;;  %v2764_v12 = vld [vmem:[%s4285_s2 + $0x20] sm:$0xff] }
 0x1a5   : > { %1750 = vperm.xlu1 %2857, %v1746_v3  }
 0x1a7   : > { %v3714_v47 = vpop.permute.xlu1 %1134  ;;  %v3716_v37 = vpop.permute.xlu0 %1119 }
 0x1a8   : > { %v979_v31 = vpop.permute.xlu2 %978 }
 0x1ad   : > { %1550 = vperm.xlu1 %2857, %v1484_v5  }
 0x1af   : > { %v3729_v63 = vpop.permute.xlu1 %1129  ;;  %v971_v60 = vpop.permute.xlu0 %970 }
 0x1b4   : > { %1323 = vmatmul.bf16.gmra.mxu0 %v2761_v21  ;;  %1372 = vmatmul.bf16.gmra.mxu1 %v2761_v21 }
 0x1b5   : > { %1565 = vperm.xlu1 %2857, %v1487_v22  }
 0x1b7   : > { %v3742_v46 = vpop.permute.xlu1 %1104  ;;  %v981_v34 = vpop.permute.xlu0 %980 }
 0x1b8   : > { %v982_v49 = vsel %vm708_vm3, %v979_v31, %v981_v34  ;;  %v983_v29 = vsel %vm708_vm3, %v981_v34, %v979_v31 }
 0x1b9   : > { %v984_v13 = vmul.f32 %v982_v49, %v3416_v41  ;;  %v985_v16 = vmul.f32 %v983_v29, %v3418_v42  ;;  %v1480_v41 = vld [vmem:[%s4288_s5 + $0x40] sm:$0xff] }
 0x1ba   : > { %1530 = vperm.xlu2 %2858, %v1480_v41   ;;  %v3868_v41 = vld [vmem:[%s3061_s30 + $0x30] sm:$0xff] }
 0x1bb   : > { %2485 = vst [vmem:[%s4113_s19 + $0x30] sm:$0xff] %v3868_v41 }
 0x1bd   : > { %1915 = vperm.xlu1 %2857, %v1906_v58  }
 0x1bf   : > { %v973_v43 = vpop.permute.xlu1 %972 }
 0x1c0   : > { %v974_v1 = vsel %vm746_vm2, %v971_v60, %v973_v43  ;;  %v975_v2 = vsel %vm746_vm2, %v973_v43, %v971_v60 }
 0x1c1   : > { %v976_v55 = vmul.f32 %v975_v2, %v3398_v24  ;;  %v977_v23 = vmul.f32 %v974_v1, %v3400_v36  ;;  %v4305_v24 = vmov 2  }
 0x1c2   : > { %2861 = vset.pattern.permute.xlu0 %v4305_v24 }
 0x1c3   : > { %v986_v0 = vmax.f32 %v976_v55, %v984_v13  ;;  %v987_v15 = vmax.f32 %v977_v23, %v985_v16  ;;  %1775 = vperm.xlu0 %2861, %v1746_v3  }
 0x1c4   : > { %1328 = vmatmul.bf16.gmra.mxu0 %v2762_v6  ;;  %1377 = vmatmul.bf16.gmra.mxu1 %v2762_v6 }
 0x1c5   : > { %v988_v4 = vmax.f32 %v986_v0, %v3523_v57  ;;  %v989_v48 = vmax.f32 %v987_v15, %v3544_v18  ;;  %v1482_v57 = vld [vmem:[%s4288_s5 + $0x50] sm:$0xff]  ;;  %v2763_v18 = vld [vmem:[%s4285_s2 + $0x18] sm:$0xff]  ;;  %2866 = vset.pattern.permute.xlu1 %v4306_v17 }
 0x1c6   : > { %1540 = vperm.xlu2 %2858, %v1482_v57   ;;  %1934 = vperm.xlu1 %2866, %v1906_v58   ;;  %v1768_v57 = vperm.slane %v3868_v41, 1 }
 0x1c7   : > { %vm990_vm7 = vcmp.gt.f32.partialorder %v988_v4, 0.1  ;;  %vm991_vm8 = vcmp.gt.f32.partialorder %v989_v48, 0.1 }
 0x1c8   : > { %v3774_v36 = vsel %vm990_vm7, 1.0, %v2935_v26  ;;  %v3776_v42 = vsel %vm991_vm8, 1.0, %v2935_v26  ;;  %v1485_v26 = vld [vmem:[%s4288_s5 + $0x68] sm:$0xff] }
 0x1c9   : > { %4324 = vst [vmem:[#allocation4_spill] sm:$0xff] %v3774_v36 }
 0x1ca   : > { %4325 = vst [vmem:[#allocation5_spill] sm:$0xff] %v3776_v42 }
 0x1cb   : > { %2864 = vset.pattern.permute.xlu0 %v4302_v19 }
 0x1cc   : > { %1555 = vperm.xlu0 %2864, %v1485_v26   ;;  %v1753_v26 = vperm.slane %v3868_v41, 0 }
 0x1ce   : > { %2860 = vset.pattern.permute.xlu2 %v4306_v17  ;;  %2869 = vset.pattern.permute.xlu1 %v4305_v24 }
 0x1cf   : > { %1765 = vperm.xlu2 %2860, %v1746_v3   ;;  %1958 = vperm.xlu1 %2869, %v1906_v58  }
 0x1d4   : > { %1333 = vmatmul.bf16.gmra.mxu0 %v2763_v18  ;;  %1382 = vmatmul.bf16.gmra.mxu1 %v2763_v18  ;;  %v3872_v18 = vld [vmem:[%s3061_s30 + $0x38] sm:$0xff] }
 0x1d5   : > { %2867 = vset.pattern.permute.xlu0 %v4306_v17  ;;  %v3828_v32 = vpop.permute.xlu0 %1495  ;;  %v1769_v5 = vperm.slane %v3872_v18, 1  ;;  %2486 = vst [vmem:[%s4113_s19 + $0x38] sm:$0xff] %v3872_v18 }
 0x1d6   : > { %1938 = vperm.xlu0 %2867, %v1907_v10  }
 0x1d7   : > { %2862 = vset.pattern.permute.xlu2 %v4304_v56  ;;  %2870 = vset.pattern.permute.xlu1 %v4304_v56 }
 0x1d8   : > { %1785 = vperm.xlu2 %2862, %v1746_v3   ;;  %1978 = vperm.xlu1 %2870, %v1905_v52  }
 0x1de   : > { %2871 = vset.pattern.permute.xlu0 %v4304_v56 }
 0x1df   : > { %1982 = vperm.xlu0 %2871, %v1906_v58  }
 0x1e0   : > { %2863 = vset.pattern.permute.xlu2 %v4302_v19  ;;  %2874 = vset.pattern.permute.xlu1 %v4302_v19 }
 0x1e1   : > { %1545 = vperm.xlu2 %2863, %v1483_v59   ;;  %v1778_v59 = vperm.slane %v3868_v41, 2 }
 0x1e2   : > { %v3823_v33 = vpop.permute.xlu2 %1490 }
 0x1e4   : > { %1338 = vmatmul.bf16.gmra.mxu0 %v2764_v12  ;;  %1387 = vmatmul.bf16.gmra.mxu1 %v2764_v12 }
 0x1e7   : > { %2872 = vset.pattern.permute.xlu0 %v4302_v19 }
 0x1e8   : > { %1920 = vperm.xlu0 %2872, %v1907_v10  }
 0x1e9   : > { %1560 = vperm.xlu2 %2863, %v1486_v35   ;;  %v1779_v35 = vperm.slane %v3872_v18, 2 }
 0x1ea   : > { %v3831_v25 = vpop.permute.xlu2 %1500 }
 0x1f0   : > { %v3835_v53 = vpop.permute.xlu0 %1505 }
 0x1f1   : > { %1910 = vperm.xlu2 %2863, %v1905_v52  }
 0x1f2   : > { %v3840_v21 = vpop.permute.xlu2 %1510 }
 0x1f4   : > { %1343 = vmatmul.bf16.gmra.mxu0 %v2765_v38  ;;  %1392 = vmatmul.bf16.gmra.mxu1 %v2765_v38  ;;  %v1754_v38 = vperm.slane %v3872_v18, 0 }
 0x1f8   : > { %v3843_v60 = vpop.permute.xlu0 %1515 }
 0x1f9   : > { %2865 = vset.pattern.permute.xlu2 %v4306_v17 }
 0x1fa   : > { %1930 = vperm.xlu2 %2865, %v1905_v52   ;;  %v3845_v20 = vpop.permute.xlu2 %1520 }
 0x1ff   : > { %v3860_v0 = vpop.xlane.xlu1 %1012 }
 0x200   : > { %v3847_v45 = vpop.permute.xlu0 %1525 }
 0x201   : > { %4326 = vst [vmem:[#allocation6_spill] sm:$0xff] %v3847_v45 }
 0x202   : > { %2868 = vset.pattern.permute.xlu2 %v4305_v24 }
 0x203   : > { %1954 = vperm.xlu2 %2868, %v1905_v52  }
 0x204   : > { %1348 = vmatmul.bf16.gmra.mxu0 %v2766_v40  ;;  %1397 = vmatmul.bf16.gmra.mxu1 %v2766_v40 }
 0x208   : > { %v3856_v6 = vpop.permute.xlu0 %1535 }
 0x209   : > { %4328 = vst [vmem:[#allocation8_spill] sm:$0xff] %v3856_v6 }
 0x20b   : > { %1962 = vperm.xlu2 %2868, %v1907_v10  }
 0x213   : > { %2873 = vset.pattern.permute.xlu2 %v4304_v56 }
 0x214   : > { %1353 = vmatmul.bf16.gmra.mxu0 %v2767_v54  ;;  %1402 = vmatmul.bf16.gmra.mxu1 %v2767_v54  ;;  %v3849_v31 = vpop.permute.xlu2 %1530 }
 0x215   : > { %4327 = vst [vmem:[#allocation7_spill] sm:$0xff] %v3849_v31  ;;  %1986 = vperm.xlu2 %2873, %v1907_v10  }
 0x217   : > { %v1751_v10 = vpop.permute.xlu1 %1750 }
 0x218   : > { %v1755_v54 = vmul.f32 %v1753_v26, %v1751_v10 }
 0x21d   : > { %2875 = vset.pattern.permute.xlu2 %v4302_v19 }
 0x220   : > { %v3858_v3 = vpop.permute.xlu2 %1540 }
 0x221   : > { %v1319_v27 = vpop.f32.mrf.mxu0  ;;  %v1368_v34 = vpop.f32.mrf.mxu1  ;;  %4329 = vst [vmem:[#allocation9_spill] sm:$0xff] %v3858_v3 }
 0x222   : > { %v1320_v51 = vadd.f32 %v1319_v27, %v3742_v46  ;;  %v1369_v49 = vadd.f32 %v1368_v34, %v3742_v46  ;;  %v1756_v27 = vmul.f32 %v1754_v38, %v1751_v10 }
 0x224   : > { %v1408_v13 = vmax.f32 %v1320_v51, 0.0  ;;  %v1409_v16 = vmax.f32 %v1369_v49, 0.0 }
 0x229   : > { %v1321_v29 = vpop.f32.mrf.mxu0  ;;  %v1370_v43 = vpop.f32.mrf.mxu1 }
 0x22a   : > { %v1322_v1 = vadd.f32 %v1321_v29, %v3734_v30  ;;  %v1371_v2 = vadd.f32 %v1370_v43, %v3734_v30  ;;  %v1760_v30 = vpop.permute.xlu0 %1759  ;;  %v1766_v22 = vpop.permute.xlu2 %1765 }
 0x22b   : > { %v1770_v40 = vmul.f32 %v1768_v57, %v1766_v22  ;;  %v1771_v52 = vmul.f32 %v1769_v5, %v1766_v22 }
 0x22c   : > { %v1410_v55 = vmax.f32 %v1322_v1, 0.0  ;;  %v1411_v23 = vmax.f32 %v1371_v2, 0.0  ;;  %v1762_v1 = vadd.f32 %v1760_v30, %v1755_v54  ;;  %v1763_v2 = vadd.f32 %v1760_v30, %v1756_v27 }
 0x22e   : > { %v3862_v46 = vpack.c.bf16 %v1410_v55, %v1408_v13  ;;  %v3864_v15 = vpack.c.bf16 %v1411_v23, %v1409_v16  ;;  %v1788_v23 = vperm.slane %v3868_v41, 3  ;;  %v1772_v5 = vadd.f32 %v1770_v40, %v1762_v1 }
 0x22f   : > { %v1773_v22 = vadd.f32 %v1771_v52, %v1763_v2 }
 0x231   : > { %v1324_v4 = vpop.f32.mrf.mxu0  ;;  %v1373_v48 = vpop.f32.mrf.mxu1 }
 0x232   : > { %v1325_v12 = vadd.f32 %v1324_v4, %v3721_v50  ;;  %v1374_v58 = vadd.f32 %v1373_v48, %v3721_v50  ;;  %v1789_v4 = vperm.slane %v3872_v18, 3 }
 0x234   : > { %v1412_v34 = vmax.f32 %v1325_v12, 0.0  ;;  %v1413_v51 = vmax.f32 %v1374_v58, 0.0  ;;  %v1786_v12 = vpop.permute.xlu2 %1785 }
 0x235   : > { %v1776_v13 = vpop.permute.xlu0 %1775  ;;  %v1790_v58 = vmul.f32 %v1788_v23, %v1786_v12  ;;  %v1791_v26 = vmul.f32 %v1789_v4, %v1786_v12 }
 0x236   : > { %v1780_v16 = vmul.f32 %v1778_v59, %v1776_v13  ;;  %v1781_v55 = vmul.f32 %v1779_v35, %v1776_v13 }
 0x238   : > { %v1782_v38 = vadd.f32 %v1780_v16, %v1772_v5  ;;  %v1783_v10 = vadd.f32 %v1781_v55, %v1773_v22 }
 0x239   : > { %v1326_v49 = vpop.f32.mrf.mxu0  ;;  %v1375_v29 = vpop.f32.mrf.mxu1 }
 0x23a   : > { %v1327_v43 = vadd.f32 %v1326_v49, %v3716_v37  ;;  %v1376_v50 = vadd.f32 %v1375_v29, %v3716_v37  ;;  %v1792_v30 = vadd.f32 %v1790_v58, %v1782_v38  ;;  %v1793_v59 = vadd.f32 %v1791_v26, %v1783_v10 }
 0x23c   : > { %v1414_v48 = vmax.f32 %v1327_v43, 0.0  ;;  %v1415_v57 = vmax.f32 %v1376_v50, 0.0  ;;  %v1795_v27 = vsel %vm1794_vm9, %v1792_v30, -inf  ;;  %v1802_v29 = vsel %vm1794_vm9, %v1793_v59, -inf }
 0x23d   : > { %v1796_v40 = vrot.slane %v1795_v27, 4  ;;  %v1803_v52 = vrot.slane %v1802_v29, 4 }
 0x23e   : > { %v3885_v49 = vpack.c.bf16 %v1414_v48, %v1412_v34  ;;  %v3887_v37 = vpack.c.bf16 %v1415_v57, %v1413_v51 }
 0x23f   : > { %v1797_v43 = vmax.f32 %v1795_v27, %v1796_v40  ;;  %v1804_v50 = vmax.f32 %v1802_v29, %v1803_v52 }
 0x241   : > { %v1329_v35 = vpop.f32.mrf.mxu0  ;;  %v1378_v54 = vpop.f32.mrf.mxu1  ;;  %v1798_v1 = vrot.slane %v1797_v43, 2  ;;  %v1805_v2 = vrot.slane %v1804_v50, 2 }
 0x242   : > { %v1330_v34 = vadd.f32 %v1329_v35, %v3704_v9  ;;  %v1379_v51 = vadd.f32 %v1378_v54, %v3704_v9 }
 0x243   : > { %v1799_v55 = vmax.f32 %v1797_v43, %v1798_v1  ;;  %v1806_v23 = vmax.f32 %v1804_v50, %v1805_v2  ;;  %v3899_v50 = vpop.permute.xlu1 %1550 }
 0x244   : > { %v1416_v22 = vmax.f32 %v1330_v34, 0.0  ;;  %v1417_v12 = vmax.f32 %v1379_v51, 0.0  ;;  %4330 = vst [vmem:[#allocation10_spill] sm:$0xff] %v3899_v50 }
 0x245   : > { %v1800_v57 = vrot.slane %v1799_v55, 1  ;;  %v1807_v5 = vrot.slane %v1806_v23, 1 }
 0x247   : > { %v1801_v38 = vmax.f32 %v1799_v55, %v1800_v57  ;;  %v1808_v10 = vmax.f32 %v1806_v23, %v1807_v5 }
 0x249   : > { %v1331_v13 = vpop.f32.mrf.mxu0  ;;  %v1380_v16 = vpop.f32.mrf.mxu1  ;;  %v1809_v9 = vsub.f32 %v1792_v30, %v1801_v38  ;;  %v1810_v54 = vsub.f32 %v1793_v59, %v1808_v10 }
 0x24a   : > { %v1332_v4 = vadd.f32 %v1331_v13, %v3729_v63  ;;  %v1381_v48 = vadd.f32 %v1380_v16, %v3729_v63  ;;  %v3901_v63 = vpop.permute.xlu2 %1545  ;;  %v3913_v10 = vpop.permute.xlu0 %1555 }
 0x24b   : > { %v1811_v52 = vmul.f32 1.442695, %v1809_v9  ;;  %v1813_v43 = vmul.f32 1.442695, %v1810_v54  ;;  %4331 = vst [vmem:[#allocation11_spill] sm:$0xff] %v3901_v63  ;;  %v3908_v23 = vpop.permute.xlu1 %1565 }
 0x24c   : > { %v1418_v58 = vmax.f32 %v1332_v4, 0.0  ;;  %v1419_v26 = vmax.f32 %v1381_v48, 0.0  ;;  %4332 = vst [vmem:[#allocation12_spill] sm:$0xff] %v3908_v23 }
 0x24d   : > { %2894 = vpow2.f32 %v1811_v52  ;;  %4334 = vst [vmem:[#allocation14_spill] sm:$0xff] %v3913_v10 }
 0x24e   : > { %v3895_v27 = vpack.c.bf16 %v1418_v58, %v1416_v22  ;;  %v3897_v35 = vpack.c.bf16 %v1419_v26, %v1417_v12  ;;  %2896 = vpow2.f32 %v1813_v43 }
 0x251   : > { %v1334_v29 = vpop.f32.mrf.mxu0  ;;  %v1383_v40 = vpop.f32.mrf.mxu1 }
 0x252   : > { %v1335_v1 = vadd.f32 %v1334_v29, %v3714_v47  ;;  %v1384_v2 = vadd.f32 %v1383_v40, %v3714_v47  ;;  %v3911_v58 = vpop.permute.xlu2 %1560 }
 0x253   : > { %v2895_v34 = vpop.eup %2894  ;;  %4333 = vst [vmem:[#allocation13_spill] sm:$0xff] %v3911_v58 }
 0x254   : > { %v2897_v16 = vpop.eup %2896  ;;  %v1815_v55 = vsel %vm1794_vm9, %v2895_v34, 0.0  ;;  %v1420_v4 = vmax.f32 %v1335_v1, 0.0  ;;  %v1421_v5 = vmax.f32 %v1384_v2, 0.0  ;;  %v1916_v2 = vpop.permute.xlu1 %1915 }
 0x255   : > { %v1816_v48 = vrot.slane %v1815_v55, 4  ;;  %v1822_v57 = vsel %vm1794_vm9, %v2897_v16, 0.0 }
 0x256   : > { %v1823_v47 = vrot.slane %v1822_v57, 4 }
 0x257   : > { %v1817_v26 = vadd.f32 %v1816_v48, %v1815_v55 }
 0x258   : > { %v1824_v38 = vadd.f32 %v1823_v47, %v1822_v57 }
 0x259   : > { %v1336_v51 = vpop.f32.mrf.mxu0  ;;  %v1385_v13 = vpop.f32.mrf.mxu1  ;;  %v1818_v54 = vrot.slane %v1817_v26, 2 }
 0x25a   : > { %v1337_v30 = vadd.f32 %v1336_v51, %v3700_v11  ;;  %v1386_v59 = vadd.f32 %v1385_v13, %v3700_v11  ;;  %v1825_v29 = vrot.slane %v1824_v38, 2 }
 0x25b   : > { %v1819_v40 = vadd.f32 %v1818_v54, %v1817_v26 }
 0x25c   : > { %v1422_v22 = vmax.f32 %v1337_v30, 0.0  ;;  %v1423_v12 = vmax.f32 %v1386_v59, 0.0  ;;  %v1826_v1 = vadd.f32 %v1825_v29, %v1824_v38  ;;  %v1911_v30 = vpop.permute.xlu2 %1910 }
 0x25d   : > { %v1820_v51 = vrot.slane %v1819_v40, 1 }
 0x25e   : > { %v3915_v9 = vpack.c.bf16 %v1422_v22, %v1420_v4  ;;  %v3917_v11 = vpack.c.bf16 %v1423_v12, %v1421_v5  ;;  %v1827_v13 = vrot.slane %v1826_v1, 1  ;;  %v1939_v4 = vpop.permute.xlu0 %1938  ;;  %v1935_v5 = vpop.permute.xlu1 %1934 }
 0x25f   : > { %v1821_v59 = vadd.f32 %v1820_v51, %v1819_v40 }
 0x260   : > { %v1828_v55 = vadd.f32 %v1827_v13, %v1826_v1 }
 0x261   : > { %v3919_v52 = vpop.f32.mrf.mxu0  ;;  %v3921_v43 = vpop.f32.mrf.mxu1  ;;  %2898 = vrcp.f32 %v1821_v59 }
 0x262   : > { %2900 = vrcp.f32 %v1828_v55 }
 0x264   : > { %v1931_v22 = vpop.permute.xlu2 %1930 }
 0x266   : > { %v1959_v17 = vpop.permute.xlu1 %1958  ;;  %v1983_v42 = vpop.permute.xlu0 %1982 }
 0x267   : > { %v2899_v12 = vpop.eup %2898 }
 0x268   : > { %v2901_v47 = vpop.eup %2900  ;;  %v1831_v26 = vmul.f32 %v2899_v12, %v2895_v34 }
 0x269   : > { %v3923_v48 = vpop.f32.mrf.mxu0  ;;  %v3925_v57 = vpop.f32.mrf.mxu1  ;;  %v1832_v54 = vmul.f32 %v2901_v47, %v2897_v16 }
 0x26a   : > { %v3927_v38 = vperm.slane %v1831_v26, 0  ;;  %v3929_v29 = vperm.slane %v1831_v26, 1  ;;  %v3935_v1 = vperm.slane %v1831_v26, 2  ;;  %v3937_v51 = vperm.slane %v1831_v26, 3 }
 0x26b   : > { %v3931_v19 = vperm.slane %v1832_v54, 0  ;;  %v3933_v40 = vperm.slane %v1832_v54, 1  ;;  %v3943_v55 = vperm.slane %v1832_v54, 2  ;;  %v3945_v34 = vperm.slane %v1832_v54, 3 }
 0x26c   : > { %4335 = vst [vmem:[#allocation15_spill] sm:$0xff] %v3937_v51  ;;  %v1925_v16 = vmul.f32 %v1916_v2, %v3927_v38  ;;  %v1923_v12 = vmul.f32 %v1911_v30, %v3927_v38  ;;  %v1943_v24 = vmul.f32 %v1935_v5, %v3929_v29  ;;  %v1941_v58 = vmul.f32 %v1931_v22, %v3929_v29  ;;  %v1955_v63 = vpop.permute.xlu2 %1954 }
 0x26d   : > { %4336 = vst [vmem:[#allocation16_spill] sm:$0xff] %v3945_v34  ;;  %v1926_v47 = vmul.f32 %v1916_v2, %v3931_v19  ;;  %v1924_v56 = vmul.f32 %v1911_v30, %v3931_v19  ;;  %v1944_v26 = vmul.f32 %v1935_v5, %v3933_v40  ;;  %v1942_v54 = vmul.f32 %v1931_v22, %v3933_v40 }
 0x26e   : > { %v1949_v36 = vadd.f32 %v1943_v24, %v1925_v16  ;;  %v1967_v10 = vmul.f32 %v1959_v17, %v3935_v1  ;;  %v1968_v50 = vmul.f32 %v1959_v17, %v3943_v55  ;;  %v1991_v2 = vmul.f32 %v1983_v42, %v3937_v51 }
 0x26f   : > { %v1950_v23 = vadd.f32 %v1944_v26, %v1926_v47  ;;  %v1992_v30 = vmul.f32 %v1983_v42, %v3945_v34  ;;  %v1947_v3 = vadd.f32 %v1941_v58, %v1923_v12  ;;  %v1948_v6 = vadd.f32 %v1942_v54, %v1924_v56  ;;  %v1921_v58 = vpop.permute.xlu0 %1920 }
 0x270   : > { %v1965_v5 = vmul.f32 %v1955_v63, %v3935_v1  ;;  %v1966_v24 = vmul.f32 %v1955_v63, %v3943_v55  ;;  %v1973_v16 = vadd.f32 %v1967_v10, %v1949_v36  ;;  %v1945_v56 = vmul.f32 %v1939_v4, %v3929_v29 }
 0x271   : > { %v3939_v13 = vpop.f32.mrf.mxu0  ;;  %v3941_v59 = vpop.f32.mrf.mxu1  ;;  %v1974_v47 = vadd.f32 %v1968_v50, %v1950_v23  ;;  %v1946_v12 = vmul.f32 %v1939_v4, %v3933_v40  ;;  %v1927_v36 = vmul.f32 %v1921_v58, %v3927_v38  ;;  %v1928_v50 = vmul.f32 %v1921_v58, %v3931_v19 }
 0x272   : > { %v3961_v22 = vadd.f32 %v1965_v5, %v1947_v3  ;;  %v3963_v45 = vadd.f32 %v1966_v24, %v1948_v6  ;;  %v3965_v17 = vadd.f32 %v1991_v2, %v1973_v16 }
 0x273   : > { %v3967_v51 = vadd.f32 %v1992_v30, %v1974_v47  ;;  %v1951_v54 = vadd.f32 %v1945_v56, %v1927_v36  ;;  %v1952_v2 = vadd.f32 %v1946_v12, %v1928_v50 }
 0x274   : > { %4337 = vst [vmem:[#allocation17_spill] sm:$0xff] %v3963_v45  ;;  %v1963_v63 = vpop.permute.xlu2 %1962 }
 0x275   : > { %4338 = vst [vmem:[#allocation18_spill] sm:$0xff] %v3965_v17  ;;  %v1969_v6 = vmul.f32 %v1963_v63, %v3935_v1  ;;  %v1970_v10 = vmul.f32 %v1963_v63, %v3943_v55 }
 0x276   : > { %4339 = vst [vmem:[#allocation19_spill] sm:$0xff] %v3967_v51 }
 0x277   : > { %v3975_v30 = vadd.f32 %v1969_v6, %v1951_v54  ;;  %v3977_v5 = vadd.f32 %v1970_v10, %v1952_v2 }
 0x279   : > { %v1346_v26 = vpop.f32.mrf.mxu0  ;;  %v1395_v31 = vpop.f32.mrf.mxu1 }
 0x27a   : > { %v1396_v2 = vadd.f32 %v1395_v31, %v3702_v8 }
 0x281   : > { %v1349_v42 = vpop.f32.mrf.mxu0  ;;  %v1398_v34 = vpop.f32.mrf.mxu1 }
 0x282   : > { %v1350_v12 = vadd.f32 %v1349_v42, %v3686_v28  ;;  %v1399_v36 = vadd.f32 %v1398_v34, %v3686_v28  ;;  %v1342_v34 = vadd.f32 %v3923_v48, %v3695_v44 }
 0x284   : > { %v1433_v28 = vmax.f32 %v1399_v36, 0.0  ;;  %v2223_v36 = vld [vmem:[%s4297_s14] sm:$0xff] }
 0x289   : > { %v1351_v3 = vpop.f32.mrf.mxu0  ;;  %v1400_v23 = vpop.f32.mrf.mxu1 }
 0x28a   : > { %v1352_v17 = vadd.f32 %v1351_v3, %v3693_v7  ;;  %v1401_v45 = vadd.f32 %v1400_v23, %v3693_v7  ;;  %v1345_v23 = vadd.f32 %v3939_v13, %v3682_v39  ;;  %v1340_v13 = vadd.f32 %v3919_v52, %v3691_v61  ;;  %v2784_v52 = vld [vmem:[%s4287_s4] sm:$0xff] }
 0x28c   : > { %v1435_v3 = vmax.f32 %v1401_v45, 0.0  ;;  %v1431_v45 = vmax.f32 %v1396_v2, 0.0  ;;  %v2203_v2 = vld [vmem:[%s4295_s12 + $0x8] sm:$0xff] }
 0x291   : > { %v1354_v24 = vpop.f32.mrf.mxu0  ;;  %v1403_v16 = vpop.f32.mrf.mxu1 }
 0x292   : > { %v1355_v4 = vadd.f32 %v1354_v24, %v3684_v14  ;;  %v1404_v47 = vadd.f32 %v1403_v16, %v3684_v14  ;;  %v1347_v14 = vadd.f32 %v1346_v26, %v3702_v8  ;;  %v1434_v24 = vmax.f32 %v1352_v17, 0.0 }
 0x293   : > { %v1391_v8 = vadd.f32 %v3925_v57, %v3695_v44  ;;  %v1469_v17 = vpack.c.bf16 %v1435_v3, %v1433_v28  ;;  %v4343_v3 = vmov 0  }
 0x294   : > { %v1436_v50 = vmax.f32 %v1355_v4, 0.0  ;;  %v1437_v6 = vmax.f32 %v1404_v47, 0.0  ;;  %v1430_v31 = vmax.f32 %v1347_v14, 0.0  ;;  %v1426_v4 = vmax.f32 %v1342_v34, 0.0 }
 0x295   : > { %v1427_v47 = vmax.f32 %v1391_v8, 0.0  ;;  %v2942_v14 = vmov 6   ;;  %v2789_v8 = vld [vmem:[%s4287_s4 + $0x28] sm:$0xff] }
 0x299   : > { %v1356_v58 = vpop.f32.mrf.mxu0  ;;  %v1405_v51 = vpop.f32.mrf.mxu1 }
 0x29a   : > { %v1357_v63 = vadd.f32 %v1356_v58, %v3652_v62  ;;  %v1406_v56 = vadd.f32 %v1405_v51, %v3652_v62  ;;  %v1394_v62 = vadd.f32 %v3941_v59, %v3682_v39  ;;  %v1432_v51 = vmax.f32 %v1350_v12, 0.0 }
 0x29b   : > { %v1389_v39 = vadd.f32 %v3921_v43, %v3691_v61  ;;  %v1428_v59 = vmax.f32 %v1345_v23, 0.0  ;;  %v2167_v61 = vld [vmem:[%s4293_s10] sm:$0xff]  ;;  %v2184_v43 = vld [vmem:[%s4294_s11 + $0x8] sm:$0xff]  ;;  %v2940_v12 = vmov 5   ;;  %v2945_v23 = vmov 13  }
 0x29c   : > { %v1438_v10 = vmax.f32 %v1357_v63, 0.0  ;;  %v1439_v54 = vmax.f32 %v1406_v56, 0.0  ;;  %v1468_v26 = vpack.c.bf16 %v1434_v24, %v1432_v51  ;;  %v1429_v42 = vmax.f32 %v1394_v62, 0.0  ;;  %2171 = vperm.xlu1 %2874, %v2167_v61   ;;  %2192 = vperm.xlu0 %2872, %v2184_v43  }
 0x29d   : > { %v1466_v48 = vpack.c.bf16 %v1430_v31, %v1428_v59  ;;  %v1424_v63 = vmax.f32 %v1340_v13, 0.0  ;;  %v1425_v44 = vmax.f32 %v1389_v39, 0.0  ;;  %v2943_v24 = vmov 10   ;;  %v2790_v59 = vld [vmem:[%s4287_s4 + $0x30] sm:$0xff] }
 0x29e   : > { %v1470_v16 = vpack.c.bf16 %v1438_v10, %v1436_v50  ;;  %v1471_v7 = vpack.c.bf16 %v1439_v54, %v1437_v6  ;;  %v1467_v58 = vpack.c.bf16 %v1431_v45, %v1429_v42  ;;  %v4341_v50 = vmov 2   ;;  %v2787_v6 = vld [vmem:[%s4287_s4 + $0x18] sm:$0xff] }
 0x29f   : > { %v1464_v57 = vpack.c.bf16 %v1426_v4, %v1424_v63  ;;  %v1465_v56 = vpack.c.bf16 %v1427_v47, %v1425_v44  ;;  %v2941_v10 = vmov 8   ;;  %v4342_v54 = vmov 3   ;;  %v2791_v4 = vld [vmem:[%s4287_s4 + $0x38] sm:$0xff]  ;;  %v2412_v47 = vld [vmem:[#allocation3] sm:$0x1] }
 0x2a0   : > { %1616 = vmatpush.bf16.msra.mxu2 %v1470_v16  ;;  %1665 = vmatpush.bf16.msra.mxu3 %v1471_v7  ;;  %v2788_v16 = vld [vmem:[%s4287_s4 + $0x20] sm:$0xff]  ;;  %v2944_v7 = vmov 11   ;;  %v2946_v62 = vmov 7   ;;  %v1014_v51 = vrot.slane %v3860_v0, 4  ;;  %v2947_v31 = vmov 15  }
 0x2a1   : > { %v2948_v45 = vmov 9   ;;  %v2949_v39 = vmov 12   ;;  %v2950_v42 = vmov 14  }
 0x2a2   : > { %v1015_v28 = vadd.f32 %v1014_v51, %v3860_v0  ;;  %v2392_v0 = vld [vmem:[%s4298_s15] sm:$0xff] }
 0x2a4   : > { %1617 = vmatpush.bf16.msra.mxu2 %v1468_v26  ;;  %1666 = vmatpush.bf16.msra.mxu3 %v1469_v17  ;;  %v1016_v34 = vrot.slane %v1015_v28, 2 }
 0x2a5   : > { %2877 = vset.pattern.permute.xlu0 %v4341_v50 }
 0x2a6   : > { %v1017_v26 = vadd.f32 %v1016_v34, %v1015_v28 }
 0x2a8   : > { %1618 = vmatpush.bf16.msra.mxu2 %v1466_v48  ;;  %1667 = vmatpush.bf16.msra.mxu3 %v1467_v58  ;;  %v1018_v17 = vrot.slane %v1017_v26, 1 }
 0x2aa   : > { %v1019_v13 = vadd.f32 %v1018_v17, %v1017_v26 }
 0x2ac   : > { %1619 = vmatpush.bf16.msra.mxu2 %v1464_v57  ;;  %1668 = vmatpush.bf16.msra.mxu3 %v1465_v56  ;;  %2825 = vpush %v1019_v13 }
 0x2b0   : > { %1620 = vmatpush.bf16.msra.mxu2 %v3915_v9  ;;  %1669 = vmatpush.bf16.msra.mxu3 %v3917_v11  ;;  %v2786_v9 = vld [vmem:[%s4287_s4 + $0x10] sm:$0xff]  ;;  %v2202_v11 = vld [vmem:[%s4295_s12] sm:$0xff] }
 0x2b4   : > { %1621 = vmatpush.bf16.msra.mxu2 %v3895_v27  ;;  %1670 = vmatpush.bf16.msra.mxu3 %v3897_v35  ;;  %v2183_v27 = vld [vmem:[%s4294_s11] sm:$0xff]  ;;  %v2939_v35 = vmov 4  }
 0x2b5   : > { %2187 = vperm.xlu1 %2874, %v2183_v27  }
 0x2b8   : > { %1622 = vmatpush.bf16.msra.mxu2 %v3885_v49  ;;  %1671 = vmatpush.bf16.msra.mxu3 %v3887_v37  ;;  %v4021_v49 = vld [vmem:[%s4296_s13] sm:$0xff]  ;;  %v4340_v37 = vmov 1  }
 0x2b9   : > { %2251 = vperm.xlu0 %2877, %v4021_v49  }
 0x2bc   : > { %1623 = vmatpush.bf16.msra.mxu2 %v3862_v46  ;;  %1672 = vmatpush.bf16.msra.mxu3 %v3864_v15  ;;  %v2785_v46 = vld [vmem:[%s4287_s4 + $0x8] sm:$0xff] }
 0x2bd   : > { %2226 = vperm.xlu1 %2874, %v4021_v49   ;;  %v2168_v15 = vld [vmem:[%s4293_s10 + $0x8] sm:$0xff] }
 0x2be   : > { %2176 = vperm.xlu2 %2875, %v2168_v15  }
 0x2bf   : > { %1624 = vmatmul.bf16.vlgmr.msra.gmra.mxu2 %v2784_v52  ;;  %1673 = vmatmul.bf16.vlgmr.msra.gmra.mxu3 %v2784_v52 }
 0x2c1   : > { %2882 = vset.pattern.permute.xlu0 %v2942_v14 }
 0x2c2   : > { %2291 = vperm.xlu0 %2882, %v4021_v49  }
 0x2c5   : > { %2876 = vset.pattern.permute.xlu1 %v4340_v37 }
 0x2c6   : > { %2241 = vperm.xlu1 %2876, %v4021_v49   ;;  %2206 = vperm.xlu2 %2875, %v2202_v11  }
 0x2ca   : > { %2887 = vset.pattern.permute.xlu0 %v2944_v7 }
 0x2cb   : > { %2341 = vperm.xlu0 %2887, %v4021_v49  }
 0x2ce   : > { %2879 = vset.pattern.permute.xlu1 %v2939_v35  ;;  %2235 = vperm.xlu2 %2875, %v2223_v36  }
 0x2cf   : > { %1629 = vmatmul.bf16.gmra.mxu2 %v2785_v46  ;;  %1678 = vmatmul.bf16.gmra.mxu3 %v2785_v46 }
 0x2d0   : > { %2271 = vperm.xlu1 %2879, %v4021_v49  }
 0x2d3   : > { %2892 = vset.pattern.permute.xlu0 %v4343_v3 }
 0x2d4   : > { %2395 = vperm.xlu0 %2892, %v2392_v0  }
 0x2d6   : > { %2878 = vset.pattern.permute.xlu2 %v4342_v54 }
 0x2d7   : > { %2261 = vperm.xlu2 %2878, %v4021_v49  }
 0x2d8   : > { %2881 = vset.pattern.permute.xlu1 %v2940_v12 }
 0x2d9   : > { %2281 = vperm.xlu1 %2881, %v4021_v49  }
 0x2dd   : > { %s2826_s27 = spop %2825 }
 0x2de   : > { %s1021_s16 = smul.f32 0.00390625, %s2826_s27 }
 0x2df   : > { %1634 = vmatmul.bf16.gmra.mxu2 %v2786_v9  ;;  %1683 = vmatmul.bf16.gmra.mxu3 %v2786_v9 }
 0x2e0   : > { %2880 = vset.pattern.permute.xlu2 %v4343_v3 }
 0x2e1   : > { %2884 = vset.pattern.permute.xlu1 %v2941_v10  ;;  %2211 = vperm.xlu2 %2880, %v2203_v2  }
 0x2e2   : > { %2311 = vperm.xlu1 %2884, %v4021_v49  }
 0x2e9   : > { %2883 = vset.pattern.permute.xlu2 %v2946_v62 }
 0x2ea   : > { %2886 = vset.pattern.permute.xlu1 %v2943_v24  ;;  %2301 = vperm.xlu2 %2883, %v4021_v49  }
 0x2eb   : > { %2331 = vperm.xlu1 %2886, %v4021_v49  }
 0x2ef   : > { %1639 = vmatmul.bf16.gmra.mxu2 %v2787_v6  ;;  %1688 = vmatmul.bf16.gmra.mxu3 %v2787_v6 }
 0x2f2   : > { %2885 = vset.pattern.permute.xlu2 %v2948_v45 }
 0x2f3   : > { %2889 = vset.pattern.permute.xlu1 %v2945_v23  ;;  %2321 = vperm.xlu2 %2885, %v4021_v49  }
 0x2f4   : > { %2361 = vperm.xlu1 %2889, %v4021_v49  }
 0x2fb   : > { %2888 = vset.pattern.permute.xlu2 %v2949_v39 }
 0x2fc   : > { %2891 = vset.pattern.permute.xlu1 %v2947_v31  ;;  %2351 = vperm.xlu2 %2888, %v4021_v49  }
 0x2fd   : > { %2381 = vperm.xlu1 %2891, %v4021_v49  }
 0x2ff   : > { %1644 = vmatmul.bf16.gmra.mxu2 %v2788_v16  ;;  %1693 = vmatmul.bf16.gmra.mxu3 %v2788_v16 }
 0x304   : > { %2890 = vset.pattern.permute.xlu2 %v2950_v42 }
 0x305   : > { %2371 = vperm.xlu2 %2890, %v4021_v49  }
 0x30d   : > { %2893 = vset.pattern.permute.xlu2 %v4343_v3 }
 0x30e   : > { %2415 = vperm.xlu2 %2893, %v2412_v47  }
 0x30f   : > { %1649 = vmatmul.bf16.gmra.mxu2 %v2789_v8  ;;  %1698 = vmatmul.bf16.gmra.mxu3 %v2789_v8 }
 0x31f   : > { %1654 = vmatmul.bf16.gmra.mxu2 %v2790_v59  ;;  %1703 = vmatmul.bf16.gmra.mxu3 %v2790_v59 }
 0x32f   : > { %1659 = vmatmul.bf16.gmra.mxu2 %v2791_v4  ;;  %1708 = vmatmul.bf16.gmra.mxu3 %v2791_v4 }
 0x342   : > { %v1625_v48 = vpop.f32.mrf.mxu2  ;;  %v1674_v58 = vpop.f32.mrf.mxu3 }
 0x343   : > { %v1626_v63 = vadd.f32 %v1625_v48, %v3823_v33  ;;  %v1675_v44 = vadd.f32 %v1674_v58, %v3823_v33 }
 0x345   : > { %v1714_v57 = vmax.f32 %v1626_v63, 0.0  ;;  %v1715_v56 = vmax.f32 %v1675_v44, 0.0 }
 0x347   : > { %v1835_v61 = vmul.f32 %v3927_v38, %v1714_v57  ;;  %v1836_v52 = vmul.f32 %v3931_v19, %v1715_v56 }
 0x349   : > { %v1843_v27 = vpack.c.bf16 %v1836_v52, %v1835_v61 }
 0x34a   : > { %v1627_v49 = vpop.f32.mrf.mxu2  ;;  %v1676_v46 = vpop.f32.mrf.mxu3 }
 0x34b   : > { %1847 = vst [vmem:[#allocation2] sm:$0xff] %v1843_v27  ;;  %v1628_v15 = vadd.f32 %v1627_v49, %v3828_v32  ;;  %v1677_v37 = vadd.f32 %v1676_v46, %v3828_v32  ;;  %v4344_v46 = vld [vmem:[#allocation6_spill] sm:$0xff] }
 0x34d   : > { %v1716_v35 = vmax.f32 %v1628_v15, 0.0  ;;  %v1717_v9 = vmax.f32 %v1677_v37, 0.0 }
 0x34f   : > { %v1837_v11 = vmul.f32 %v3927_v38, %v1716_v35  ;;  %v1838_v33 = vmul.f32 %v3931_v19, %v1717_v9 }
 0x351   : > { %v1844_v43 = vpack.c.bf16 %v1838_v33, %v1837_v11 }
 0x352   : > { %v1630_v12 = vpop.f32.mrf.mxu2  ;;  %v1679_v36 = vpop.f32.mrf.mxu3 }
 0x353   : > { %1848 = vst [vmem:[#allocation2 + $0x8] sm:$0xff] %v1844_v43  ;;  %v1631_v50 = vadd.f32 %v1630_v12, %v3831_v25  ;;  %v1680_v6 = vadd.f32 %v1679_v36, %v3831_v25  ;;  %v4345_v12 = vld [vmem:[#allocation7_spill] sm:$0xff] }
 0x355   : > { %v1718_v10 = vmax.f32 %v1631_v50, 0.0  ;;  %v1719_v54 = vmax.f32 %v1680_v6, 0.0 }
 0x357   : > { %v1839_v14 = vmul.f32 %v3927_v38, %v1718_v10  ;;  %v1840_v32 = vmul.f32 %v3931_v19, %v1719_v54 }
 0x359   : > { %v1845_v2 = vpack.c.bf16 %v1840_v32, %v1839_v14 }
 0x35a   : > { %v1632_v24 = vpop.f32.mrf.mxu2  ;;  %v1681_v3 = vpop.f32.mrf.mxu3 }
 0x35b   : > { %1849 = vst [vmem:[#allocation2 + $0x10] sm:$0xff] %v1845_v2  ;;  %v1633_v16 = vadd.f32 %v1632_v24, %v3835_v53  ;;  %v1682_v7 = vadd.f32 %v1681_v3, %v3835_v53 }
 0x35d   : > { %v1720_v23 = vmax.f32 %v1633_v16, 0.0  ;;  %v1721_v62 = vmax.f32 %v1682_v7, 0.0 }
 0x35f   : > { %v1841_v51 = vmul.f32 %v3927_v38, %v1720_v23  ;;  %v1842_v25 = vmul.f32 %v3931_v19, %v1721_v62 }
 0x361   : > { %v1846_v28 = vpack.c.bf16 %v1842_v25, %v1841_v51 }
 0x362   : > { %v1635_v34 = vpop.f32.mrf.mxu2  ;;  %v1684_v8 = vpop.f32.mrf.mxu3 }
 0x363   : > { %1850 = vst [vmem:[#allocation2 + $0x18] sm:$0xff] %v1846_v28  ;;  %v1636_v31 = vadd.f32 %v1635_v34, %v3840_v21  ;;  %v1685_v45 = vadd.f32 %v1684_v8, %v3840_v21  ;;  %v4347_v34 = vld [vmem:[#allocation9_spill] sm:$0xff] }
 0x365   : > { %v1722_v0 = vmax.f32 %v1636_v31, 0.0  ;;  %v1723_v26 = vmax.f32 %v1685_v45, 0.0 }
 0x367   : > { %v1853_v17 = vmul.f32 %v3929_v29, %v1722_v0  ;;  %v1854_v53 = vmul.f32 %v3933_v40, %v1723_v26 }
 0x369   : > { %v1861_v13 = vpack.c.bf16 %v1854_v53, %v1853_v17 }
 0x36a   : > { %v1637_v39 = vpop.f32.mrf.mxu2  ;;  %v1686_v38 = vpop.f32.mrf.mxu3 }
 0x36b   : > { %1865 = vst [vmem:[#allocation2 + $0x20] sm:$0xff] %v1861_v13  ;;  %v1638_v19 = vadd.f32 %v1637_v39, %v3843_v60  ;;  %v1687_v59 = vadd.f32 %v1686_v38, %v3843_v60  ;;  %v4348_v38 = vld [vmem:[#allocation11_spill] sm:$0xff] }
 0x36d   : > { %v1724_v42 = vmax.f32 %v1638_v19, 0.0  ;;  %v1725_v4 = vmax.f32 %v1687_v59, 0.0 }
 0x36f   : > { %v1855_v21 = vmul.f32 %v3929_v29, %v1724_v42  ;;  %v1856_v47 = vmul.f32 %v3933_v40, %v1725_v4 }
 0x371   : > { %v1862_v48 = vpack.c.bf16 %v1856_v47, %v1855_v21 }
 0x372   : > { %v1640_v60 = vpop.f32.mrf.mxu2  ;;  %v1689_v58 = vpop.f32.mrf.mxu3 }
 0x373   : > { %1866 = vst [vmem:[#allocation2 + $0x28] sm:$0xff] %v1862_v48  ;;  %v1641_v63 = vadd.f32 %v1640_v60, %v3845_v20  ;;  %v1690_v44 = vadd.f32 %v1689_v58, %v3845_v20  ;;  %v2951_v60 = vmov 8.0  }
 0x374   : > { %2902 = vrcp.f32 %v2951_v60 }
 0x375   : > { %v1726_v57 = vmax.f32 %v1641_v63, 0.0  ;;  %v1727_v56 = vmax.f32 %v1690_v44, 0.0  ;;  %v4349_v44 = vld [vmem:[#allocation10_spill] sm:$0xff] }
 0x377   : > { %v1857_v61 = vmul.f32 %v3929_v29, %v1726_v57  ;;  %v1858_v41 = vmul.f32 %v3933_v40, %v1727_v56 }
 0x379   : > { %v1863_v52 = vpack.c.bf16 %v1858_v41, %v1857_v61 }
 0x37a   : > { %v1642_v27 = vpop.f32.mrf.mxu2  ;;  %v1691_v49 = vpop.f32.mrf.mxu3 }
 0x37b   : > { %1867 = vst [vmem:[#allocation2 + $0x30] sm:$0xff] %v1863_v52  ;;  %v1643_v18 = vadd.f32 %v1642_v27, %v4344_v46  ;;  %v1692_v15 = vadd.f32 %v1691_v49, %v4344_v46  ;;  %v4148_v52 = vld [vmem:[%s3061_s30 + $0x20] sm:$0xff]  ;;  %v4152_v49 = vld [vmem:[%s3061_s30 + $0x28] sm:$0xff] }
 0x37c   : > { %v2146_v27 = vrot.slane %v4148_v52, 4 }
 0x37d   : > { %v1728_v37 = vmax.f32 %v1643_v18, 0.0  ;;  %v1729_v35 = vmax.f32 %v1692_v15, 0.0  ;;  %v4351_v18 = vld [vmem:[#allocation16_spill] sm:$0xff] }
 0x37f   : > { %v1859_v9 = vmul.f32 %v3929_v29, %v1728_v37  ;;  %v1860_v20 = vmul.f32 %v3933_v40, %v1729_v35  ;;  %v4346_v29 = vld [vmem:[#allocation8_spill] sm:$0xff]  ;;  %v2903_v37 = vpop.eup %2902 }
 0x380   : > { %vm2163_vm10 = vweird.f32 %v2903_v37 }
 0x381   : > { %v1864_v11 = vpack.c.bf16 %v1860_v20, %v1859_v9  ;;  %v2147_v9 = vadd.f32 %v4148_v52, %v2146_v27 }
 0x382   : > { %v1645_v33 = vpop.f32.mrf.mxu2  ;;  %v1694_v43 = vpop.f32.mrf.mxu3 }
 0x383   : > { %1868 = vst [vmem:[#allocation2 + $0x38] sm:$0xff] %v1864_v11  ;;  %v1646_v36 = vadd.f32 %v1645_v33, %v4345_v12  ;;  %v1695_v50 = vadd.f32 %v1694_v43, %v4345_v12  ;;  %v2159_v43 = vmul.f32 8.0, %v2903_v37  ;;  %v4352_v12 = vld [vmem:[#allocation14_spill] sm:$0xff] }
 0x385   : > { %v1730_v6 = vmax.f32 %v1646_v36, 0.0  ;;  %v1731_v10 = vmax.f32 %v1695_v50, 0.0 }
 0x387   : > { %v1871_v54 = vmul.f32 %v3935_v1, %v1730_v6  ;;  %v1872_v14 = vmul.f32 %v3943_v55, %v1731_v10  ;;  %v4161_v6 = vpop.permute.xlu1 %1978 }
 0x389   : > { %v1879_v32 = vpack.c.bf16 %v1872_v14, %v1871_v54  ;;  %v2148_v14 = vrot.slane %v2147_v9, 2 }
 0x38a   : > { %v1647_v2 = vpop.f32.mrf.mxu2  ;;  %v1696_v24 = vpop.f32.mrf.mxu3 }
 0x38b   : > { %1883 = vst [vmem:[#allocation2 + $0x40] sm:$0xff] %v1879_v32  ;;  %v1648_v40 = vadd.f32 %v1647_v2, %v4346_v29  ;;  %v1697_v3 = vadd.f32 %v1696_v24, %v4346_v29  ;;  %v2160_v2 = vsub.f32 1.0, %v2159_v43 }
 0x38d   : > { %v1732_v16 = vmax.f32 %v1648_v40, 0.0  ;;  %v1733_v7 = vmax.f32 %v1697_v3, 0.0  ;;  %v2149_v3 = vadd.f32 %v2148_v14, %v2147_v9 }
 0x38f   : > { %v1873_v23 = vmul.f32 %v3935_v1, %v1732_v16  ;;  %v1874_v62 = vmul.f32 %v3943_v55, %v1733_v7 }
 0x391   : > { %v1880_v51 = vpack.c.bf16 %v1874_v62, %v1873_v23  ;;  %v4165_v23 = vpop.permute.xlu2 %1986 }
 0x392   : > { %v1650_v25 = vpop.f32.mrf.mxu2  ;;  %v1699_v28 = vpop.f32.mrf.mxu3 }
 0x393   : > { %1884 = vst [vmem:[#allocation2 + $0x48] sm:$0xff] %v1880_v51  ;;  %v1651_v8 = vadd.f32 %v1650_v25, %v4347_v34  ;;  %v1700_v31 = vadd.f32 %v1699_v28, %v4347_v34  ;;  %v2161_v51 = vmul.f32 %v2903_v37, %v2160_v2  ;;  %v4353_v25 = vld [vmem:[#allocation13_spill] sm:$0xff] }
 0x395   : > { %v1734_v45 = vmax.f32 %v1651_v8, 0.0  ;;  %v1735_v0 = vmax.f32 %v1700_v31, 0.0  ;;  %v2172_v8 = vpop.permute.xlu1 %2171 }
 0x397   : > { %v1875_v26 = vmul.f32 %v3935_v1, %v1734_v45  ;;  %v1876_v17 = vmul.f32 %v3943_v55, %v1735_v0  ;;  %v2150_v0 = vrot.slane %v2149_v3, 1 }
 0x399   : > { %v1881_v53 = vpack.c.bf16 %v1876_v17, %v1875_v26  ;;  %v2162_v17 = vadd.f32 %v2903_v37, %v2161_v51 }
 0x39a   : > { %v1652_v13 = vpop.f32.mrf.mxu2  ;;  %v1701_v39 = vpop.f32.mrf.mxu3 }
 0x39b   : > { %1885 = vst [vmem:[#allocation2 + $0x50] sm:$0xff] %v1881_v53  ;;  %v1653_v19 = vadd.f32 %v1652_v13, %v4348_v38  ;;  %v1702_v59 = vadd.f32 %v1701_v39, %v4348_v38  ;;  %v2151_v38 = vadd.f32 %v2150_v0, %v2149_v3 }
 0x39d   : > { %v1736_v42 = vmax.f32 %v1653_v19, 0.0  ;;  %v1737_v4 = vmax.f32 %v1702_v59, 0.0 }
 0x39f   : > { %v1877_v21 = vmul.f32 %v3935_v1, %v1736_v42  ;;  %v1878_v47 = vmul.f32 %v3943_v55, %v1737_v4  ;;  %v2152_v1 = vrot.slane %v4152_v49, 4  ;;  %v4350_v55 = vld [vmem:[#allocation15_spill] sm:$0xff]  ;;  %v2164_v4 = vsel %vm2163_vm10, %v2903_v37, %v2162_v17 }
 0x3a1   : > { %v1882_v48 = vpack.c.bf16 %v1878_v47, %v1877_v21  ;;  %v2153_v33 = vadd.f32 %v4152_v49, %v2152_v1  ;;  %v4171_v21 = vpop.permute.xlu2 %2176  ;;  %v4354_v47 = vld [vmem:[#allocation12_spill] sm:$0xff] }
 0x3a2   : > { %v1655_v58 = vpop.f32.mrf.mxu2  ;;  %v1704_v63 = vpop.f32.mrf.mxu3 }
 0x3a3   : > { %1886 = vst [vmem:[#allocation2 + $0x58] sm:$0xff] %v1882_v48  ;;  %v1656_v57 = vadd.f32 %v1655_v58, %v4349_v44  ;;  %v1705_v56 = vadd.f32 %v1704_v63, %v4349_v44  ;;  %v2154_v32 = vrot.slane %v2153_v33, 2  ;;  %v4175_v44 = vmul.f32 %v2164_v4, %v2151_v38 }
 0x3a5   : > { %v1738_v61 = vmax.f32 %v1656_v57, 0.0  ;;  %v1739_v41 = vmax.f32 %v1705_v56, 0.0  ;;  %v2155_v62 = vadd.f32 %v2154_v32, %v2153_v33  ;;  %v2188_v56 = vpop.permute.xlu1 %2187 }
 0x3a7   : > { %v1889_v46 = vmul.f32 %v4350_v55, %v1738_v61  ;;  %v1890_v15 = vmul.f32 %v4351_v18, %v1739_v41  ;;  %v2156_v26 = vrot.slane %v2155_v62, 1  ;;  %v4179_v61 = vstv %s1021_s16 }
 0x3a9   : > { %v1897_v35 = vpack.c.bf16 %v1890_v15, %v1889_v46  ;;  %v2157_v42 = vadd.f32 %v2156_v26, %v2155_v62  ;;  %v2179_v46 = vmul.f32 %v2172_v8, %v4175_v44  ;;  %v2196_v15 = vmul.f32 %v4179_v61, %v2188_v56  ;;  %v2803_v26 = vld [vmem:[#allocation2 + $0x54] sm:$0xf] }
 0x3aa   : > { %v1657_v20 = vpop.f32.mrf.mxu2  ;;  %v1706_v11 = vpop.f32.mrf.mxu3  ;;  %v2804_v51 = vld [vmem:[#allocation2 + $0x54] sm:$0xf0] }
 0x3ab   : > { %1901 = vst [vmem:[#allocation2 + $0x60] sm:$0xff] %v1897_v35  ;;  %v1658_v36 = vadd.f32 %v1657_v20, %v4352_v12  ;;  %v1707_v50 = vadd.f32 %v1706_v11, %v4352_v12  ;;  %v4177_v57 = vmul.f32 %v2164_v4, %v2157_v42  ;;  %v2207_v35 = vpop.permute.xlu2 %2206  ;;  %v2198_v9 = vadd.f32 %v2196_v15, %v2179_v46 }
 0x3ad   : > { %v1740_v10 = vmax.f32 %v1658_v36, 0.0  ;;  %v1741_v54 = vmax.f32 %v1707_v50, 0.0  ;;  %v2180_v37 = vmul.f32 %v2172_v8, %v4177_v57  ;;  %v2227_v11 = vpop.permute.xlu1 %2226  ;;  %v2214_v43 = vadd.f32 %v2207_v35, %v2198_v9  ;;  %v2732_v8 = vld [vmem:[#allocation2 + $0x50] sm:$0xf] }
 0x3ae   : > { %v2733_v0 = vor.u32 %v2804_v51, %v2732_v8  ;;  %v2182_v51 = vmul.f32 %v4171_v21, %v4177_v57 }
 0x3af   : > { %v1891_v24 = vmul.f32 %v4350_v55, %v1740_v10  ;;  %v1892_v29 = vmul.f32 %v4351_v18, %v1741_v54  ;;  %v2199_v20 = vadd.f32 %v2196_v15, %v2180_v37 }
 0x3b1   : > { %v1898_v40 = vpack.c.bf16 %v1892_v29, %v1891_v24  ;;  %v2215_v10 = vadd.f32 %v2207_v35, %v2199_v20  ;;  %v4186_v24 = vmax.f32 %v2214_v43, 0.0  ;;  %v2799_v20 = vld [vmem:[#allocation2 + $0x34] sm:$0xf] }
 0x3b2   : > { %v1660_v16 = vpop.f32.mrf.mxu2  ;;  %v1709_v7 = vpop.f32.mrf.mxu3  ;;  %v2740_v29 = vld [vmem:[#allocation2 + $0x60] sm:$0xf] }
 0x3b3   : > { %1902 = vst [vmem:[#allocation2 + $0x68] sm:$0xff] %v1898_v40  ;;  %v1661_v28 = vadd.f32 %v1660_v16, %v4353_v25  ;;  %v1710_v34 = vadd.f32 %v1709_v7, %v4353_v25  ;;  %v2236_v40 = vpop.permute.xlu2 %2235  ;;  %v4188_v3 = vmax.f32 %v2215_v10, 0.0  ;;  %v2805_v7 = vld [vmem:[#allocation2 + $0x64] sm:$0xf]  ;;  %v4190_v25 = vpop.permute.xlu0 %2192  ;;  %v2244_v38 = vperm.slane %v4186_v24, 1 }
 0x3b5   : > { %v1742_v31 = vmax.f32 %v1661_v28, 0.0  ;;  %v1743_v45 = vmax.f32 %v1710_v34, 0.0  ;;  %v2734_v28 = vld [vmem:[#allocation2 + $0x58] sm:$0xf0]  ;;  %v2229_v34 = vperm.slane %v4186_v24, 0  ;;  %v2245_v42 = vperm.slane %v4188_v3, 1 }
 0x3b6   : > { %v2737_v17 = vor.u32 %v2803_v26, %v2734_v28  ;;  %v2255_v35 = vperm.slane %v4188_v3, 2  ;;  %v2702_v28 = vld [vmem:[#allocation2 + $0x18] sm:$0xf0]  ;;  %v2794_v26 = vld [vmem:[#allocation2 + $0x4] sm:$0xf0] }
 0x3b7   : > { %v1893_v53 = vmul.f32 %v4350_v55, %v1742_v31  ;;  %v1894_v13 = vmul.f32 %v4351_v18, %v1743_v45  ;;  %v2242_v31 = vpop.permute.xlu1 %2241  ;;  %v2230_v45 = vperm.slane %v4188_v3, 0 }
 0x3b8   : > { %v2247_v37 = vmul.f32 %v2245_v42, %v2242_v31 }
 0x3b9   : > { %v1899_v39 = vpack.c.bf16 %v1894_v13, %v1893_v53  ;;  %v2802_v53 = vld [vmem:[#allocation2 + $0x44] sm:$0xf0]  ;;  %v2726_v13 = vld [vmem:[#allocation2 + $0x48] sm:$0xf0] }
 0x3ba   : > { %v1662_v19 = vpop.f32.mrf.mxu2  ;;  %v1711_v59 = vpop.f32.mrf.mxu3  ;;  %v2806_v32 = vld [vmem:[#allocation2 + $0x64] sm:$0xf0]  ;;  %v2742_v2 = vld [vmem:[#allocation2 + $0x68] sm:$0xf0] }
 0x3bb   : > { %1903 = vst [vmem:[#allocation2 + $0x70] sm:$0xff] %v1899_v39  ;;  %v1663_v48 = vadd.f32 %v1662_v19, %v4354_v47  ;;  %v1712_v60 = vadd.f32 %v1711_v59, %v4354_v47  ;;  %v2741_v16 = vor.u32 %v2806_v32, %v2740_v29  ;;  %v2745_v62 = vor.u32 %v2805_v7, %v2742_v2  ;;  %v2724_v19 = vld [vmem:[#allocation2 + $0x40] sm:$0xf]  ;;  %v2801_v47 = vld [vmem:[#allocation2 + $0x44] sm:$0xf]  ;;  %v2252_v46 = vpop.permute.xlu0 %2251 }
 0x3bc   : > { %v2231_v39 = vmul.f32 %v2229_v34, %v2227_v11  ;;  %v2232_v59 = vmul.f32 %v2230_v45, %v2227_v11  ;;  %v2725_v4 = vor.u32 %v2802_v53, %v2724_v19  ;;  %v2257_v2 = vmul.f32 %v2255_v35, %v2252_v46  ;;  %v2796_v7 = vld [vmem:[#allocation2 + $0x14] sm:$0xf0]  ;;  %v2003_v34 = vld [vmem:[%s4289_s6 + $0x8] sm:$0xf]  ;;  %v2692_v19 = vld [vmem:[#allocation2] sm:$0xf] }
 0x3bd   : > { %v1744_v58 = vmax.f32 %v1663_v48, 0.0  ;;  %v1745_v63 = vmax.f32 %v1712_v60, 0.0  ;;  %v2729_v48 = vor.u32 %v2801_v47, %v2726_v13  ;;  %v2800_v60 = vld [vmem:[#allocation2 + $0x34] sm:$0xf0]  ;;  %v2197_v45 = vmul.f32 %v4179_v61, %v4190_v25 }
 0x3be   : > { %v2238_v56 = vadd.f32 %v2236_v40, %v2231_v39  ;;  %v2239_v15 = vadd.f32 %v2236_v40, %v2232_v59  ;;  %v2797_v40 = vld [vmem:[#allocation2 + $0x24] sm:$0xf]  ;;  %v2795_v39 = vld [vmem:[#allocation2 + $0x14] sm:$0xf]  ;;  %v2025_v59 = vunpack.c.l.b16 %v2003_v34  ;;  %v2693_v42 = vor.u32 %v2794_v26, %v2692_v19 }
 0x3bf   : > { %v1895_v41 = vmul.f32 %v4350_v55, %v1744_v58  ;;  %v1896_v27 = vmul.f32 %v4351_v18, %v1745_v63  ;;  %v2262_v58 = vpop.permute.xlu2 %2261  ;;  %v2718_v63 = vld [vmem:[#allocation2 + $0x38] sm:$0xf0]  ;;  %v2272_v43 = vpop.permute.xlu1 %2271  ;;  %v2284_v47 = vperm.slane %v4186_v24, 5 }
 0x3c0   : > { %v2721_v11 = vor.u32 %v2799_v20, %v2718_v63  ;;  %v2249_v32 = vadd.f32 %v2247_v37, %v2239_v15  ;;  %v2027_v15 = vpack.c.b16 %v2025_v59, %v2025_v59  ;;  %v2294_v20 = vperm.slane %v4186_v24, 6 }
 0x3c1   : > { %v1900_v1 = vpack.c.bf16 %v1896_v27, %v1895_v41  ;;  %v2246_v41 = vmul.f32 %v2244_v38, %v2242_v31  ;;  %v2254_v27 = vperm.slane %v4186_v24, 2  ;;  %v2274_v31 = vperm.slane %v4186_v24, 4 }
 0x3c2   : > { %v2748_v33 = vld [vmem:[#allocation2 + $0x70] sm:$0xf]  ;;  %v2807_v36 = vld [vmem:[#allocation2 + $0x74] sm:$0xf]  ;;  %v2259_v53 = vadd.f32 %v2257_v2, %v2249_v32  ;;  %v2705_v38 = vor.u32 %v2795_v39, %v2702_v28 }
 0x3c3   : > { %1904 = vst [vmem:[#allocation2 + $0x78] sm:$0xff] %v1900_v1  ;;  %v2716_v1 = vld [vmem:[#allocation2 + $0x30] sm:$0xf]  ;;  %v2256_v10 = vmul.f32 %v2254_v27, %v2252_v46  ;;  %v2276_v61 = vmul.f32 %v2274_v31, %v2272_v43  ;;  %v2793_v27 = vld [vmem:[#allocation2 + $0x4] sm:$0xf] }
 0x3c4   : > { %v2717_v9 = vor.u32 %v2800_v60, %v2716_v1  ;;  %v2792_v46 = vld [vmem:[%s4289_s6] sm:$0xff] }
 0x3c7   : > { %v2212_v57 = vpop.permute.xlu2 %2211  ;;  %v2282_v63 = vpop.permute.xlu1 %2281 }
 0x3c8   : > { %v2286_v35 = vmul.f32 %v2284_v47, %v2282_v63 }
 0x3ca   : > { %v2808_v12 = vld [vmem:[#allocation2 + $0x74] sm:$0xf0]  ;;  %v2750_v50 = vld [vmem:[#allocation2 + $0x78] sm:$0xf0] }
 0x3cb   : > { %v2749_v54 = vor.u32 %v2808_v12, %v2748_v33  ;;  %v2753_v14 = vor.u32 %v2807_v36, %v2750_v50  ;;  %v2798_v33 = vld [vmem:[#allocation2 + $0x24] sm:$0xf0]  ;;  %v2710_v12 = vld [vmem:[#allocation2 + $0x28] sm:$0xf0]  ;;  %v2264_v36 = vperm.slane %v4186_v24, 3  ;;  %v2248_v50 = vadd.f32 %v2246_v41, %v2238_v56 }
 0x3cc   : > { %v2285_v56 = vperm.slane %v4188_v3, 5 }
 0x3cd   : > { %2110 = vmatpush.bf16.msrb.mxu0 %v2749_v54  ;;  %2809 = vmatpush.bf16.msrb.mxu2 %v2749_v54  ;;  %v2708_v54 = vld [vmem:[#allocation2 + $0x20] sm:$0xf]  ;;  %v2266_v8 = vmul.f32 %v2264_v36, %v2262_v58  ;;  %v2295_v36 = vperm.slane %v4188_v3, 6 }
 0x3ce   : > { %2128 = vmatpush.bf16.msrb.mxu1 %v2753_v14  ;;  %2817 = vmatpush.bf16.msrb.mxu3 %v2753_v14  ;;  %v2265_v14 = vperm.slane %v4188_v3, 3  ;;  %v2709_v29 = vor.u32 %v2798_v33, %v2708_v54  ;;  %v2287_v33 = vmul.f32 %v2285_v56, %v2282_v63  ;;  %v2304_v54 = vperm.slane %v4186_v24, 7 }
 0x3d1   : > { %2111 = vmatpush.bf16.msrb.mxu0 %v2741_v16  ;;  %2810 = vmatpush.bf16.msrb.mxu2 %v2741_v16  ;;  %v2713_v16 = vor.u32 %v2797_v40, %v2710_v12 }
 0x3d2   : > { %2129 = vmatpush.bf16.msrb.mxu1 %v2745_v62  ;;  %2818 = vmatpush.bf16.msrb.mxu3 %v2745_v62  ;;  %v2181_v62 = vmul.f32 %v4171_v21, %v4175_v44  ;;  %v2700_v44 = vld [vmem:[#allocation2 + $0x10] sm:$0xf]  ;;  %v2275_v21 = vperm.slane %v4188_v3, 4 }
 0x3d3   : > { %v2701_v13 = vor.u32 %v2796_v7, %v2700_v44  ;;  %v2312_v7 = vpop.permute.xlu1 %2311 }
 0x3d4   : > { %v2200_v25 = vadd.f32 %v2197_v45, %v2181_v62  ;;  %v2277_v60 = vmul.f32 %v2275_v21, %v2272_v43  ;;  %v2292_v43 = vpop.permute.xlu0 %2291 }
 0x3d5   : > { %2112 = vmatpush.bf16.msrb.mxu0 %v2733_v0  ;;  %2811 = vmatpush.bf16.msrb.mxu2 %v2733_v0  ;;  %v2258_v0 = vadd.f32 %v2256_v10, %v2248_v50  ;;  %v2302_v50 = vpop.permute.xlu2 %2301  ;;  %v2296_v32 = vmul.f32 %v2294_v20, %v2292_v43 }
 0x3d6   : > { %2130 = vmatpush.bf16.msrb.mxu1 %v2737_v17  ;;  %2819 = vmatpush.bf16.msrb.mxu3 %v2737_v17  ;;  %v2267_v17 = vmul.f32 %v2265_v14, %v2262_v58  ;;  %v2201_v58 = vadd.f32 %v2197_v45, %v2182_v51  ;;  %v2216_v37 = vadd.f32 %v2212_v57, %v2200_v25 }
 0x3d7   : > { %v2306_v62 = vmul.f32 %v2304_v54, %v2302_v50 }
 0x3d8   : > { %v2269_v41 = vadd.f32 %v2267_v17, %v2259_v53  ;;  %v4218_v10 = vmax.f32 %v2216_v37, 0.0 }
 0x3d9   : > { %2113 = vmatpush.bf16.msrb.mxu0 %v2725_v4  ;;  %2812 = vmatpush.bf16.msrb.mxu2 %v2725_v4  ;;  %v2694_v4 = vld [vmem:[#allocation2 + $0x8] sm:$0xf0] }
 0x3da   : > { %2131 = vmatpush.bf16.msrb.mxu1 %v2729_v48  ;;  %2820 = vmatpush.bf16.msrb.mxu3 %v2729_v48  ;;  %v2268_v48 = vadd.f32 %v2266_v8, %v2258_v0  ;;  %v2697_v1 = vor.u32 %v2793_v27, %v2694_v4  ;;  %v2279_v12 = vadd.f32 %v2277_v60, %v2269_v41  ;;  %v2314_v51 = vperm.slane %v4218_v10, 0 }
 0x3db   : > { %v2324_v24 = vperm.slane %v4218_v10, 1  ;;  %v2334_v53 = vperm.slane %v4218_v10, 2  ;;  %v2344_v4 = vperm.slane %v4218_v10, 3  ;;  %v2354_v63 = vperm.slane %v4218_v10, 4 }
 0x3dc   : > { %v2289_v40 = vadd.f32 %v2287_v33, %v2279_v12  ;;  %v2316_v45 = vmul.f32 %v2314_v51, %v2312_v7  ;;  %v2342_v47 = vpop.permute.xlu0 %2341  ;;  %v2364_v37 = vperm.slane %v4218_v10, 5  ;;  %v2374_v12 = vperm.slane %v4218_v10, 6 }
 0x3dd   : > { %2114 = vmatpush.bf16.msrb.mxu0 %v2717_v9  ;;  %2813 = vmatpush.bf16.msrb.mxu2 %v2717_v9  ;;  %v2278_v9 = vadd.f32 %v2276_v61, %v2268_v48  ;;  %v2346_v56 = vmul.f32 %v2344_v4, %v2342_v47 }
 0x3de   : > { %2132 = vmatpush.bf16.msrb.mxu1 %v2721_v11  ;;  %2821 = vmatpush.bf16.msrb.mxu3 %v2721_v11  ;;  %v2217_v11 = vadd.f32 %v2212_v57, %v2201_v58 }
 0x3df   : > { %v2288_v14 = vadd.f32 %v2286_v35, %v2278_v9 }
 0x3e0   : > { %v4221_v2 = vmax.f32 %v2217_v11, 0.0 }
 0x3e1   : > { %2115 = vmatpush.bf16.msrb.mxu0 %v2709_v29  ;;  %2814 = vmatpush.bf16.msrb.mxu2 %v2709_v29  ;;  %v2305_v29 = vperm.slane %v4188_v3, 7  ;;  %v2298_v28 = vadd.f32 %v2296_v32, %v2288_v14  ;;  %v2322_v3 = vpop.permute.xlu2 %2321 }
 0x3e2   : > { %2133 = vmatpush.bf16.msrb.mxu1 %v2713_v16  ;;  %2822 = vmatpush.bf16.msrb.mxu3 %v2713_v16  ;;  %v2297_v16 = vmul.f32 %v2295_v36, %v2292_v43  ;;  %v2315_v8 = vperm.slane %v4221_v2, 0  ;;  %v2325_v17 = vperm.slane %v4221_v2, 1  ;;  %v2326_v57 = vmul.f32 %v2324_v24, %v2322_v3 }
 0x3e3   : > { %v2307_v34 = vmul.f32 %v2305_v29, %v2302_v50  ;;  %v2308_v0 = vadd.f32 %v2306_v62, %v2298_v28  ;;  %v2335_v19 = vperm.slane %v4221_v2, 2  ;;  %v2345_v48 = vperm.slane %v4221_v2, 3 }
 0x3e4   : > { %v2299_v31 = vadd.f32 %v2297_v16, %v2289_v40  ;;  %v2317_v44 = vmul.f32 %v2315_v8, %v2312_v7  ;;  %v2327_v39 = vmul.f32 %v2325_v17, %v2322_v3  ;;  %v2355_v27 = vperm.slane %v4221_v2, 4 }
 0x3e5   : > { %2116 = vmatpush.bf16.msrb.mxu0 %v2701_v13  ;;  %2815 = vmatpush.bf16.msrb.mxu2 %v2701_v13  ;;  %v2318_v21 = vadd.f32 %v2316_v45, %v2308_v0  ;;  %v2365_v20 = vperm.slane %v4221_v2, 5  ;;  %v2375_v54 = vperm.slane %v4221_v2, 6  ;;  %v2384_v40 = vperm.slane %v4218_v10, 7 }
 0x3e6   : > { %2134 = vmatpush.bf16.msrb.mxu1 %v2705_v38  ;;  %2823 = vmatpush.bf16.msrb.mxu3 %v2705_v38  ;;  %v2309_v26 = vadd.f32 %v2307_v34, %v2299_v31  ;;  %v2332_v38 = vpop.permute.xlu1 %2331  ;;  %v2385_v51 = vperm.slane %v4221_v2, 7 }
 0x3e7   : > { %v2328_v59 = vadd.f32 %v2326_v57, %v2318_v21  ;;  %v2337_v25 = vmul.f32 %v2335_v19, %v2332_v38 }
 0x3e8   : > { %v2319_v13 = vadd.f32 %v2317_v44, %v2309_v26  ;;  %v2396_v44 = vpop.permute.xlu0 %2395 }
 0x3e9   : > { %2117 = vmatpush.bf16.msrb.mxu0 %v2693_v42  ;;  %2816 = vmatpush.bf16.msrb.mxu2 %v2693_v42  ;;  %v2336_v42 = vmul.f32 %v2334_v53, %v2332_v38  ;;  %v2352_v60 = vpop.permute.xlu2 %2351 }
 0x3ea   : > { %2135 = vmatpush.bf16.msrb.mxu1 %v2697_v1  ;;  %2824 = vmatpush.bf16.msrb.mxu3 %v2697_v1  ;;  %v2329_v61 = vadd.f32 %v2327_v39, %v2319_v13  ;;  %v2347_v1 = vmul.f32 %v2345_v48, %v2342_v47  ;;  %v2357_v9 = vmul.f32 %v2355_v27, %v2352_v60 }
 0x3eb   : > { %v2338_v58 = vadd.f32 %v2336_v42, %v2328_v59 }
 0x3ec   : > { %2118 = vmatmul.bf16.vlgmr.msrb.gmra.mxu0 %v2792_v46  ;;  %2123 = vmatmul.bf16.vlgmr.msrb.gmra.mxu2 %v2027_v15  ;;  %v2339_v41 = vadd.f32 %v2337_v25, %v2329_v61 }
 0x3ed   : > { %2136 = vmatmul.bf16.vlgmr.msrb.gmra.mxu1 %v2792_v46  ;;  %2141 = vmatmul.bf16.vlgmr.msrb.gmra.mxu3 %v2027_v15  ;;  %v2356_v15 = vmul.f32 %v2354_v63, %v2352_v60  ;;  %v2348_v35 = vadd.f32 %v2346_v56, %v2338_v58 }
 0x3ee   : > { %v2362_v46 = vpop.permute.xlu1 %2361  ;;  %v2349_v11 = vadd.f32 %v2347_v1, %v2339_v41 }
 0x3ef   : > { %v2366_v33 = vmul.f32 %v2364_v37, %v2362_v46  ;;  %v2358_v43 = vadd.f32 %v2356_v15, %v2348_v35  ;;  %v2367_v36 = vmul.f32 %v2365_v20, %v2362_v46 }
 0x3f0   : > { %v2359_v50 = vadd.f32 %v2357_v9, %v2349_v11 }
 0x3f1   : > { %v2372_v14 = vpop.permute.xlu2 %2371  ;;  %v2368_v32 = vadd.f32 %v2366_v33, %v2358_v43  ;;  %v1989_v43 = vmul.f32 %v4161_v6, %v4350_v55 }
 0x3f2   : > { %v2376_v29 = vmul.f32 %v2374_v12, %v2372_v14  ;;  %v2369_v16 = vadd.f32 %v2367_v36, %v2359_v50  ;;  %v2377_v7 = vmul.f32 %v2375_v54, %v2372_v14  ;;  %v1990_v54 = vmul.f32 %v4161_v6, %v4351_v18 }
 0x3f4   : > { %v2378_v28 = vadd.f32 %v2376_v29, %v2368_v32  ;;  %v2379_v8 = vadd.f32 %v2377_v7, %v2369_v16  ;;  %v1995_v7 = vadd.f32 %v1989_v43, %v3961_v22  ;;  %v1994_v22 = vmul.f32 %v4165_v23, %v4351_v18 }
 0x3f6   : > { %v2382_v62 = vpop.permute.xlu1 %2381  ;;  %v2000_v18 = vadd.f32 %v1994_v22, %v3977_v5 }
 0x3f7   : > { %v2386_v34 = vmul.f32 %v2384_v40, %v2382_v62  ;;  %v2387_v31 = vmul.f32 %v2385_v51, %v2382_v62 }
 0x3f9   : > { %v2388_v45 = vadd.f32 %v2386_v34, %v2378_v28  ;;  %v2389_v0 = vadd.f32 %v2387_v31, %v2379_v8  ;;  %v2416_v42 = vpop.permute.xlu2 %2415  ;;  %v4359_v28 = vld [vmem:[#allocation17_spill] sm:$0xff]  ;;  %v1993_v31 = vmul.f32 %v4165_v23, %v4350_v55 }
 0x3fa   : > { %v2418_v61 = vperm.slane %v2416_v42, 0  ;;  %v1996_v34 = vadd.f32 %v1990_v54, %v4359_v28 }
 0x3fb   : > { %v2390_v24 = vmax.f32 %v2388_v45, 0.0  ;;  %v2391_v26 = vmax.f32 %v2389_v0, 0.0 }
 0x3fd   : > { %v2398_v17 = vmul.f32 %v2396_v44, %v2390_v24  ;;  %v2399_v3 = vmul.f32 %v2396_v44, %v2391_v26 }
 0x3ff   : > { %v2400_v21 = vrot.slane %v2398_v17, 4  ;;  %v2406_v57 = vrot.slane %v2399_v3, 4 }
 0x401   : > { %v2401_v53 = vadd.f32 %v2400_v21, %v2398_v17  ;;  %v2407_v10 = vadd.f32 %v2406_v57, %v2399_v3  ;;  %v4360_v21 = vld [vmem:[#allocation4_spill] sm:$0xff] }
 0x402   : > { %v2471_v57 = vperm.slane %v4360_v21, 0 }
 0x403   : > { %v2402_v13 = vrot.slane %v2401_v53, 2  ;;  %v2408_v39 = vrot.slane %v2407_v10, 2 }
 0x405   : > { %v2403_v38 = vadd.f32 %v2402_v13, %v2401_v53  ;;  %v2409_v19 = vadd.f32 %v2408_v39, %v2407_v10  ;;  %v2918_v53 = vld [vmem:[%s3061_s30] sm:$0xff]  ;;  %v1999_v13 = vadd.f32 %v1993_v31, %v3975_v30  ;;  %v4361_v39 = vld [vmem:[#allocation5_spill] sm:$0xff] }
 0x406   : > { %v2472_v55 = vperm.slane %v4361_v39, 0 }
 0x407   : > { %v2404_v2 = vrot.slane %v2403_v38, 1  ;;  %v2410_v59 = vrot.slane %v2409_v19, 1 }
 0x409   : > { %v2405_v4 = vadd.f32 %v2404_v2, %v2403_v38  ;;  %v2411_v25 = vadd.f32 %v2410_v59, %v2409_v19  ;;  %v2919_v38 = vld [vmem:[%s3061_s30 + $0x8] sm:$0xff] }
 0x40b   : > { %v2419_v47 = vadd.f32 %v2418_v61, %v2405_v4  ;;  %v2420_v48 = vadd.f32 %v2418_v61, %v2411_v25 }
 0x40d   : > { %v2754_v60 = vmul.f32 -1.442695, %v2419_v47  ;;  %v2755_v58 = vmul.f32 -1.442695, %v2420_v48  ;;  %v4362_v48 = vld [vmem:[#allocation18_spill] sm:$0xff] }
 0x40f   : > { %2904 = vpow2.f32 %v2754_v60 }
 0x410   : > { %2906 = vpow2.f32 %v2755_v58 }
 0x415   : > { %v2905_v63 = vpop.eup %2904 }
 0x416   : > { %v2907_v56 = vpop.eup %2906  ;;  %v2427_v41 = vadd.f32 1.0, %v2905_v63  ;;  %v4363_v63 = vld [vmem:[#allocation19_spill] sm:$0xff] }
 0x417   : > { %v2428_v27 = vadd.f32 1.0, %v2907_v56 }
 0x418   : > { %2908 = vrcp.f32 %v2427_v41  ;;  %vm2434_vm11 = vweird.f32 %v2427_v41  ;;  %v2440_v33 = vand.u32 2147483648, %v2427_v41  ;;  %v2438_v36 = vand.u32 2147483647, %v2427_v41 }
 0x419   : > { %2910 = vrcp.f32 %v2428_v27  ;;  %vm2449_vm13 = vweird.f32 %v2428_v27  ;;  %v2455_v50 = vand.u32 2147483648, %v2428_v27  ;;  %v2453_v29 = vand.u32 2147483647, %v2428_v27 }
 0x41a   : > { %v2441_v16 = vor.u32 1.1754944e-38, %v2440_v33  ;;  %vm2439_vm1 = vcmp.eq.f32.partialorder %v2438_v36, 8.507059e+37 }
 0x41b   : > { %v2456_v51 = vor.u32 1.1754944e-38, %v2455_v50  ;;  %vm2454_vm2 = vcmp.eq.f32.partialorder %v2453_v29, 8.507059e+37 }
 0x41e   : > { %v2909_v1 = vpop.eup %2908 }
 0x41f   : > { %v2911_v46 = vpop.eup %2910  ;;  %v2430_v15 = vmul.f32 %v2909_v1, %v2427_v41  ;;  %vm2435_vm12 = vweird.f32 %v2909_v1 }
 0x420   : > { %v2445_v37 = vmul.f32 %v2911_v46, %v2428_v27  ;;  %vm2450_vm14 = vweird.f32 %v2911_v46  ;;  %vm4244_vm15 = vmor %vm2434_vm11, %vm2435_vm12 }
 0x421   : > { %v2431_v35 = vsub.f32 1.0, %v2430_v15  ;;  %vm4248_vm0 = vmor %vm2449_vm13, %vm2450_vm14  ;;  %v2920_v15 = vld [vmem:[%s3061_s30 + $0x10] sm:$0xff] }
 0x422   : > { %v2446_v9 = vsub.f32 1.0, %v2445_v37 }
 0x423   : > { %v2432_v20 = vmul.f32 %v2909_v1, %v2431_v35 }
 0x424   : > { %v2447_v11 = vmul.f32 %v2911_v46, %v2446_v9  ;;  %v2921_v9 = vld [vmem:[%s3061_s30 + $0x18] sm:$0xff] }
 0x425   : > { %v2433_v12 = vadd.f32 %v2909_v1, %v2432_v20 }
 0x426   : > { %v2448_v32 = vadd.f32 %v2911_v46, %v2447_v11 }
 0x427   : > { %v2437_v62 = vsel %vm4244_vm15, %v2909_v1, %v2433_v12 }
 0x428   : > { %v2452_v8 = vsel %vm4248_vm0, %v2911_v46, %v2448_v32  ;;  %v2442_v24 = vsel %vm2439_vm1, %v2441_v16, %v2437_v62 }
 0x429   : > { %v2457_v17 = vsel %vm2454_vm2, %v2456_v51, %v2452_v8 }
 0x469   : > { %v2119_v6 = vpop.f32.mrf.mxu0 }
 0x46a   : > { %v2120_v45 = vadd.f32 %v2119_v6, %v1995_v7  ;;  %v2137_v0 = vpop.f32.mrf.mxu1 }
 0x46b   : > { %v2138_v44 = vadd.f32 %v2137_v0, %v1996_v34 }
 0x46c   : > { %v2459_v26 = vmul.f32 %v2442_v24, %v2120_v45 }
 0x46d   : > { %v2460_v3 = vmul.f32 %v2457_v17, %v2138_v44 }
 0x46e   : > { %v2465_v10 = vadd.f32 %v2918_v53, %v2459_v26 }
 0x46f   : > { %v2466_v19 = vadd.f32 %v2919_v38, %v2460_v3  ;;  %v2124_v2 = vpop.f32.mrf.mxu2 }
 0x470   : > { %v2473_v23 = vmul.f32 %v2471_v57, %v2465_v10  ;;  %v2125_v59 = vadd.f32 %v2124_v2, %v1999_v13  ;;  %v2142_v42 = vpop.f32.mrf.mxu3 }
 0x471   : > { %v2474_v4 = vmul.f32 %v2472_v55, %v2466_v19  ;;  %v2143_v61 = vadd.f32 %v2142_v42, %v2000_v18  ;;  %v2121_v25 = vpop.f32.mrf.mxu0 }
 0x472   : > { %2479 = vst [vmem:[%s4113_s19] sm:$0xff] %v2473_v23  ;;  %v2463_v47 = vmul.f32 %v2442_v24, %v2125_v59  ;;  %v2122_v30 = vadd.f32 %v2121_v25, %v4362_v48  ;;  %v2139_v60 = vpop.f32.mrf.mxu1 }
 0x473   : > { %2480 = vst [vmem:[%s4113_s19 + $0x8] sm:$0xff] %v2474_v4  ;;  %v2464_v58 = vmul.f32 %v2457_v17, %v2143_v61  ;;  %v2140_v56 = vadd.f32 %v2139_v60, %v4363_v63 }
 0x474   : > { %v2469_v5 = vadd.f32 %v4148_v52, %v2463_v47  ;;  %v2461_v41 = vmul.f32 %v2442_v24, %v2122_v30 }
 0x475   : > { %v2470_v27 = vadd.f32 %v4152_v49, %v2464_v58  ;;  %v2462_v1 = vmul.f32 %v2457_v17, %v2140_v56 }
 0x476   : > { %v2477_v46 = vmul.f32 %v2471_v57, %v2469_v5  ;;  %v2467_v37 = vadd.f32 %v2920_v15, %v2461_v41 }
 0x477   : > { %v2478_v35 = vmul.f32 %v2472_v55, %v2470_v27  ;;  %v2468_v20 = vadd.f32 %v2921_v9, %v2462_v1  ;;  %v2126_v11 = vpop.f32.mrf.mxu2 }
 0x478   : > { %2483 = vst [vmem:[%s4113_s19 + $0x20] sm:$0xff] %v2477_v46  ;;  %v2475_v33 = vmul.f32 %v2471_v57, %v2467_v37  ;;  %v2144_v43 = vpop.f32.mrf.mxu3 }
 0x479   : > { %2484 = vst [vmem:[%s4113_s19 + $0x28] sm:$0xff] %v2478_v35  ;;  %v2476_v12 = vmul.f32 %v2472_v55, %v2468_v20 }
 0x47a   : > { %2481 = vst [vmem:[%s4113_s19 + $0x10] sm:$0xff] %v2475_v33 }
 0x47b   : > { %2482 = vst [vmem:[%s4113_s19 + $0x18] sm:$0xff] %v2476_v12 }
 0x47c PF: > { %s29_s26 = sadd.s32 1, %s2928_s26  }
 0x47d   : > { %p26_p4 = scmp.ge.s32.totalorder %s29_s26, 4  }
 0x47f   :  { %28 = sbr.rel (!%p26_p4) target bundleno = 3 (0x3), region = 121 }

</bundles_post_ra>
